<compile_context>
chip_gen: v7x
topology: tpu7x:2x2x1
jax: 0.10.0
libtpu: 0.0.40
codegen_flags: <defaults>
</compile_context>

<pallas_src>
import math
import numpy as np
import jax
import jax.numpy as jnp
from jax import lax
from jax.experimental import pallas as pl
from jax.experimental.pallas import tpu as pltpu

# ----------------------- static configuration -----------------------
B           = 8        # batch
X_DIM       = 16       # x_dim (action + state dims)
ACTION_DIM  = 4        # first ACTION_DIM columns get clamped
HIDDEN      = 32       # model MLP hidden width
T_EMB       = 16       # sinusoidal time-embedding width
N_TIMESTEPS = 20       # diffusion steps (small for the demo)
MAX_ACTION  = 1.0
_BIG        = 1e30     # "no clamp" limit for non-action lanes


# ------------------- schedule (baked numpy constants) -------------------
def _make_schedule_np():
    # linear_beta_schedule + DDPM posterior buffers (as registered in the module)
    betas  = np.linspace(1e-4, 2e-2, N_TIMESTEPS, dtype=np.float64)
    alphas = 1.0 - betas
    ac     = np.cumprod(alphas)
    acp    = np.concatenate([[1.0], ac[:-1]])
    post_var = betas * (1.0 - acp) / (1.0 - ac)
    sr    = np.sqrt(1.0 / ac)                            # sqrt_recip_alphas_cumprod
    srm1  = np.sqrt(1.0 / ac - 1.0)                      # sqrt_recipm1_alphas_cumprod
    c1    = betas * np.sqrt(acp) / (1.0 - ac)            # posterior_mean_coef1
    c2    = (1.0 - acp) * np.sqrt(alphas) / (1.0 - ac)   # posterior_mean_coef2
    logv  = np.log(np.clip(post_var, 1e-20, None))       # posterior_log_variance_clipped
    nz    = (np.arange(N_TIMESTEPS) != 0).astype(np.float64)   # nonzero_mask
    coefs = np.stack([sr, srm1, c1, c2], axis=1).astype(np.float32)   # (NT, 4)
    sigma = (nz * np.exp(0.5 * logv)).astype(np.float32)              # (NT,)
    return coefs, sigma


_COEFS, _SIGMA = _make_schedule_np()


# ----------------------------- mish -----------------------------------
def _mish_fast(x):
    # mish(x) = x * tanh(softplus(x)) = x * ((1+e)^2 - 1) / ((1+e)^2 + 1),
    # e = exp(min(x, 30)); 2 EUP ops (exp + approx reciprocal), rest VPU.
    e  = jnp.exp(jnp.minimum(x, 30.0))
    u  = 1.0 + e
    u2 = u * u
    return x * (u2 - 1.0) * pl.reciprocal(u2 + 1.0, approx=True)


def _mish_ref(x):
    # exact PyTorch-style mish for the pure-JAX reference
    return x * jnp.tanh(jax.nn.softplus(x))


# ----------------------------- kernel -------------------------------
def diffusion_sample_kernel(x0_ref, snoise_ref, tbias_ref,
                            w1x_ref, w2_ref, b2_ref, w3_ref, b3_ref, o_ref):
    # ---- loop-invariant values hoisted once (JAX does not CSE broadcasts) ----
    col    = lax.broadcasted_iota(jnp.int32, (1, X_DIM), 1)
    is_act = col < ACTION_DIM
    lo = jnp.where(is_act, -MAX_ACTION, -_BIG)      # per-lane clamp limits
    hi = jnp.where(is_act,  MAX_ACTION,  _BIG)

    w1x = w1x_ref[...]
    w2  = w2_ref[...]
    w3  = w3_ref[...]
    b2  = b2_ref[...]
    b3  = b3_ref[...]

    x = x0_ref[...]
    # Static Python loop: coefficients become immediate constants, indexing of
    # tbias/snoise is static.  Working set is tiny, so unrolling is free.
    for i in range(N_TIMESTEPS):
        t = N_TIMESTEPS - 1 - i                      # reversed(range(n_timesteps))
        sr, srm1, c1, c2 = (float(v) for v in _COEFS[t])

        # ---- eps = model(x, t): MLP; temb[t] @ W1t + b1 prefolded to tbias[t] ----
        h = jnp.dot(x, w1x, preferred_element_type=jnp.float32) + tbias_ref[t]
        h = _mish_fast(h)                                                  # (B, HIDDEN)
        h = _mish_fast(jnp.dot(h, w2, preferred_element_type=jnp.float32) + b2)
        eps = jnp.dot(h, w3, preferred_element_type=jnp.float32) + b3     # (B, X_DIM)

        # predict_start_from_noise (predict_epsilon=True) + clip on action dims
        x_recon = sr * x - srm1 * eps
        x_recon = jnp.minimum(jnp.maximum(x_recon, lo), hi)

        # q_posterior mean + reparameterized sample (p_sample).  Noise was
        # pre-scaled by (t != 0) * exp(0.5 * posterior_log_variance[t]).
        x = c1 * x_recon + c2 * x + snoise_ref[t]

    # sample(): final clamp of the action dims; single unconditional store.
    o_ref[...] = jnp.minimum(jnp.maximum(x, lo), hi)


# ----------------------------- wrapper -------------------------------
def diffusion_sample(x0, noise, temb, params):
    w1x, w1t, b1, w2, b2, w3, b3 = params

    # ---- hoisted per-timestep precompute (constant w.r.t. the reverse loop) ----
    # time-embedding branch of layer 1: tbias[t] = temb[t] @ W1t + b1
    tbias = (temb.reshape(N_TIMESTEPS, T_EMB) @ w1t + b1
             ).reshape(N_TIMESTEPS, 1, HIDDEN)
    # noise pre-scaled by sigma_t = (t != 0) * exp(0.5 * posterior_log_variance[t])
    scaled_noise = jnp.asarray(_SIGMA)[:, None, None] * noise      # (NT, B, X_DIM)

    vmem = pl.BlockSpec(memory_space=pltpu.MemorySpace.VMEM)
    return pl.pallas_call(
        diffusion_sample_kernel,
        out_shape=jax.ShapeDtypeStruct((B, X_DIM), jnp.float32),
        in_specs=[vmem] * 8,          # everything resident; single invocation
        out_specs=vmem,
    )(x0, scaled_noise, tbias, w1x, w2, b2, w3, b3)


# ------------------- time embedding / params construction -------------------
def make_time_embedding():
    half = T_EMB // 2
    freqs = np.exp(-math.log(10000.0) * np.arange(half) / (half - 1))
    ts = np.arange(N_TIMESTEPS)[:, None] * freqs[None, :]
    emb = np.concatenate([np.sin(ts), np.cos(ts)], axis=-1).astype(np.float32)
    return jnp.asarray(emb)                                        # (NT, T_EMB)


def make_params(key):
    ks = jax.random.split(key, 4)
    def lin(k, fan_in, shape):
        return (jax.random.normal(k, shape, jnp.float32) / np.sqrt(fan_in)).astype(jnp.float32)
    w1x = lin(ks[0], X_DIM + T_EMB, (X_DIM, HIDDEN))
    w1t = lin(ks[1], X_DIM + T_EMB, (T_EMB, HIDDEN))
    b1  = jnp.zeros((1, HIDDEN), jnp.float32)
    w2  = lin(ks[2], HIDDEN, (HIDDEN, HIDDEN))
    b2  = jnp.zeros((1, HIDDEN), jnp.float32)
    w3  = lin(ks[3], HIDDEN, (HIDDEN, X_DIM))
    b3  = jnp.zeros((1, X_DIM), jnp.float32)
    return (w1x, w1t, b1, w2, b2, w3, b3)


# -------------------------- pure-JAX reference --------------------------
# Structured exactly like the PyTorch sample()/p_sample_loop()/p_sample() path
# in f32 with exact mish; the kernel differs only by the approx EUP reciprocal
# in mish and MXU matmul rounding, both well inside the tolerance below.
def reference_sample(x0, noise, temb, params):
    w1x, w1t, b1, w2, b2, w3, b3 = params
    x = x0
    for i in range(N_TIMESTEPS):
        t = N_TIMESTEPS - 1 - i
        tb  = temb[t].reshape(1, T_EMB) @ w1t + b1
        h   = _mish_ref(x @ w1x + tb)
        h   = _mish_ref(h @ w2 + b2)
        eps = h @ w3 + b3
        sr, srm1, c1, c2 = (float(v) for v in _COEFS[t])
        x_recon = sr * x - srm1 * eps
        x_recon = x_recon.at[:, :ACTION_DIM].set(
            jnp.clip(x_recon[:, :ACTION_DIM], -MAX_ACTION, MAX_ACTION))
        x = c1 * x_recon + c2 * x + float(_SIGMA[t]) * noise[t]
    x = x.at[:, :ACTION_DIM].set(jnp.clip(x[:, :ACTION_DIM], -MAX_ACTION, MAX_ACTION))
    return x


if __name__ == "__main__":
    key = jax.random.PRNGKey(0)
    k_x0, k_noise, k_params = jax.random.split(key, 3)

    x0 = jax.random.normal(k_x0, (B, X_DIM), jnp.float32)                 # x ~ N(0, I)
    noise = jax.random.normal(k_noise, (N_TIMESTEPS, B, X_DIM), jnp.float32)
    temb = make_time_embedding()
    params = make_params(k_params)

    out = jax.block_until_ready(diffusion_sample(x0, noise, temb, params))
    ref = jax.block_until_ready(reference_sample(x0, noise, temb, params))

    np.testing.assert_allclose(np.asarray(out), np.asarray(ref), rtol=2e-2, atol=2e-2)
    assert out.shape == (B, X_DIM) and np.all(np.isfinite(np.asarray(out)))

    print("KERNEL_OK")
</pallas_src>

<mosaic_0001>
module attributes {stable_mosaic.version = 11 : i64} {
  func.func @diffusion_sample_kernel(%arg0: memref<8x16xf32, #tpu.memory_space<vmem>>, %arg1: memref<20x8x16xf32, #tpu.memory_space<vmem>>, %arg2: memref<20x1x32xf32, #tpu.memory_space<vmem>>, %arg3: memref<16x32xf32, #tpu.memory_space<vmem>>, %arg4: memref<32x32xf32, #tpu.memory_space<vmem>>, %arg5: memref<1x32xf32, #tpu.memory_space<vmem>>, %arg6: memref<32x16xf32, #tpu.memory_space<vmem>>, %arg7: memref<1x16xf32, #tpu.memory_space<vmem>>, %arg8: memref<8x16xf32, #tpu.memory_space<vmem>>) attributes {dimension_semantics = [], scalar_prefetch = 0 : i64, scratch_operands = 0 : i64, tpu.core_type = #tpu.core_type<tc>} {
    %0 = tpu.iota {dimensions = array<i32: 1>} : vector<1x16xi32>
    %c4_i32 = arith.constant 4 : i32
    %1 = vector.broadcast %c4_i32 : i32 to vector<1x16xi32>
    %2 = arith.cmpi slt, %0, %1 : vector<1x16xi32>
    %cst = arith.constant -1.000000e+00 : f32
    %cst_0 = arith.constant -1.000000e+30 : f32
    %3 = vector.broadcast %cst : f32 to vector<1x16xf32>
    %4 = vector.broadcast %cst_0 : f32 to vector<1x16xf32>
    %5 = arith.select %2, %3, %4 : vector<1x16xi1>, vector<1x16xf32>
    %cst_1 = arith.constant 1.000000e+00 : f32
    %cst_2 = arith.constant 1.000000e+30 : f32
    %6 = vector.broadcast %cst_1 : f32 to vector<1x16xf32>
    %7 = vector.broadcast %cst_2 : f32 to vector<1x16xf32>
    %8 = arith.select %2, %6, %7 : vector<1x16xi1>, vector<1x16xf32>
    %c0 = arith.constant 0 : index
    %c0_3 = arith.constant 0 : index
    %9 = vector.load %arg3[%c0, %c0_3] : memref<16x32xf32, #tpu.memory_space<vmem>>, vector<16x32xf32>
    %c0_4 = arith.constant 0 : index
    %c0_5 = arith.constant 0 : index
    %10 = vector.load %arg4[%c0_4, %c0_5] : memref<32x32xf32, #tpu.memory_space<vmem>>, vector<32x32xf32>
    %c0_6 = arith.constant 0 : index
    %c0_7 = arith.constant 0 : index
    %11 = vector.load %arg6[%c0_6, %c0_7] : memref<32x16xf32, #tpu.memory_space<vmem>>, vector<32x16xf32>
    %c0_8 = arith.constant 0 : index
    %c0_9 = arith.constant 0 : index
    %12 = vector.load %arg5[%c0_8, %c0_9] : memref<1x32xf32, #tpu.memory_space<vmem>>, vector<1x32xf32>
    %c0_10 = arith.constant 0 : index
    %c0_11 = arith.constant 0 : index
    %13 = vector.load %arg7[%c0_10, %c0_11] : memref<1x16xf32, #tpu.memory_space<vmem>>, vector<1x16xf32>
    %c0_12 = arith.constant 0 : index
    %c0_13 = arith.constant 0 : index
    %14 = vector.load %arg0[%c0_12, %c0_13] : memref<8x16xf32, #tpu.memory_space<vmem>>, vector<8x16xf32>
    %cst_14 = arith.constant dense<0.000000e+00> : vector<8x32xf32>
    %15 = tpu.matmul %14, %9, %cst_14 {dimension_numbers = #tpu.dot_dimension_numbers<[1], [0], [0], [1], [0, 0, 1, 1], [], []>} : vector<8x16xf32>, vector<16x32xf32>, vector<8x32xf32> -> vector<8x32xf32>
    %c19 = arith.constant 19 : index
    %c0_15 = arith.constant 0 : index
    %c0_16 = arith.constant 0 : index
    %16 = vector.load %arg2[%c19, %c0_15, %c0_16] : memref<20x1x32xf32, #tpu.memory_space<vmem>>, vector<1x1x32xf32>
    %17 = vector.shape_cast %16 : vector<1x1x32xf32> to vector<1x32xf32>
    %18 = vector.broadcast %17 : vector<1x32xf32> to vector<8x32xf32>
    %19 = arith.addf %15, %18 : vector<8x32xf32>
    %cst_17 = arith.constant 3.000000e+01 : f32
    %20 = vector.broadcast %cst_17 : f32 to vector<8x32xf32>
    %21 = arith.minimumf %19, %20 : vector<8x32xf32>
    %22 = math.exp %21 : vector<8x32xf32>
    %cst_18 = arith.constant 1.000000e+00 : f32
    %23 = vector.broadcast %cst_18 : f32 to vector<8x32xf32>
    %24 = arith.addf %23, %22 : vector<8x32xf32>
    %25 = arith.mulf %24, %24 : vector<8x32xf32>
    %cst_19 = arith.constant 1.000000e+00 : f32
    %26 = vector.broadcast %cst_19 : f32 to vector<8x32xf32>
    %27 = arith.subf %25, %26 : vector<8x32xf32>
    %28 = arith.mulf %19, %27 : vector<8x32xf32>
    %cst_20 = arith.constant 1.000000e+00 : f32
    %29 = vector.broadcast %cst_20 : f32 to vector<8x32xf32>
    %30 = arith.addf %25, %29 : vector<8x32xf32>
    %31 = tpu.reciprocal %30 {approx = true} : vector<8x32xf32> -> vector<8x32xf32>
    %32 = arith.mulf %28, %31 : vector<8x32xf32>
    %cst_21 = arith.constant dense<0.000000e+00> : vector<8x32xf32>
    %33 = tpu.matmul %32, %10, %cst_21 {dimension_numbers = #tpu.dot_dimension_numbers<[1], [0], [0], [1], [0, 0, 1, 1], [], []>} : vector<8x32xf32>, vector<32x32xf32>, vector<8x32xf32> -> vector<8x32xf32>
    %34 = vector.broadcast %12 : vector<1x32xf32> to vector<8x32xf32>
    %35 = arith.addf %33, %34 : vector<8x32xf32>
    %cst_22 = arith.constant 3.000000e+01 : f32
    %36 = vector.broadcast %cst_22 : f32 to vector<8x32xf32>
    %37 = arith.minimumf %35, %36 : vector<8x32xf32>
    %38 = math.exp %37 : vector<8x32xf32>
    %cst_23 = arith.constant 1.000000e+00 : f32
    %39 = vector.broadcast %cst_23 : f32 to vector<8x32xf32>
    %40 = arith.addf %39, %38 : vector<8x32xf32>
    %41 = arith.mulf %40, %40 : vector<8x32xf32>
    %cst_24 = arith.constant 1.000000e+00 : f32
    %42 = vector.broadcast %cst_24 : f32 to vector<8x32xf32>
    %43 = arith.subf %41, %42 : vector<8x32xf32>
    %44 = arith.mulf %35, %43 : vector<8x32xf32>
    %cst_25 = arith.constant 1.000000e+00 : f32
    %45 = vector.broadcast %cst_25 : f32 to vector<8x32xf32>
    %46 = arith.addf %41, %45 : vector<8x32xf32>
    %47 = tpu.reciprocal %46 {approx = true} : vector<8x32xf32> -> vector<8x32xf32>
    %48 = arith.mulf %44, %47 : vector<8x32xf32>
    %cst_26 = arith.constant dense<0.000000e+00> : vector<8x16xf32>
    %49 = tpu.matmul %48, %11, %cst_26 {dimension_numbers = #tpu.dot_dimension_numbers<[1], [0], [0], [1], [0, 0, 1, 1], [], []>} : vector<8x32xf32>, vector<32x16xf32>, vector<8x16xf32> -> vector<8x16xf32>
    %50 = vector.broadcast %13 : vector<1x16xf32> to vector<8x16xf32>
    %51 = arith.addf %49, %50 : vector<8x16xf32>
    %cst_27 = arith.constant 1.1064918 : f32
    %52 = vector.broadcast %cst_27 : f32 to vector<8x16xf32>
    %53 = arith.mulf %52, %14 : vector<8x16xf32>
    %cst_28 = arith.constant 0.473628789 : f32
    %54 = vector.broadcast %cst_28 : f32 to vector<8x16xf32>
    %55 = arith.mulf %54, %51 : vector<8x16xf32>
    %56 = arith.subf %53, %55 : vector<8x16xf32>
    %57 = vector.broadcast %5 : vector<1x16xf32> to vector<8x16xf32>
    %58 = arith.maximumf %56, %57 : vector<8x16xf32>
    %59 = vector.broadcast %8 : vector<1x16xf32> to vector<8x16xf32>
    %60 = arith.minimumf %58, %59 : vector<8x16xf32>
    %cst_29 = arith.constant 0.0996526777 : f32
    %61 = vector.broadcast %cst_29 : f32 to vector<8x16xf32>
    %62 = arith.mulf %61, %60 : vector<8x16xf32>
    %cst_30 = arith.constant 0.899887681 : f32
    %63 = vector.broadcast %cst_30 : f32 to vector<8x16xf32>
    %64 = arith.mulf %63, %14 : vector<8x16xf32>
    %65 = arith.addf %62, %64 : vector<8x16xf32>
    %c19_31 = arith.constant 19 : index
    %c0_32 = arith.constant 0 : index
    %c0_33 = arith.constant 0 : index
    %66 = vector.load %arg1[%c19_31, %c0_32, %c0_33] : memref<20x8x16xf32, #tpu.memory_space<vmem>>, vector<1x8x16xf32>
    %67 = vector.shape_cast %66 : vector<1x8x16xf32> to vector<8x16xf32>
    %68 = arith.addf %65, %67 : vector<8x16xf32>
    %cst_34 = arith.constant dense<0.000000e+00> : vector<8x32xf32>
    %69 = tpu.matmul %68, %9, %cst_34 {dimension_numbers = #tpu.dot_dimension_numbers<[1], [0], [0], [1], [0, 0, 1, 1], [], []>} : vector<8x16xf32>, vector<16x32xf32>, vector<8x32xf32> -> vector<8x32xf32>
    %c18 = arith.constant 18 : index
    %c0_35 = arith.constant 0 : index
    %c0_36 = arith.constant 0 : index
    %70 = vector.load %arg2[%c18, %c0_35, %c0_36] : memref<20x1x32xf32, #tpu.memory_space<vmem>>, vector<1x1x32xf32>
    %71 = vector.shape_cast %70 : vector<1x1x32xf32> to vector<1x32xf32>
    %72 = vector.broadcast %71 : vector<1x32xf32> to vector<8x32xf32>
    %73 = arith.addf %69, %72 : vector<8x32xf32>
    %cst_37 = arith.constant 3.000000e+01 : f32
    %74 = vector.broadcast %cst_37 : f32 to vector<8x32xf32>
    %75 = arith.minimumf %73, %74 : vector<8x32xf32>
    %76 = math.exp %75 : vector<8x32xf32>
    %cst_38 = arith.constant 1.000000e+00 : f32
    %77 = vector.broadcast %cst_38 : f32 to vector<8x32xf32>
    %78 = arith.addf %77, %76 : vector<8x32xf32>
    %79 = arith.mulf %78, %78 : vector<8x32xf32>
    %cst_39 = arith.constant 1.000000e+00 : f32
    %80 = vector.broadcast %cst_39 : f32 to vector<8x32xf32>
    %81 = arith.subf %79, %80 : vector<8x32xf32>
    %82 = arith.mulf %73, %81 : vector<8x32xf32>
    %cst_40 = arith.constant 1.000000e+00 : f32
    %83 = vector.broadcast %cst_40 : f32 to vector<8x32xf32>
    %84 = arith.addf %79, %83 : vector<8x32xf32>
    %85 = tpu.reciprocal %84 {approx = true} : vector<8x32xf32> -> vector<8x32xf32>
    %86 = arith.mulf %82, %85 : vector<8x32xf32>
    %cst_41 = arith.constant dense<0.000000e+00> : vector<8x32xf32>
    %87 = tpu.matmul %86, %10, %cst_41 {dimension_numbers = #tpu.dot_dimension_numbers<[1], [0], [0], [1], [0, 0, 1, 1], [], []>} : vector<8x32xf32>, vector<32x32xf32>, vector<8x32xf32> -> vector<8x32xf32>
    %88 = vector.broadcast %12 : vector<1x32xf32> to vector<8x32xf32>
    %89 = arith.addf %87, %88 : vector<8x32xf32>
    %cst_42 = arith.constant 3.000000e+01 : f32
    %90 = vector.broadcast %cst_42 : f32 to vector<8x32xf32>
    %91 = arith.minimumf %89, %90 : vector<8x32xf32>
    %92 = math.exp %91 : vector<8x32xf32>
    %cst_43 = arith.constant 1.000000e+00 : f32
    %93 = vector.broadcast %cst_43 : f32 to vector<8x32xf32>
    %94 = arith.addf %93, %92 : vector<8x32xf32>
    %95 = arith.mulf %94, %94 : vector<8x32xf32>
    %cst_44 = arith.constant 1.000000e+00 : f32
    %96 = vector.broadcast %cst_44 : f32 to vector<8x32xf32>
    %97 = arith.subf %95, %96 : vector<8x32xf32>
    %98 = arith.mulf %89, %97 : vector<8x32xf32>
    %cst_45 = arith.constant 1.000000e+00 : f32
    %99 = vector.broadcast %cst_45 : f32 to vector<8x32xf32>
    %100 = arith.addf %95, %99 : vector<8x32xf32>
    %101 = tpu.reciprocal %100 {approx = true} : vector<8x32xf32> -> vector<8x32xf32>
    %102 = arith.mulf %98, %101 : vector<8x32xf32>
    %cst_46 = arith.constant dense<0.000000e+00> : vector<8x16xf32>
    %103 = tpu.matmul %102, %11, %cst_46 {dimension_numbers = #tpu.dot_dimension_numbers<[1], [0], [0], [1], [0, 0, 1, 1], [], []>} : vector<8x32xf32>, vector<32x16xf32>, vector<8x16xf32> -> vector<8x16xf32>
    %104 = vector.broadcast %13 : vector<1x16xf32> to vector<8x16xf32>
    %105 = arith.addf %103, %104 : vector<8x16xf32>
    %cst_47 = arith.constant 1.09537101 : f32
    %106 = vector.broadcast %cst_47 : f32 to vector<8x16xf32>
    %107 = arith.mulf %106, %68 : vector<8x16xf32>
    %cst_48 = arith.constant 0.447032154 : f32
    %108 = vector.broadcast %cst_48 : f32 to vector<8x16xf32>
    %109 = arith.mulf %108, %105 : vector<8x16xf32>
    %110 = arith.subf %107, %109 : vector<8x16xf32>
    %111 = vector.broadcast %5 : vector<1x16xf32> to vector<8x16xf32>
    %112 = arith.maximumf %110, %111 : vector<8x16xf32>
    %113 = vector.broadcast %8 : vector<1x16xf32> to vector<8x16xf32>
    %114 = arith.minimumf %112, %113 : vector<8x16xf32>
    %cst_49 = arith.constant 0.10488376 : f32
    %115 = vector.broadcast %cst_49 : f32 to vector<8x16xf32>
    %116 = arith.mulf %115, %114 : vector<8x16xf32>
    %cst_50 = arith.constant 0.894726515 : f32
    %117 = vector.broadcast %cst_50 : f32 to vector<8x16xf32>
    %118 = arith.mulf %117, %68 : vector<8x16xf32>
    %119 = arith.addf %116, %118 : vector<8x16xf32>
    %c18_51 = arith.constant 18 : index
    %c0_52 = arith.constant 0 : index
    %c0_53 = arith.constant 0 : index
    %120 = vector.load %arg1[%c18_51, %c0_52, %c0_53] : memref<20x8x16xf32, #tpu.memory_space<vmem>>, vector<1x8x16xf32>
    %121 = vector.shape_cast %120 : vector<1x8x16xf32> to vector<8x16xf32>
    %122 = arith.addf %119, %121 : vector<8x16xf32>
    %cst_54 = arith.constant dense<0.000000e+00> : vector<8x32xf32>
    %123 = tpu.matmul %122, %9, %cst_54 {dimension_numbers = #tpu.dot_dimension_numbers<[1], [0], [0], [1], [0, 0, 1, 1], [], []>} : vector<8x16xf32>, vector<16x32xf32>, vector<8x32xf32> -> vector<8x32xf32>
    %c17 = arith.constant 17 : index
    %c0_55 = arith.constant 0 : index
    %c0_56 = arith.constant 0 : index
    %124 = vector.load %arg2[%c17, %c0_55, %c0_56] : memref<20x1x32xf32, #tpu.memory_space<vmem>>, vector<1x1x32xf32>
    %125 = vector.shape_cast %124 : vector<1x1x32xf32> to vector<1x32xf32>
    %126 = vector.broadcast %125 : vector<1x32xf32> to vector<8x32xf32>
    %127 = arith.addf %123, %126 : vector<8x32xf32>
    %cst_57 = arith.constant 3.000000e+01 : f32
    %128 = vector.broadcast %cst_57 : f32 to vector<8x32xf32>
    %129 = arith.minimumf %127, %128 : vector<8x32xf32>
    %130 = math.exp %129 : vector<8x32xf32>
    %cst_58 = arith.constant 1.000000e+00 : f32
    %131 = vector.broadcast %cst_58 : f32 to vector<8x32xf32>
    %132 = arith.addf %131, %130 : vector<8x32xf32>
    %133 = arith.mulf %132, %132 : vector<8x32xf32>
    %cst_59 = arith.constant 1.000000e+00 : f32
    %134 = vector.broadcast %cst_59 : f32 to vector<8x32xf32>
    %135 = arith.subf %133, %134 : vector<8x32xf32>
    %136 = arith.mulf %127, %135 : vector<8x32xf32>
    %cst_60 = arith.constant 1.000000e+00 : f32
    %137 = vector.broadcast %cst_60 : f32 to vector<8x32xf32>
    %138 = arith.addf %133, %137 : vector<8x32xf32>
    %139 = tpu.reciprocal %138 {approx = true} : vector<8x32xf32> -> vector<8x32xf32>
    %140 = arith.mulf %136, %139 : vector<8x32xf32>
    %cst_61 = arith.constant dense<0.000000e+00> : vector<8x32xf32>
    %141 = tpu.matmul %140, %10, %cst_61 {dimension_numbers = #tpu.dot_dimension_numbers<[1], [0], [0], [1], [0, 0, 1, 1], [], []>} : vector<8x32xf32>, vector<32x32xf32>, vector<8x32xf32> -> vector<8x32xf32>
    %142 = vector.broadcast %12 : vector<1x32xf32> to vector<8x32xf32>
    %143 = arith.addf %141, %142 : vector<8x32xf32>
    %cst_62 = arith.constant 3.000000e+01 : f32
    %144 = vector.broadcast %cst_62 : f32 to vector<8x32xf32>
    %145 = arith.minimumf %143, %144 : vector<8x32xf32>
    %146 = math.exp %145 : vector<8x32xf32>
    %cst_63 = arith.constant 1.000000e+00 : f32
    %147 = vector.broadcast %cst_63 : f32 to vector<8x32xf32>
    %148 = arith.addf %147, %146 : vector<8x32xf32>
    %149 = arith.mulf %148, %148 : vector<8x32xf32>
    %cst_64 = arith.constant 1.000000e+00 : f32
    %150 = vector.broadcast %cst_64 : f32 to vector<8x32xf32>
    %151 = arith.subf %149, %150 : vector<8x32xf32>
    %152 = arith.mulf %143, %151 : vector<8x32xf32>
    %cst_65 = arith.constant 1.000000e+00 : f32
    %153 = vector.broadcast %cst_65 : f32 to vector<8x32xf32>
    %154 = arith.addf %149, %153 : vector<8x32xf32>
    %155 = tpu.reciprocal %154 {approx = true} : vector<8x32xf32> -> vector<8x32xf32>
    %156 = arith.mulf %152, %155 : vector<8x32xf32>
    %cst_66 = arith.constant dense<0.000000e+00> : vector<8x16xf32>
    %157 = tpu.matmul %156, %11, %cst_66 {dimension_numbers = #tpu.dot_dimension_numbers<[1], [0], [0], [1], [0, 0, 1, 1], [], []>} : vector<8x32xf32>, vector<32x16xf32>, vector<8x16xf32> -> vector<8x16xf32>
    %158 = vector.broadcast %13 : vector<1x16xf32> to vector<8x16xf32>
    %159 = arith.addf %157, %158 : vector<8x16xf32>
    %cst_67 = arith.constant 1.08494127 : f32
    %160 = vector.broadcast %cst_67 : f32 to vector<8x16xf32>
    %161 = arith.mulf %160, %122 : vector<8x16xf32>
    %cst_68 = arith.constant 0.420829743 : f32
    %162 = vector.broadcast %cst_68 : f32 to vector<8x16xf32>
    %163 = arith.mulf %162, %159 : vector<8x16xf32>
    %164 = arith.subf %161, %163 : vector<8x16xf32>
    %165 = vector.broadcast %5 : vector<1x16xf32> to vector<8x16xf32>
    %166 = arith.maximumf %164, %165 : vector<8x16xf32>
    %167 = vector.broadcast %8 : vector<1x16xf32> to vector<8x16xf32>
    %168 = arith.minimumf %166, %167 : vector<8x16xf32>
    %cst_69 = arith.constant 0.110687204 : f32
    %169 = vector.broadcast %cst_69 : f32 to vector<8x16xf32>
    %170 = arith.mulf %169, %168 : vector<8x16xf32>
    %cst_70 = arith.constant 0.888985574 : f32
    %171 = vector.broadcast %cst_70 : f32 to vector<8x16xf32>
    %172 = arith.mulf %171, %122 : vector<8x16xf32>
    %173 = arith.addf %170, %172 : vector<8x16xf32>
    %c17_71 = arith.constant 17 : index
    %c0_72 = arith.constant 0 : index
    %c0_73 = arith.constant 0 : index
    %174 = vector.load %arg1[%c17_71, %c0_72, %c0_73] : memref<20x8x16xf32, #tpu.memory_space<vmem>>, vector<1x8x16xf32>
    %175 = vector.shape_cast %174 : vector<1x8x16xf32> to vector<8x16xf32>
    %176 = arith.addf %173, %175 : vector<8x16xf32>
    %cst_74 = arith.constant dense<0.000000e+00> : vector<8x32xf32>
    %177 = tpu.matmul %176, %9, %cst_74 {dimension_numbers = #tpu.dot_dimension_numbers<[1], [0], [0], [1], [0, 0, 1, 1], [], []>} : vector<8x16xf32>, vector<16x32xf32>, vector<8x32xf32> -> vector<8x32xf32>
    %c16 = arith.constant 16 : index
    %c0_75 = arith.constant 0 : index
    %c0_76 = arith.constant 0 : index
    %178 = vector.load %arg2[%c16, %c0_75, %c0_76] : memref<20x1x32xf32, #tpu.memory_space<vmem>>, vector<1x1x32xf32>
    %179 = vector.shape_cast %178 : vector<1x1x32xf32> to vector<1x32xf32>
    %180 = vector.broadcast %179 : vector<1x32xf32> to vector<8x32xf32>
    %181 = arith.addf %177, %180 : vector<8x32xf32>
    %cst_77 = arith.constant 3.000000e+01 : f32
    %182 = vector.broadcast %cst_77 : f32 to vector<8x32xf32>
    %183 = arith.minimumf %181, %182 : vector<8x32xf32>
    %184 = math.exp %183 : vector<8x32xf32>
    %cst_78 = arith.constant 1.000000e+00 : f32
    %185 = vector.broadcast %cst_78 : f32 to vector<8x32xf32>
    %186 = arith.addf %185, %184 : vector<8x32xf32>
    %187 = arith.mulf %186, %186 : vector<8x32xf32>
    %cst_79 = arith.constant 1.000000e+00 : f32
    %188 = vector.broadcast %cst_79 : f32 to vector<8x32xf32>
    %189 = arith.subf %187, %188 : vector<8x32xf32>
    %190 = arith.mulf %181, %189 : vector<8x32xf32>
    %cst_80 = arith.constant 1.000000e+00 : f32
    %191 = vector.broadcast %cst_80 : f32 to vector<8x32xf32>
    %192 = arith.addf %187, %191 : vector<8x32xf32>
    %193 = tpu.reciprocal %192 {approx = true} : vector<8x32xf32> -> vector<8x32xf32>
    %194 = arith.mulf %190, %193 : vector<8x32xf32>
    %cst_81 = arith.constant dense<0.000000e+00> : vector<8x32xf32>
    %195 = tpu.matmul %194, %10, %cst_81 {dimension_numbers = #tpu.dot_dimension_numbers<[1], [0], [0], [1], [0, 0, 1, 1], [], []>} : vector<8x32xf32>, vector<32x32xf32>, vector<8x32xf32> -> vector<8x32xf32>
    %196 = vector.broadcast %12 : vector<1x32xf32> to vector<8x32xf32>
    %197 = arith.addf %195, %196 : vector<8x32xf32>
    %cst_82 = arith.constant 3.000000e+01 : f32
    %198 = vector.broadcast %cst_82 : f32 to vector<8x32xf32>
    %199 = arith.minimumf %197, %198 : vector<8x32xf32>
    %200 = math.exp %199 : vector<8x32xf32>
    %cst_83 = arith.constant 1.000000e+00 : f32
    %201 = vector.broadcast %cst_83 : f32 to vector<8x32xf32>
    %202 = arith.addf %201, %200 : vector<8x32xf32>
    %203 = arith.mulf %202, %202 : vector<8x32xf32>
    %cst_84 = arith.constant 1.000000e+00 : f32
    %204 = vector.broadcast %cst_84 : f32 to vector<8x32xf32>
    %205 = arith.subf %203, %204 : vector<8x32xf32>
    %206 = arith.mulf %197, %205 : vector<8x32xf32>
    %cst_85 = arith.constant 1.000000e+00 : f32
    %207 = vector.broadcast %cst_85 : f32 to vector<8x32xf32>
    %208 = arith.addf %203, %207 : vector<8x32xf32>
    %209 = tpu.reciprocal %208 {approx = true} : vector<8x32xf32> -> vector<8x32xf32>
    %210 = arith.mulf %206, %209 : vector<8x32xf32>
    %cst_86 = arith.constant dense<0.000000e+00> : vector<8x16xf32>
    %211 = tpu.matmul %210, %11, %cst_86 {dimension_numbers = #tpu.dot_dimension_numbers<[1], [0], [0], [1], [0, 0, 1, 1], [], []>} : vector<8x32xf32>, vector<32x16xf32>, vector<8x16xf32> -> vector<8x16xf32>
    %212 = vector.broadcast %13 : vector<1x16xf32> to vector<8x16xf32>
    %213 = arith.addf %211, %212 : vector<8x16xf32>
    %cst_87 = arith.constant 1.07518435 : f32
    %214 = vector.broadcast %cst_87 : f32 to vector<8x16xf32>
    %215 = arith.mulf %214, %176 : vector<8x16xf32>
    %cst_88 = arith.constant 0.394995481 : f32
    %216 = vector.broadcast %cst_88 : f32 to vector<8x16xf32>
    %217 = arith.mulf %216, %213 : vector<8x16xf32>
    %218 = arith.subf %215, %217 : vector<8x16xf32>
    %219 = vector.broadcast %5 : vector<1x16xf32> to vector<8x16xf32>
    %220 = arith.maximumf %218, %219 : vector<8x16xf32>
    %221 = vector.broadcast %8 : vector<1x16xf32> to vector<8x16xf32>
    %222 = arith.minimumf %220, %221 : vector<8x16xf32>
    %cst_89 = arith.constant 0.117163919 : f32
    %223 = vector.broadcast %cst_89 : f32 to vector<8x16xf32>
    %224 = arith.mulf %223, %222 : vector<8x16xf32>
    %cst_90 = arith.constant 0.882564246 : f32
    %225 = vector.broadcast %cst_90 : f32 to vector<8x16xf32>
    %226 = arith.mulf %225, %176 : vector<8x16xf32>
    %227 = arith.addf %224, %226 : vector<8x16xf32>
    %c16_91 = arith.constant 16 : index
    %c0_92 = arith.constant 0 : index
    %c0_93 = arith.constant 0 : index
    %228 = vector.load %arg1[%c16_91, %c0_92, %c0_93] : memref<20x8x16xf32, #tpu.memory_space<vmem>>, vector<1x8x16xf32>
    %229 = vector.shape_cast %228 : vector<1x8x16xf32> to vector<8x16xf32>
    %230 = arith.addf %227, %229 : vector<8x16xf32>
    %cst_94 = arith.constant dense<0.000000e+00> : vector<8x32xf32>
    %231 = tpu.matmul %230, %9, %cst_94 {dimension_numbers = #tpu.dot_dimension_numbers<[1], [0], [0], [1], [0, 0, 1, 1], [], []>} : vector<8x16xf32>, vector<16x32xf32>, vector<8x32xf32> -> vector<8x32xf32>
    %c15 = arith.constant 15 : index
    %c0_95 = arith.constant 0 : index
    %c0_96 = arith.constant 0 : index
    %232 = vector.load %arg2[%c15, %c0_95, %c0_96] : memref<20x1x32xf32, #tpu.memory_space<vmem>>, vector<1x1x32xf32>
    %233 = vector.shape_cast %232 : vector<1x1x32xf32> to vector<1x32xf32>
    %234 = vector.broadcast %233 : vector<1x32xf32> to vector<8x32xf32>
    %235 = arith.addf %231, %234 : vector<8x32xf32>
    %cst_97 = arith.constant 3.000000e+01 : f32
    %236 = vector.broadcast %cst_97 : f32 to vector<8x32xf32>
    %237 = arith.minimumf %235, %236 : vector<8x32xf32>
    %238 = math.exp %237 : vector<8x32xf32>
    %cst_98 = arith.constant 1.000000e+00 : f32
    %239 = vector.broadcast %cst_98 : f32 to vector<8x32xf32>
    %240 = arith.addf %239, %238 : vector<8x32xf32>
    %241 = arith.mulf %240, %240 : vector<8x32xf32>
    %cst_99 = arith.constant 1.000000e+00 : f32
    %242 = vector.broadcast %cst_99 : f32 to vector<8x32xf32>
    %243 = arith.subf %241, %242 : vector<8x32xf32>
    %244 = arith.mulf %235, %243 : vector<8x32xf32>
    %cst_100 = arith.constant 1.000000e+00 : f32
    %245 = vector.broadcast %cst_100 : f32 to vector<8x32xf32>
    %246 = arith.addf %241, %245 : vector<8x32xf32>
    %247 = tpu.reciprocal %246 {approx = true} : vector<8x32xf32> -> vector<8x32xf32>
    %248 = arith.mulf %244, %247 : vector<8x32xf32>
    %cst_101 = arith.constant dense<0.000000e+00> : vector<8x32xf32>
    %249 = tpu.matmul %248, %10, %cst_101 {dimension_numbers = #tpu.dot_dimension_numbers<[1], [0], [0], [1], [0, 0, 1, 1], [], []>} : vector<8x32xf32>, vector<32x32xf32>, vector<8x32xf32> -> vector<8x32xf32>
    %250 = vector.broadcast %12 : vector<1x32xf32> to vector<8x32xf32>
    %251 = arith.addf %249, %250 : vector<8x32xf32>
    %cst_102 = arith.constant 3.000000e+01 : f32
    %252 = vector.broadcast %cst_102 : f32 to vector<8x32xf32>
    %253 = arith.minimumf %251, %252 : vector<8x32xf32>
    %254 = math.exp %253 : vector<8x32xf32>
    %cst_103 = arith.constant 1.000000e+00 : f32
    %255 = vector.broadcast %cst_103 : f32 to vector<8x32xf32>
    %256 = arith.addf %255, %254 : vector<8x32xf32>
    %257 = arith.mulf %256, %256 : vector<8x32xf32>
    %cst_104 = arith.constant 1.000000e+00 : f32
    %258 = vector.broadcast %cst_104 : f32 to vector<8x32xf32>
    %259 = arith.subf %257, %258 : vector<8x32xf32>
    %260 = arith.mulf %251, %259 : vector<8x32xf32>
    %cst_105 = arith.constant 1.000000e+00 : f32
    %261 = vector.broadcast %cst_105 : f32 to vector<8x32xf32>
    %262 = arith.addf %257, %261 : vector<8x32xf32>
    %263 = tpu.reciprocal %262 {approx = true} : vector<8x32xf32> -> vector<8x32xf32>
    %264 = arith.mulf %260, %263 : vector<8x32xf32>
    %cst_106 = arith.constant dense<0.000000e+00> : vector<8x16xf32>
    %265 = tpu.matmul %264, %11, %cst_106 {dimension_numbers = #tpu.dot_dimension_numbers<[1], [0], [0], [1], [0, 0, 1, 1], [], []>} : vector<8x32xf32>, vector<32x16xf32>, vector<8x16xf32> -> vector<8x16xf32>
    %266 = vector.broadcast %13 : vector<1x16xf32> to vector<8x16xf32>
    %267 = arith.addf %265, %266 : vector<8x16xf32>
    %cst_107 = arith.constant 1.06608319 : f32
    %268 = vector.broadcast %cst_107 : f32 to vector<8x16xf32>
    %269 = arith.mulf %268, %230 : vector<8x16xf32>
    %cst_108 = arith.constant 0.369504184 : f32
    %270 = vector.broadcast %cst_108 : f32 to vector<8x16xf32>
    %271 = arith.mulf %270, %267 : vector<8x16xf32>
    %272 = arith.subf %269, %271 : vector<8x16xf32>
    %273 = vector.broadcast %5 : vector<1x16xf32> to vector<8x16xf32>
    %274 = arith.maximumf %272, %273 : vector<8x16xf32>
    %275 = vector.broadcast %8 : vector<1x16xf32> to vector<8x16xf32>
    %276 = arith.minimumf %274, %275 : vector<8x16xf32>
    %cst_109 = arith.constant 0.124439813 : f32
    %277 = vector.broadcast %cst_109 : f32 to vector<8x16xf32>
    %278 = arith.mulf %277, %276 : vector<8x16xf32>
    %cst_110 = arith.constant 0.875337064 : f32
    %279 = vector.broadcast %cst_110 : f32 to vector<8x16xf32>
    %280 = arith.mulf %279, %230 : vector<8x16xf32>
    %281 = arith.addf %278, %280 : vector<8x16xf32>
    %c15_111 = arith.constant 15 : index
    %c0_112 = arith.constant 0 : index
    %c0_113 = arith.constant 0 : index
    %282 = vector.load %arg1[%c15_111, %c0_112, %c0_113] : memref<20x8x16xf32, #tpu.memory_space<vmem>>, vector<1x8x16xf32>
    %283 = vector.shape_cast %282 : vector<1x8x16xf32> to vector<8x16xf32>
    %284 = arith.addf %281, %283 : vector<8x16xf32>
    %cst_114 = arith.constant dense<0.000000e+00> : vector<8x32xf32>
    %285 = tpu.matmul %284, %9, %cst_114 {dimension_numbers = #tpu.dot_dimension_numbers<[1], [0], [0], [1], [0, 0, 1, 1], [], []>} : vector<8x16xf32>, vector<16x32xf32>, vector<8x32xf32> -> vector<8x32xf32>
    %c14 = arith.constant 14 : index
    %c0_115 = arith.constant 0 : index
    %c0_116 = arith.constant 0 : index
    %286 = vector.load %arg2[%c14, %c0_115, %c0_116] : memref<20x1x32xf32, #tpu.memory_space<vmem>>, vector<1x1x32xf32>
    %287 = vector.shape_cast %286 : vector<1x1x32xf32> to vector<1x32xf32>
    %288 = vector.broadcast %287 : vector<1x32xf32> to vector<8x32xf32>
    %289 = arith.addf %285, %288 : vector<8x32xf32>
    %cst_117 = arith.constant 3.000000e+01 : f32
    %290 = vector.broadcast %cst_117 : f32 to vector<8x32xf32>
    %291 = arith.minimumf %289, %290 : vector<8x32xf32>
    %292 = math.exp %291 : vector<8x32xf32>
    %cst_118 = arith.constant 1.000000e+00 : f32
    %293 = vector.broadcast %cst_118 : f32 to vector<8x32xf32>
    %294 = arith.addf %293, %292 : vector<8x32xf32>
    %295 = arith.mulf %294, %294 : vector<8x32xf32>
    %cst_119 = arith.constant 1.000000e+00 : f32
    %296 = vector.broadcast %cst_119 : f32 to vector<8x32xf32>
    %297 = arith.subf %295, %296 : vector<8x32xf32>
    %298 = arith.mulf %289, %297 : vector<8x32xf32>
    %cst_120 = arith.constant 1.000000e+00 : f32
    %299 = vector.broadcast %cst_120 : f32 to vector<8x32xf32>
    %300 = arith.addf %295, %299 : vector<8x32xf32>
    %301 = tpu.reciprocal %300 {approx = true} : vector<8x32xf32> -> vector<8x32xf32>
    %302 = arith.mulf %298, %301 : vector<8x32xf32>
    %cst_121 = arith.constant dense<0.000000e+00> : vector<8x32xf32>
    %303 = tpu.matmul %302, %10, %cst_121 {dimension_numbers = #tpu.dot_dimension_numbers<[1], [0], [0], [1], [0, 0, 1, 1], [], []>} : vector<8x32xf32>, vector<32x32xf32>, vector<8x32xf32> -> vector<8x32xf32>
    %304 = vector.broadcast %12 : vector<1x32xf32> to vector<8x32xf32>
    %305 = arith.addf %303, %304 : vector<8x32xf32>
    %cst_122 = arith.constant 3.000000e+01 : f32
    %306 = vector.broadcast %cst_122 : f32 to vector<8x32xf32>
    %307 = arith.minimumf %305, %306 : vector<8x32xf32>
    %308 = math.exp %307 : vector<8x32xf32>
    %cst_123 = arith.constant 1.000000e+00 : f32
    %309 = vector.broadcast %cst_123 : f32 to vector<8x32xf32>
    %310 = arith.addf %309, %308 : vector<8x32xf32>
    %311 = arith.mulf %310, %310 : vector<8x32xf32>
    %cst_124 = arith.constant 1.000000e+00 : f32
    %312 = vector.broadcast %cst_124 : f32 to vector<8x32xf32>
    %313 = arith.subf %311, %312 : vector<8x32xf32>
    %314 = arith.mulf %305, %313 : vector<8x32xf32>
    %cst_125 = arith.constant 1.000000e+00 : f32
    %315 = vector.broadcast %cst_125 : f32 to vector<8x32xf32>
    %316 = arith.addf %311, %315 : vector<8x32xf32>
    %317 = tpu.reciprocal %316 {approx = true} : vector<8x32xf32> -> vector<8x32xf32>
    %318 = arith.mulf %314, %317 : vector<8x32xf32>
    %cst_126 = arith.constant dense<0.000000e+00> : vector<8x16xf32>
    %319 = tpu.matmul %318, %11, %cst_126 {dimension_numbers = #tpu.dot_dimension_numbers<[1], [0], [0], [1], [0, 0, 1, 1], [], []>} : vector<8x32xf32>, vector<32x16xf32>, vector<8x16xf32> -> vector<8x16xf32>
    %320 = vector.broadcast %13 : vector<1x16xf32> to vector<8x16xf32>
    %321 = arith.addf %319, %320 : vector<8x16xf32>
    %cst_127 = arith.constant 1.05762196 : f32
    %322 = vector.broadcast %cst_127 : f32 to vector<8x16xf32>
    %323 = arith.mulf %322, %284 : vector<8x16xf32>
    %cst_128 = arith.constant 0.344331443 : f32
    %324 = vector.broadcast %cst_128 : f32 to vector<8x16xf32>
    %325 = arith.mulf %324, %321 : vector<8x16xf32>
    %326 = arith.subf %323, %325 : vector<8x16xf32>
    %327 = vector.broadcast %5 : vector<1x16xf32> to vector<8x16xf32>
    %328 = arith.maximumf %326, %327 : vector<8x16xf32>
    %329 = vector.broadcast %8 : vector<1x16xf32> to vector<8x16xf32>
    %330 = arith.minimumf %328, %329 : vector<8x16xf32>
    %cst_129 = arith.constant 0.132674053 : f32
    %331 = vector.broadcast %cst_129 : f32 to vector<8x16xf32>
    %332 = arith.mulf %331, %330 : vector<8x16xf32>
    %cst_130 = arith.constant 0.867145359 : f32
    %333 = vector.broadcast %cst_130 : f32 to vector<8x16xf32>
    %334 = arith.mulf %333, %284 : vector<8x16xf32>
    %335 = arith.addf %332, %334 : vector<8x16xf32>
    %c14_131 = arith.constant 14 : index
    %c0_132 = arith.constant 0 : index
    %c0_133 = arith.constant 0 : index
    %336 = vector.load %arg1[%c14_131, %c0_132, %c0_133] : memref<20x8x16xf32, #tpu.memory_space<vmem>>, vector<1x8x16xf32>
    %337 = vector.shape_cast %336 : vector<1x8x16xf32> to vector<8x16xf32>
    %338 = arith.addf %335, %337 : vector<8x16xf32>
    %cst_134 = arith.constant dense<0.000000e+00> : vector<8x32xf32>
    %339 = tpu.matmul %338, %9, %cst_134 {dimension_numbers = #tpu.dot_dimension_numbers<[1], [0], [0], [1], [0, 0, 1, 1], [], []>} : vector<8x16xf32>, vector<16x32xf32>, vector<8x32xf32> -> vector<8x32xf32>
    %c13 = arith.constant 13 : index
    %c0_135 = arith.constant 0 : index
    %c0_136 = arith.constant 0 : index
    %340 = vector.load %arg2[%c13, %c0_135, %c0_136] : memref<20x1x32xf32, #tpu.memory_space<vmem>>, vector<1x1x32xf32>
    %341 = vector.shape_cast %340 : vector<1x1x32xf32> to vector<1x32xf32>
    %342 = vector.broadcast %341 : vector<1x32xf32> to vector<8x32xf32>
    %343 = arith.addf %339, %342 : vector<8x32xf32>
    %cst_137 = arith.constant 3.000000e+01 : f32
    %344 = vector.broadcast %cst_137 : f32 to vector<8x32xf32>
    %345 = arith.minimumf %343, %344 : vector<8x32xf32>
    %346 = math.exp %345 : vector<8x32xf32>
    %cst_138 = arith.constant 1.000000e+00 : f32
    %347 = vector.broadcast %cst_138 : f32 to vector<8x32xf32>
    %348 = arith.addf %347, %346 : vector<8x32xf32>
    %349 = arith.mulf %348, %348 : vector<8x32xf32>
    %cst_139 = arith.constant 1.000000e+00 : f32
    %350 = vector.broadcast %cst_139 : f32 to vector<8x32xf32>
    %351 = arith.subf %349, %350 : vector<8x32xf32>
    %352 = arith.mulf %343, %351 : vector<8x32xf32>
    %cst_140 = arith.constant 1.000000e+00 : f32
    %353 = vector.broadcast %cst_140 : f32 to vector<8x32xf32>
    %354 = arith.addf %349, %353 : vector<8x32xf32>
    %355 = tpu.reciprocal %354 {approx = true} : vector<8x32xf32> -> vector<8x32xf32>
    %356 = arith.mulf %352, %355 : vector<8x32xf32>
    %cst_141 = arith.constant dense<0.000000e+00> : vector<8x32xf32>
    %357 = tpu.matmul %356, %10, %cst_141 {dimension_numbers = #tpu.dot_dimension_numbers<[1], [0], [0], [1], [0, 0, 1, 1], [], []>} : vector<8x32xf32>, vector<32x32xf32>, vector<8x32xf32> -> vector<8x32xf32>
    %358 = vector.broadcast %12 : vector<1x32xf32> to vector<8x32xf32>
    %359 = arith.addf %357, %358 : vector<8x32xf32>
    %cst_142 = arith.constant 3.000000e+01 : f32
    %360 = vector.broadcast %cst_142 : f32 to vector<8x32xf32>
    %361 = arith.minimumf %359, %360 : vector<8x32xf32>
    %362 = math.exp %361 : vector<8x32xf32>
    %cst_143 = arith.constant 1.000000e+00 : f32
    %363 = vector.broadcast %cst_143 : f32 to vector<8x32xf32>
    %364 = arith.addf %363, %362 : vector<8x32xf32>
    %365 = arith.mulf %364, %364 : vector<8x32xf32>
    %cst_144 = arith.constant 1.000000e+00 : f32
    %366 = vector.broadcast %cst_144 : f32 to vector<8x32xf32>
    %367 = arith.subf %365, %366 : vector<8x32xf32>
    %368 = arith.mulf %359, %367 : vector<8x32xf32>
    %cst_145 = arith.constant 1.000000e+00 : f32
    %369 = vector.broadcast %cst_145 : f32 to vector<8x32xf32>
    %370 = arith.addf %365, %369 : vector<8x32xf32>
    %371 = tpu.reciprocal %370 {approx = true} : vector<8x32xf32> -> vector<8x32xf32>
    %372 = arith.mulf %368, %371 : vector<8x32xf32>
    %cst_146 = arith.constant dense<0.000000e+00> : vector<8x16xf32>
    %373 = tpu.matmul %372, %11, %cst_146 {dimension_numbers = #tpu.dot_dimension_numbers<[1], [0], [0], [1], [0, 0, 1, 1], [], []>} : vector<8x32xf32>, vector<32x16xf32>, vector<8x16xf32> -> vector<8x16xf32>
    %374 = vector.broadcast %13 : vector<1x16xf32> to vector<8x16xf32>
    %375 = arith.addf %373, %374 : vector<8x16xf32>
    %cst_147 = arith.constant 1.04978597 : f32
    %376 = vector.broadcast %cst_147 : f32 to vector<8x16xf32>
    %377 = arith.mulf %376, %338 : vector<8x16xf32>
    %cst_148 = arith.constant 0.319453597 : f32
    %378 = vector.broadcast %cst_148 : f32 to vector<8x16xf32>
    %379 = arith.mulf %378, %375 : vector<8x16xf32>
    %380 = arith.subf %377, %379 : vector<8x16xf32>
    %381 = vector.broadcast %5 : vector<1x16xf32> to vector<8x16xf32>
    %382 = arith.maximumf %380, %381 : vector<8x16xf32>
    %383 = vector.broadcast %8 : vector<1x16xf32> to vector<8x16xf32>
    %384 = arith.minimumf %382, %383 : vector<8x16xf32>
    %cst_149 = arith.constant 0.142070845 : f32
    %385 = vector.broadcast %cst_149 : f32 to vector<8x16xf32>
    %386 = arith.mulf %385, %384 : vector<8x16xf32>
    %cst_150 = arith.constant 0.857785284 : f32
    %387 = vector.broadcast %cst_150 : f32 to vector<8x16xf32>
    %388 = arith.mulf %387, %338 : vector<8x16xf32>
    %389 = arith.addf %386, %388 : vector<8x16xf32>
    %c13_151 = arith.constant 13 : index
    %c0_152 = arith.constant 0 : index
    %c0_153 = arith.constant 0 : index
    %390 = vector.load %arg1[%c13_151, %c0_152, %c0_153] : memref<20x8x16xf32, #tpu.memory_space<vmem>>, vector<1x8x16xf32>
    %391 = vector.shape_cast %390 : vector<1x8x16xf32> to vector<8x16xf32>
    %392 = arith.addf %389, %391 : vector<8x16xf32>
    %cst_154 = arith.constant dense<0.000000e+00> : vector<8x32xf32>
    %393 = tpu.matmul %392, %9, %cst_154 {dimension_numbers = #tpu.dot_dimension_numbers<[1], [0], [0], [1], [0, 0, 1, 1], [], []>} : vector<8x16xf32>, vector<16x32xf32>, vector<8x32xf32> -> vector<8x32xf32>
    %c12 = arith.constant 12 : index
    %c0_155 = arith.constant 0 : index
    %c0_156 = arith.constant 0 : index
    %394 = vector.load %arg2[%c12, %c0_155, %c0_156] : memref<20x1x32xf32, #tpu.memory_space<vmem>>, vector<1x1x32xf32>
    %395 = vector.shape_cast %394 : vector<1x1x32xf32> to vector<1x32xf32>
    %396 = vector.broadcast %395 : vector<1x32xf32> to vector<8x32xf32>
    %397 = arith.addf %393, %396 : vector<8x32xf32>
    %cst_157 = arith.constant 3.000000e+01 : f32
    %398 = vector.broadcast %cst_157 : f32 to vector<8x32xf32>
    %399 = arith.minimumf %397, %398 : vector<8x32xf32>
    %400 = math.exp %399 : vector<8x32xf32>
    %cst_158 = arith.constant 1.000000e+00 : f32
    %401 = vector.broadcast %cst_158 : f32 to vector<8x32xf32>
    %402 = arith.addf %401, %400 : vector<8x32xf32>
    %403 = arith.mulf %402, %402 : vector<8x32xf32>
    %cst_159 = arith.constant 1.000000e+00 : f32
    %404 = vector.broadcast %cst_159 : f32 to vector<8x32xf32>
    %405 = arith.subf %403, %404 : vector<8x32xf32>
    %406 = arith.mulf %397, %405 : vector<8x32xf32>
    %cst_160 = arith.constant 1.000000e+00 : f32
    %407 = vector.broadcast %cst_160 : f32 to vector<8x32xf32>
    %408 = arith.addf %403, %407 : vector<8x32xf32>
    %409 = tpu.reciprocal %408 {approx = true} : vector<8x32xf32> -> vector<8x32xf32>
    %410 = arith.mulf %406, %409 : vector<8x32xf32>
    %cst_161 = arith.constant dense<0.000000e+00> : vector<8x32xf32>
    %411 = tpu.matmul %410, %10, %cst_161 {dimension_numbers = #tpu.dot_dimension_numbers<[1], [0], [0], [1], [0, 0, 1, 1], [], []>} : vector<8x32xf32>, vector<32x32xf32>, vector<8x32xf32> -> vector<8x32xf32>
    %412 = vector.broadcast %12 : vector<1x32xf32> to vector<8x32xf32>
    %413 = arith.addf %411, %412 : vector<8x32xf32>
    %cst_162 = arith.constant 3.000000e+01 : f32
    %414 = vector.broadcast %cst_162 : f32 to vector<8x32xf32>
    %415 = arith.minimumf %413, %414 : vector<8x32xf32>
    %416 = math.exp %415 : vector<8x32xf32>
    %cst_163 = arith.constant 1.000000e+00 : f32
    %417 = vector.broadcast %cst_163 : f32 to vector<8x32xf32>
    %418 = arith.addf %417, %416 : vector<8x32xf32>
    %419 = arith.mulf %418, %418 : vector<8x32xf32>
    %cst_164 = arith.constant 1.000000e+00 : f32
    %420 = vector.broadcast %cst_164 : f32 to vector<8x32xf32>
    %421 = arith.subf %419, %420 : vector<8x32xf32>
    %422 = arith.mulf %413, %421 : vector<8x32xf32>
    %cst_165 = arith.constant 1.000000e+00 : f32
    %423 = vector.broadcast %cst_165 : f32 to vector<8x32xf32>
    %424 = arith.addf %419, %423 : vector<8x32xf32>
    %425 = tpu.reciprocal %424 {approx = true} : vector<8x32xf32> -> vector<8x32xf32>
    %426 = arith.mulf %422, %425 : vector<8x32xf32>
    %cst_166 = arith.constant dense<0.000000e+00> : vector<8x16xf32>
    %427 = tpu.matmul %426, %11, %cst_166 {dimension_numbers = #tpu.dot_dimension_numbers<[1], [0], [0], [1], [0, 0, 1, 1], [], []>} : vector<8x32xf32>, vector<32x16xf32>, vector<8x16xf32> -> vector<8x16xf32>
    %428 = vector.broadcast %13 : vector<1x16xf32> to vector<8x16xf32>
    %429 = arith.addf %427, %428 : vector<8x16xf32>
    %cst_167 = arith.constant 1.04256177 : f32
    %430 = vector.broadcast %cst_167 : f32 to vector<8x16xf32>
    %431 = arith.mulf %430, %392 : vector<8x16xf32>
    %cst_168 = arith.constant 0.294847608 : f32
    %432 = vector.broadcast %cst_168 : f32 to vector<8x16xf32>
    %433 = arith.mulf %432, %429 : vector<8x16xf32>
    %434 = arith.subf %431, %433 : vector<8x16xf32>
    %435 = vector.broadcast %5 : vector<1x16xf32> to vector<8x16xf32>
    %436 = arith.maximumf %434, %435 : vector<8x16xf32>
    %437 = vector.broadcast %8 : vector<1x16xf32> to vector<8x16xf32>
    %438 = arith.minimumf %436, %437 : vector<8x16xf32>
    %cst_169 = arith.constant 0.152896509 : f32
    %439 = vector.broadcast %cst_169 : f32 to vector<8x16xf32>
    %440 = arith.mulf %439, %438 : vector<8x16xf32>
    %cst_170 = arith.constant 8.469910e-01 : f32
    %441 = vector.broadcast %cst_170 : f32 to vector<8x16xf32>
    %442 = arith.mulf %441, %392 : vector<8x16xf32>
    %443 = arith.addf %440, %442 : vector<8x16xf32>
    %c12_171 = arith.constant 12 : index
    %c0_172 = arith.constant 0 : index
    %c0_173 = arith.constant 0 : index
    %444 = vector.load %arg1[%c12_171, %c0_172, %c0_173] : memref<20x8x16xf32, #tpu.memory_space<vmem>>, vector<1x8x16xf32>
    %445 = vector.shape_cast %444 : vector<1x8x16xf32> to vector<8x16xf32>
    %446 = arith.addf %443, %445 : vector<8x16xf32>
    %cst_174 = arith.constant dense<0.000000e+00> : vector<8x32xf32>
    %447 = tpu.matmul %446, %9, %cst_174 {dimension_numbers = #tpu.dot_dimension_numbers<[1], [0], [0], [1], [0, 0, 1, 1], [], []>} : vector<8x16xf32>, vector<16x32xf32>, vector<8x32xf32> -> vector<8x32xf32>
    %c11 = arith.constant 11 : index
    %c0_175 = arith.constant 0 : index
    %c0_176 = arith.constant 0 : index
    %448 = vector.load %arg2[%c11, %c0_175, %c0_176] : memref<20x1x32xf32, #tpu.memory_space<vmem>>, vector<1x1x32xf32>
    %449 = vector.shape_cast %448 : vector<1x1x32xf32> to vector<1x32xf32>
    %450 = vector.broadcast %449 : vector<1x32xf32> to vector<8x32xf32>
    %451 = arith.addf %447, %450 : vector<8x32xf32>
    %cst_177 = arith.constant 3.000000e+01 : f32
    %452 = vector.broadcast %cst_177 : f32 to vector<8x32xf32>
    %453 = arith.minimumf %451, %452 : vector<8x32xf32>
    %454 = math.exp %453 : vector<8x32xf32>
    %cst_178 = arith.constant 1.000000e+00 : f32
    %455 = vector.broadcast %cst_178 : f32 to vector<8x32xf32>
    %456 = arith.addf %455, %454 : vector<8x32xf32>
    %457 = arith.mulf %456, %456 : vector<8x32xf32>
    %cst_179 = arith.constant 1.000000e+00 : f32
    %458 = vector.broadcast %cst_179 : f32 to vector<8x32xf32>
    %459 = arith.subf %457, %458 : vector<8x32xf32>
    %460 = arith.mulf %451, %459 : vector<8x32xf32>
    %cst_180 = arith.constant 1.000000e+00 : f32
    %461 = vector.broadcast %cst_180 : f32 to vector<8x32xf32>
    %462 = arith.addf %457, %461 : vector<8x32xf32>
    %463 = tpu.reciprocal %462 {approx = true} : vector<8x32xf32> -> vector<8x32xf32>
    %464 = arith.mulf %460, %463 : vector<8x32xf32>
    %cst_181 = arith.constant dense<0.000000e+00> : vector<8x32xf32>
    %465 = tpu.matmul %464, %10, %cst_181 {dimension_numbers = #tpu.dot_dimension_numbers<[1], [0], [0], [1], [0, 0, 1, 1], [], []>} : vector<8x32xf32>, vector<32x32xf32>, vector<8x32xf32> -> vector<8x32xf32>
    %466 = vector.broadcast %12 : vector<1x32xf32> to vector<8x32xf32>
    %467 = arith.addf %465, %466 : vector<8x32xf32>
    %cst_182 = arith.constant 3.000000e+01 : f32
    %468 = vector.broadcast %cst_182 : f32 to vector<8x32xf32>
    %469 = arith.minimumf %467, %468 : vector<8x32xf32>
    %470 = math.exp %469 : vector<8x32xf32>
    %cst_183 = arith.constant 1.000000e+00 : f32
    %471 = vector.broadcast %cst_183 : f32 to vector<8x32xf32>
    %472 = arith.addf %471, %470 : vector<8x32xf32>
    %473 = arith.mulf %472, %472 : vector<8x32xf32>
    %cst_184 = arith.constant 1.000000e+00 : f32
    %474 = vector.broadcast %cst_184 : f32 to vector<8x32xf32>
    %475 = arith.subf %473, %474 : vector<8x32xf32>
    %476 = arith.mulf %467, %475 : vector<8x32xf32>
    %cst_185 = arith.constant 1.000000e+00 : f32
    %477 = vector.broadcast %cst_185 : f32 to vector<8x32xf32>
    %478 = arith.addf %473, %477 : vector<8x32xf32>
    %479 = tpu.reciprocal %478 {approx = true} : vector<8x32xf32> -> vector<8x32xf32>
    %480 = arith.mulf %476, %479 : vector<8x32xf32>
    %cst_186 = arith.constant dense<0.000000e+00> : vector<8x16xf32>
    %481 = tpu.matmul %480, %11, %cst_186 {dimension_numbers = #tpu.dot_dimension_numbers<[1], [0], [0], [1], [0, 0, 1, 1], [], []>} : vector<8x32xf32>, vector<32x16xf32>, vector<8x16xf32> -> vector<8x16xf32>
    %482 = vector.broadcast %13 : vector<1x16xf32> to vector<8x16xf32>
    %483 = arith.addf %481, %482 : vector<8x16xf32>
    %cst_187 = arith.constant 1.03593695 : f32
    %484 = vector.broadcast %cst_187 : f32 to vector<8x16xf32>
    %485 = arith.mulf %484, %446 : vector<8x16xf32>
    %cst_188 = arith.constant 0.270490974 : f32
    %486 = vector.broadcast %cst_188 : f32 to vector<8x16xf32>
    %487 = arith.mulf %486, %483 : vector<8x16xf32>
    %488 = arith.subf %485, %487 : vector<8x16xf32>
    %489 = vector.broadcast %5 : vector<1x16xf32> to vector<8x16xf32>
    %490 = arith.maximumf %488, %489 : vector<8x16xf32>
    %491 = vector.broadcast %8 : vector<1x16xf32> to vector<8x16xf32>
    %492 = arith.minimumf %490, %491 : vector<8x16xf32>
    %cst_189 = arith.constant 0.165505156 : f32
    %493 = vector.broadcast %cst_189 : f32 to vector<8x16xf32>
    %494 = arith.mulf %493, %492 : vector<8x16xf32>
    %cst_190 = arith.constant 0.83440876 : f32
    %495 = vector.broadcast %cst_190 : f32 to vector<8x16xf32>
    %496 = arith.mulf %495, %446 : vector<8x16xf32>
    %497 = arith.addf %494, %496 : vector<8x16xf32>
    %c11_191 = arith.constant 11 : index
    %c0_192 = arith.constant 0 : index
    %c0_193 = arith.constant 0 : index
    %498 = vector.load %arg1[%c11_191, %c0_192, %c0_193] : memref<20x8x16xf32, #tpu.memory_space<vmem>>, vector<1x8x16xf32>
    %499 = vector.shape_cast %498 : vector<1x8x16xf32> to vector<8x16xf32>
    %500 = arith.addf %497, %499 : vector<8x16xf32>
    %cst_194 = arith.constant dense<0.000000e+00> : vector<8x32xf32>
    %501 = tpu.matmul %500, %9, %cst_194 {dimension_numbers = #tpu.dot_dimension_numbers<[1], [0], [0], [1], [0, 0, 1, 1], [], []>} : vector<8x16xf32>, vector<16x32xf32>, vector<8x32xf32> -> vector<8x32xf32>
    %c10 = arith.constant 10 : index
    %c0_195 = arith.constant 0 : index
    %c0_196 = arith.constant 0 : index
    %502 = vector.load %arg2[%c10, %c0_195, %c0_196] : memref<20x1x32xf32, #tpu.memory_space<vmem>>, vector<1x1x32xf32>
    %503 = vector.shape_cast %502 : vector<1x1x32xf32> to vector<1x32xf32>
    %504 = vector.broadcast %503 : vector<1x32xf32> to vector<8x32xf32>
    %505 = arith.addf %501, %504 : vector<8x32xf32>
    %cst_197 = arith.constant 3.000000e+01 : f32
    %506 = vector.broadcast %cst_197 : f32 to vector<8x32xf32>
    %507 = arith.minimumf %505, %506 : vector<8x32xf32>
    %508 = math.exp %507 : vector<8x32xf32>
    %cst_198 = arith.constant 1.000000e+00 : f32
    %509 = vector.broadcast %cst_198 : f32 to vector<8x32xf32>
    %510 = arith.addf %509, %508 : vector<8x32xf32>
    %511 = arith.mulf %510, %510 : vector<8x32xf32>
    %cst_199 = arith.constant 1.000000e+00 : f32
    %512 = vector.broadcast %cst_199 : f32 to vector<8x32xf32>
    %513 = arith.subf %511, %512 : vector<8x32xf32>
    %514 = arith.mulf %505, %513 : vector<8x32xf32>
    %cst_200 = arith.constant 1.000000e+00 : f32
    %515 = vector.broadcast %cst_200 : f32 to vector<8x32xf32>
    %516 = arith.addf %511, %515 : vector<8x32xf32>
    %517 = tpu.reciprocal %516 {approx = true} : vector<8x32xf32> -> vector<8x32xf32>
    %518 = arith.mulf %514, %517 : vector<8x32xf32>
    %cst_201 = arith.constant dense<0.000000e+00> : vector<8x32xf32>
    %519 = tpu.matmul %518, %10, %cst_201 {dimension_numbers = #tpu.dot_dimension_numbers<[1], [0], [0], [1], [0, 0, 1, 1], [], []>} : vector<8x32xf32>, vector<32x32xf32>, vector<8x32xf32> -> vector<8x32xf32>
    %520 = vector.broadcast %12 : vector<1x32xf32> to vector<8x32xf32>
    %521 = arith.addf %519, %520 : vector<8x32xf32>
    %cst_202 = arith.constant 3.000000e+01 : f32
    %522 = vector.broadcast %cst_202 : f32 to vector<8x32xf32>
    %523 = arith.minimumf %521, %522 : vector<8x32xf32>
    %524 = math.exp %523 : vector<8x32xf32>
    %cst_203 = arith.constant 1.000000e+00 : f32
    %525 = vector.broadcast %cst_203 : f32 to vector<8x32xf32>
    %526 = arith.addf %525, %524 : vector<8x32xf32>
    %527 = arith.mulf %526, %526 : vector<8x32xf32>
    %cst_204 = arith.constant 1.000000e+00 : f32
    %528 = vector.broadcast %cst_204 : f32 to vector<8x32xf32>
    %529 = arith.subf %527, %528 : vector<8x32xf32>
    %530 = arith.mulf %521, %529 : vector<8x32xf32>
    %cst_205 = arith.constant 1.000000e+00 : f32
    %531 = vector.broadcast %cst_205 : f32 to vector<8x32xf32>
    %532 = arith.addf %527, %531 : vector<8x32xf32>
    %533 = tpu.reciprocal %532 {approx = true} : vector<8x32xf32> -> vector<8x32xf32>
    %534 = arith.mulf %530, %533 : vector<8x32xf32>
    %cst_206 = arith.constant dense<0.000000e+00> : vector<8x16xf32>
    %535 = tpu.matmul %534, %11, %cst_206 {dimension_numbers = #tpu.dot_dimension_numbers<[1], [0], [0], [1], [0, 0, 1, 1], [], []>} : vector<8x32xf32>, vector<32x16xf32>, vector<8x16xf32> -> vector<8x16xf32>
    %536 = vector.broadcast %13 : vector<1x16xf32> to vector<8x16xf32>
    %537 = arith.addf %535, %536 : vector<8x16xf32>
    %cst_207 = arith.constant 1.02990007 : f32
    %538 = vector.broadcast %cst_207 : f32 to vector<8x16xf32>
    %539 = arith.mulf %538, %500 : vector<8x16xf32>
    %cst_208 = arith.constant 0.246361628 : f32
    %540 = vector.broadcast %cst_208 : f32 to vector<8x16xf32>
    %541 = arith.mulf %540, %537 : vector<8x16xf32>
    %542 = arith.subf %539, %541 : vector<8x16xf32>
    %543 = vector.broadcast %5 : vector<1x16xf32> to vector<8x16xf32>
    %544 = arith.maximumf %542, %543 : vector<8x16xf32>
    %545 = vector.broadcast %8 : vector<1x16xf32> to vector<8x16xf32>
    %546 = arith.minimumf %544, %545 : vector<8x16xf32>
    %cst_209 = arith.constant 1.803780e-01 : f32
    %547 = vector.broadcast %cst_209 : f32 to vector<8x16xf32>
    %548 = arith.mulf %547, %546 : vector<8x16xf32>
    %cst_210 = arith.constant 0.819557845 : f32
    %549 = vector.broadcast %cst_210 : f32 to vector<8x16xf32>
    %550 = arith.mulf %549, %500 : vector<8x16xf32>
    %551 = arith.addf %548, %550 : vector<8x16xf32>
    %c10_211 = arith.constant 10 : index
    %c0_212 = arith.constant 0 : index
    %c0_213 = arith.constant 0 : index
    %552 = vector.load %arg1[%c10_211, %c0_212, %c0_213] : memref<20x8x16xf32, #tpu.memory_space<vmem>>, vector<1x8x16xf32>
    %553 = vector.shape_cast %552 : vector<1x8x16xf32> to vector<8x16xf32>
    %554 = arith.addf %551, %553 : vector<8x16xf32>
    %cst_214 = arith.constant dense<0.000000e+00> : vector<8x32xf32>
    %555 = tpu.matmul %554, %9, %cst_214 {dimension_numbers = #tpu.dot_dimension_numbers<[1], [0], [0], [1], [0, 0, 1, 1], [], []>} : vector<8x16xf32>, vector<16x32xf32>, vector<8x32xf32> -> vector<8x32xf32>
    %c9 = arith.constant 9 : index
    %c0_215 = arith.constant 0 : index
    %c0_216 = arith.constant 0 : index
    %556 = vector.load %arg2[%c9, %c0_215, %c0_216] : memref<20x1x32xf32, #tpu.memory_space<vmem>>, vector<1x1x32xf32>
    %557 = vector.shape_cast %556 : vector<1x1x32xf32> to vector<1x32xf32>
    %558 = vector.broadcast %557 : vector<1x32xf32> to vector<8x32xf32>
    %559 = arith.addf %555, %558 : vector<8x32xf32>
    %cst_217 = arith.constant 3.000000e+01 : f32
    %560 = vector.broadcast %cst_217 : f32 to vector<8x32xf32>
    %561 = arith.minimumf %559, %560 : vector<8x32xf32>
    %562 = math.exp %561 : vector<8x32xf32>
    %cst_218 = arith.constant 1.000000e+00 : f32
    %563 = vector.broadcast %cst_218 : f32 to vector<8x32xf32>
    %564 = arith.addf %563, %562 : vector<8x32xf32>
    %565 = arith.mulf %564, %564 : vector<8x32xf32>
    %cst_219 = arith.constant 1.000000e+00 : f32
    %566 = vector.broadcast %cst_219 : f32 to vector<8x32xf32>
    %567 = arith.subf %565, %566 : vector<8x32xf32>
    %568 = arith.mulf %559, %567 : vector<8x32xf32>
    %cst_220 = arith.constant 1.000000e+00 : f32
    %569 = vector.broadcast %cst_220 : f32 to vector<8x32xf32>
    %570 = arith.addf %565, %569 : vector<8x32xf32>
    %571 = tpu.reciprocal %570 {approx = true} : vector<8x32xf32> -> vector<8x32xf32>
    %572 = arith.mulf %568, %571 : vector<8x32xf32>
    %cst_221 = arith.constant dense<0.000000e+00> : vector<8x32xf32>
    %573 = tpu.matmul %572, %10, %cst_221 {dimension_numbers = #tpu.dot_dimension_numbers<[1], [0], [0], [1], [0, 0, 1, 1], [], []>} : vector<8x32xf32>, vector<32x32xf32>, vector<8x32xf32> -> vector<8x32xf32>
    %574 = vector.broadcast %12 : vector<1x32xf32> to vector<8x32xf32>
    %575 = arith.addf %573, %574 : vector<8x32xf32>
    %cst_222 = arith.constant 3.000000e+01 : f32
    %576 = vector.broadcast %cst_222 : f32 to vector<8x32xf32>
    %577 = arith.minimumf %575, %576 : vector<8x32xf32>
    %578 = math.exp %577 : vector<8x32xf32>
    %cst_223 = arith.constant 1.000000e+00 : f32
    %579 = vector.broadcast %cst_223 : f32 to vector<8x32xf32>
    %580 = arith.addf %579, %578 : vector<8x32xf32>
    %581 = arith.mulf %580, %580 : vector<8x32xf32>
    %cst_224 = arith.constant 1.000000e+00 : f32
    %582 = vector.broadcast %cst_224 : f32 to vector<8x32xf32>
    %583 = arith.subf %581, %582 : vector<8x32xf32>
    %584 = arith.mulf %575, %583 : vector<8x32xf32>
    %cst_225 = arith.constant 1.000000e+00 : f32
    %585 = vector.broadcast %cst_225 : f32 to vector<8x32xf32>
    %586 = arith.addf %581, %585 : vector<8x32xf32>
    %587 = tpu.reciprocal %586 {approx = true} : vector<8x32xf32> -> vector<8x32xf32>
    %588 = arith.mulf %584, %587 : vector<8x32xf32>
    %cst_226 = arith.constant dense<0.000000e+00> : vector<8x16xf32>
    %589 = tpu.matmul %588, %11, %cst_226 {dimension_numbers = #tpu.dot_dimension_numbers<[1], [0], [0], [1], [0, 0, 1, 1], [], []>} : vector<8x32xf32>, vector<32x16xf32>, vector<8x16xf32> -> vector<8x16xf32>
    %590 = vector.broadcast %13 : vector<1x16xf32> to vector<8x16xf32>
    %591 = arith.addf %589, %590 : vector<8x16xf32>
    %cst_227 = arith.constant 1.02444065 : f32
    %592 = vector.broadcast %cst_227 : f32 to vector<8x16xf32>
    %593 = arith.mulf %592, %554 : vector<8x16xf32>
    %cst_228 = arith.constant 0.222437873 : f32
    %594 = vector.broadcast %cst_228 : f32 to vector<8x16xf32>
    %595 = arith.mulf %594, %591 : vector<8x16xf32>
    %596 = arith.subf %593, %595 : vector<8x16xf32>
    %597 = vector.broadcast %5 : vector<1x16xf32> to vector<8x16xf32>
    %598 = arith.maximumf %596, %597 : vector<8x16xf32>
    %599 = vector.broadcast %8 : vector<1x16xf32> to vector<8x16xf32>
    %600 = arith.minimumf %598, %599 : vector<8x16xf32>
    %cst_229 = arith.constant 0.198185951 : f32
    %601 = vector.broadcast %cst_229 : f32 to vector<8x16xf32>
    %602 = arith.mulf %601, %600 : vector<8x16xf32>
    %cst_230 = arith.constant 0.801767706 : f32
    %603 = vector.broadcast %cst_230 : f32 to vector<8x16xf32>
    %604 = arith.mulf %603, %554 : vector<8x16xf32>
    %605 = arith.addf %602, %604 : vector<8x16xf32>
    %c9_231 = arith.constant 9 : index
    %c0_232 = arith.constant 0 : index
    %c0_233 = arith.constant 0 : index
    %606 = vector.load %arg1[%c9_231, %c0_232, %c0_233] : memref<20x8x16xf32, #tpu.memory_space<vmem>>, vector<1x8x16xf32>
    %607 = vector.shape_cast %606 : vector<1x8x16xf32> to vector<8x16xf32>
    %608 = arith.addf %605, %607 : vector<8x16xf32>
    %cst_234 = arith.constant dense<0.000000e+00> : vector<8x32xf32>
    %609 = tpu.matmul %608, %9, %cst_234 {dimension_numbers = #tpu.dot_dimension_numbers<[1], [0], [0], [1], [0, 0, 1, 1], [], []>} : vector<8x16xf32>, vector<16x32xf32>, vector<8x32xf32> -> vector<8x32xf32>
    %c8 = arith.constant 8 : index
    %c0_235 = arith.constant 0 : index
    %c0_236 = arith.constant 0 : index
    %610 = vector.load %arg2[%c8, %c0_235, %c0_236] : memref<20x1x32xf32, #tpu.memory_space<vmem>>, vector<1x1x32xf32>
    %611 = vector.shape_cast %610 : vector<1x1x32xf32> to vector<1x32xf32>
    %612 = vector.broadcast %611 : vector<1x32xf32> to vector<8x32xf32>
    %613 = arith.addf %609, %612 : vector<8x32xf32>
    %cst_237 = arith.constant 3.000000e+01 : f32
    %614 = vector.broadcast %cst_237 : f32 to vector<8x32xf32>
    %615 = arith.minimumf %613, %614 : vector<8x32xf32>
    %616 = math.exp %615 : vector<8x32xf32>
    %cst_238 = arith.constant 1.000000e+00 : f32
    %617 = vector.broadcast %cst_238 : f32 to vector<8x32xf32>
    %618 = arith.addf %617, %616 : vector<8x32xf32>
    %619 = arith.mulf %618, %618 : vector<8x32xf32>
    %cst_239 = arith.constant 1.000000e+00 : f32
    %620 = vector.broadcast %cst_239 : f32 to vector<8x32xf32>
    %621 = arith.subf %619, %620 : vector<8x32xf32>
    %622 = arith.mulf %613, %621 : vector<8x32xf32>
    %cst_240 = arith.constant 1.000000e+00 : f32
    %623 = vector.broadcast %cst_240 : f32 to vector<8x32xf32>
    %624 = arith.addf %619, %623 : vector<8x32xf32>
    %625 = tpu.reciprocal %624 {approx = true} : vector<8x32xf32> -> vector<8x32xf32>
    %626 = arith.mulf %622, %625 : vector<8x32xf32>
    %cst_241 = arith.constant dense<0.000000e+00> : vector<8x32xf32>
    %627 = tpu.matmul %626, %10, %cst_241 {dimension_numbers = #tpu.dot_dimension_numbers<[1], [0], [0], [1], [0, 0, 1, 1], [], []>} : vector<8x32xf32>, vector<32x32xf32>, vector<8x32xf32> -> vector<8x32xf32>
    %628 = vector.broadcast %12 : vector<1x32xf32> to vector<8x32xf32>
    %629 = arith.addf %627, %628 : vector<8x32xf32>
    %cst_242 = arith.constant 3.000000e+01 : f32
    %630 = vector.broadcast %cst_242 : f32 to vector<8x32xf32>
    %631 = arith.minimumf %629, %630 : vector<8x32xf32>
    %632 = math.exp %631 : vector<8x32xf32>
    %cst_243 = arith.constant 1.000000e+00 : f32
    %633 = vector.broadcast %cst_243 : f32 to vector<8x32xf32>
    %634 = arith.addf %633, %632 : vector<8x32xf32>
    %635 = arith.mulf %634, %634 : vector<8x32xf32>
    %cst_244 = arith.constant 1.000000e+00 : f32
    %636 = vector.broadcast %cst_244 : f32 to vector<8x32xf32>
    %637 = arith.subf %635, %636 : vector<8x32xf32>
    %638 = arith.mulf %629, %637 : vector<8x32xf32>
    %cst_245 = arith.constant 1.000000e+00 : f32
    %639 = vector.broadcast %cst_245 : f32 to vector<8x32xf32>
    %640 = arith.addf %635, %639 : vector<8x32xf32>
    %641 = tpu.reciprocal %640 {approx = true} : vector<8x32xf32> -> vector<8x32xf32>
    %642 = arith.mulf %638, %641 : vector<8x32xf32>
    %cst_246 = arith.constant dense<0.000000e+00> : vector<8x16xf32>
    %643 = tpu.matmul %642, %11, %cst_246 {dimension_numbers = #tpu.dot_dimension_numbers<[1], [0], [0], [1], [0, 0, 1, 1], [], []>} : vector<8x32xf32>, vector<32x16xf32>, vector<8x16xf32> -> vector<8x16xf32>
    %644 = vector.broadcast %13 : vector<1x16xf32> to vector<8x16xf32>
    %645 = arith.addf %643, %644 : vector<8x16xf32>
    %cst_247 = arith.constant 1.01954937 : f32
    %646 = vector.broadcast %cst_247 : f32 to vector<8x16xf32>
    %647 = arith.mulf %646, %608 : vector<8x16xf32>
    %cst_248 = arith.constant 0.198698118 : f32
    %648 = vector.broadcast %cst_248 : f32 to vector<8x16xf32>
    %649 = arith.mulf %648, %645 : vector<8x16xf32>
    %650 = arith.subf %647, %649 : vector<8x16xf32>
    %651 = vector.broadcast %5 : vector<1x16xf32> to vector<8x16xf32>
    %652 = arith.maximumf %650, %651 : vector<8x16xf32>
    %653 = vector.broadcast %8 : vector<1x16xf32> to vector<8x16xf32>
    %654 = arith.minimumf %652, %653 : vector<8x16xf32>
    %cst_249 = arith.constant 0.219893172 : f32
    %655 = vector.broadcast %cst_249 : f32 to vector<8x16xf32>
    %656 = arith.mulf %655, %654 : vector<8x16xf32>
    %cst_250 = arith.constant 0.780074656 : f32
    %657 = vector.broadcast %cst_250 : f32 to vector<8x16xf32>
    %658 = arith.mulf %657, %608 : vector<8x16xf32>
    %659 = arith.addf %656, %658 : vector<8x16xf32>
    %c8_251 = arith.constant 8 : index
    %c0_252 = arith.constant 0 : index
    %c0_253 = arith.constant 0 : index
    %660 = vector.load %arg1[%c8_251, %c0_252, %c0_253] : memref<20x8x16xf32, #tpu.memory_space<vmem>>, vector<1x8x16xf32>
    %661 = vector.shape_cast %660 : vector<1x8x16xf32> to vector<8x16xf32>
    %662 = arith.addf %659, %661 : vector<8x16xf32>
    %cst_254 = arith.constant dense<0.000000e+00> : vector<8x32xf32>
    %663 = tpu.matmul %662, %9, %cst_254 {dimension_numbers = #tpu.dot_dimension_numbers<[1], [0], [0], [1], [0, 0, 1, 1], [], []>} : vector<8x16xf32>, vector<16x32xf32>, vector<8x32xf32> -> vector<8x32xf32>
    %c7 = arith.constant 7 : index
    %c0_255 = arith.constant 0 : index
    %c0_256 = arith.constant 0 : index
    %664 = vector.load %arg2[%c7, %c0_255, %c0_256] : memref<20x1x32xf32, #tpu.memory_space<vmem>>, vector<1x1x32xf32>
    %665 = vector.shape_cast %664 : vector<1x1x32xf32> to vector<1x32xf32>
    %666 = vector.broadcast %665 : vector<1x32xf32> to vector<8x32xf32>
    %667 = arith.addf %663, %666 : vector<8x32xf32>
    %cst_257 = arith.constant 3.000000e+01 : f32
    %668 = vector.broadcast %cst_257 : f32 to vector<8x32xf32>
    %669 = arith.minimumf %667, %668 : vector<8x32xf32>
    %670 = math.exp %669 : vector<8x32xf32>
    %cst_258 = arith.constant 1.000000e+00 : f32
    %671 = vector.broadcast %cst_258 : f32 to vector<8x32xf32>
    %672 = arith.addf %671, %670 : vector<8x32xf32>
    %673 = arith.mulf %672, %672 : vector<8x32xf32>
    %cst_259 = arith.constant 1.000000e+00 : f32
    %674 = vector.broadcast %cst_259 : f32 to vector<8x32xf32>
    %675 = arith.subf %673, %674 : vector<8x32xf32>
    %676 = arith.mulf %667, %675 : vector<8x32xf32>
    %cst_260 = arith.constant 1.000000e+00 : f32
    %677 = vector.broadcast %cst_260 : f32 to vector<8x32xf32>
    %678 = arith.addf %673, %677 : vector<8x32xf32>
    %679 = tpu.reciprocal %678 {approx = true} : vector<8x32xf32> -> vector<8x32xf32>
    %680 = arith.mulf %676, %679 : vector<8x32xf32>
    %cst_261 = arith.constant dense<0.000000e+00> : vector<8x32xf32>
    %681 = tpu.matmul %680, %10, %cst_261 {dimension_numbers = #tpu.dot_dimension_numbers<[1], [0], [0], [1], [0, 0, 1, 1], [], []>} : vector<8x32xf32>, vector<32x32xf32>, vector<8x32xf32> -> vector<8x32xf32>
    %682 = vector.broadcast %12 : vector<1x32xf32> to vector<8x32xf32>
    %683 = arith.addf %681, %682 : vector<8x32xf32>
    %cst_262 = arith.constant 3.000000e+01 : f32
    %684 = vector.broadcast %cst_262 : f32 to vector<8x32xf32>
    %685 = arith.minimumf %683, %684 : vector<8x32xf32>
    %686 = math.exp %685 : vector<8x32xf32>
    %cst_263 = arith.constant 1.000000e+00 : f32
    %687 = vector.broadcast %cst_263 : f32 to vector<8x32xf32>
    %688 = arith.addf %687, %686 : vector<8x32xf32>
    %689 = arith.mulf %688, %688 : vector<8x32xf32>
    %cst_264 = arith.constant 1.000000e+00 : f32
    %690 = vector.broadcast %cst_264 : f32 to vector<8x32xf32>
    %691 = arith.subf %689, %690 : vector<8x32xf32>
    %692 = arith.mulf %683, %691 : vector<8x32xf32>
    %cst_265 = arith.constant 1.000000e+00 : f32
    %693 = vector.broadcast %cst_265 : f32 to vector<8x32xf32>
    %694 = arith.addf %689, %693 : vector<8x32xf32>
    %695 = tpu.reciprocal %694 {approx = true} : vector<8x32xf32> -> vector<8x32xf32>
    %696 = arith.mulf %692, %695 : vector<8x32xf32>
    %cst_266 = arith.constant dense<0.000000e+00> : vector<8x16xf32>
    %697 = tpu.matmul %696, %11, %cst_266 {dimension_numbers = #tpu.dot_dimension_numbers<[1], [0], [0], [1], [0, 0, 1, 1], [], []>} : vector<8x32xf32>, vector<32x16xf32>, vector<8x16xf32> -> vector<8x16xf32>
    %698 = vector.broadcast %13 : vector<1x16xf32> to vector<8x16xf32>
    %699 = arith.addf %697, %698 : vector<8x16xf32>
    %cst_267 = arith.constant 1.01521778 : f32
    %700 = vector.broadcast %cst_267 : f32 to vector<8x16xf32>
    %701 = arith.mulf %700, %662 : vector<8x16xf32>
    %cst_268 = arith.constant 0.175120637 : f32
    %702 = vector.broadcast %cst_268 : f32 to vector<8x16xf32>
    %703 = arith.mulf %702, %699 : vector<8x16xf32>
    %704 = arith.subf %701, %703 : vector<8x16xf32>
    %705 = vector.broadcast %5 : vector<1x16xf32> to vector<8x16xf32>
    %706 = arith.maximumf %704, %705 : vector<8x16xf32>
    %707 = vector.broadcast %8 : vector<1x16xf32> to vector<8x16xf32>
    %708 = arith.minimumf %706, %707 : vector<8x16xf32>
    %cst_269 = arith.constant 0.246936604 : f32
    %709 = vector.broadcast %cst_269 : f32 to vector<8x16xf32>
    %710 = arith.mulf %709, %708 : vector<8x16xf32>
    %cst_270 = arith.constant 0.753042161 : f32
    %711 = vector.broadcast %cst_270 : f32 to vector<8x16xf32>
    %712 = arith.mulf %711, %662 : vector<8x16xf32>
    %713 = arith.addf %710, %712 : vector<8x16xf32>
    %c7_271 = arith.constant 7 : index
    %c0_272 = arith.constant 0 : index
    %c0_273 = arith.constant 0 : index
    %714 = vector.load %arg1[%c7_271, %c0_272, %c0_273] : memref<20x8x16xf32, #tpu.memory_space<vmem>>, vector<1x8x16xf32>
    %715 = vector.shape_cast %714 : vector<1x8x16xf32> to vector<8x16xf32>
    %716 = arith.addf %713, %715 : vector<8x16xf32>
    %cst_274 = arith.constant dense<0.000000e+00> : vector<8x32xf32>
    %717 = tpu.matmul %716, %9, %cst_274 {dimension_numbers = #tpu.dot_dimension_numbers<[1], [0], [0], [1], [0, 0, 1, 1], [], []>} : vector<8x16xf32>, vector<16x32xf32>, vector<8x32xf32> -> vector<8x32xf32>
    %c6 = arith.constant 6 : index
    %c0_275 = arith.constant 0 : index
    %c0_276 = arith.constant 0 : index
    %718 = vector.load %arg2[%c6, %c0_275, %c0_276] : memref<20x1x32xf32, #tpu.memory_space<vmem>>, vector<1x1x32xf32>
    %719 = vector.shape_cast %718 : vector<1x1x32xf32> to vector<1x32xf32>
    %720 = vector.broadcast %719 : vector<1x32xf32> to vector<8x32xf32>
    %721 = arith.addf %717, %720 : vector<8x32xf32>
    %cst_277 = arith.constant 3.000000e+01 : f32
    %722 = vector.broadcast %cst_277 : f32 to vector<8x32xf32>
    %723 = arith.minimumf %721, %722 : vector<8x32xf32>
    %724 = math.exp %723 : vector<8x32xf32>
    %cst_278 = arith.constant 1.000000e+00 : f32
    %725 = vector.broadcast %cst_278 : f32 to vector<8x32xf32>
    %726 = arith.addf %725, %724 : vector<8x32xf32>
    %727 = arith.mulf %726, %726 : vector<8x32xf32>
    %cst_279 = arith.constant 1.000000e+00 : f32
    %728 = vector.broadcast %cst_279 : f32 to vector<8x32xf32>
    %729 = arith.subf %727, %728 : vector<8x32xf32>
    %730 = arith.mulf %721, %729 : vector<8x32xf32>
    %cst_280 = arith.constant 1.000000e+00 : f32
    %731 = vector.broadcast %cst_280 : f32 to vector<8x32xf32>
    %732 = arith.addf %727, %731 : vector<8x32xf32>
    %733 = tpu.reciprocal %732 {approx = true} : vector<8x32xf32> -> vector<8x32xf32>
    %734 = arith.mulf %730, %733 : vector<8x32xf32>
    %cst_281 = arith.constant dense<0.000000e+00> : vector<8x32xf32>
    %735 = tpu.matmul %734, %10, %cst_281 {dimension_numbers = #tpu.dot_dimension_numbers<[1], [0], [0], [1], [0, 0, 1, 1], [], []>} : vector<8x32xf32>, vector<32x32xf32>, vector<8x32xf32> -> vector<8x32xf32>
    %736 = vector.broadcast %12 : vector<1x32xf32> to vector<8x32xf32>
    %737 = arith.addf %735, %736 : vector<8x32xf32>
    %cst_282 = arith.constant 3.000000e+01 : f32
    %738 = vector.broadcast %cst_282 : f32 to vector<8x32xf32>
    %739 = arith.minimumf %737, %738 : vector<8x32xf32>
    %740 = math.exp %739 : vector<8x32xf32>
    %cst_283 = arith.constant 1.000000e+00 : f32
    %741 = vector.broadcast %cst_283 : f32 to vector<8x32xf32>
    %742 = arith.addf %741, %740 : vector<8x32xf32>
    %743 = arith.mulf %742, %742 : vector<8x32xf32>
    %cst_284 = arith.constant 1.000000e+00 : f32
    %744 = vector.broadcast %cst_284 : f32 to vector<8x32xf32>
    %745 = arith.subf %743, %744 : vector<8x32xf32>
    %746 = arith.mulf %737, %745 : vector<8x32xf32>
    %cst_285 = arith.constant 1.000000e+00 : f32
    %747 = vector.broadcast %cst_285 : f32 to vector<8x32xf32>
    %748 = arith.addf %743, %747 : vector<8x32xf32>
    %749 = tpu.reciprocal %748 {approx = true} : vector<8x32xf32> -> vector<8x32xf32>
    %750 = arith.mulf %746, %749 : vector<8x32xf32>
    %cst_286 = arith.constant dense<0.000000e+00> : vector<8x16xf32>
    %751 = tpu.matmul %750, %11, %cst_286 {dimension_numbers = #tpu.dot_dimension_numbers<[1], [0], [0], [1], [0, 0, 1, 1], [], []>} : vector<8x32xf32>, vector<32x16xf32>, vector<8x16xf32> -> vector<8x16xf32>
    %752 = vector.broadcast %13 : vector<1x16xf32> to vector<8x16xf32>
    %753 = arith.addf %751, %752 : vector<8x16xf32>
    %cst_287 = arith.constant 1.01143849 : f32
    %754 = vector.broadcast %cst_287 : f32 to vector<8x16xf32>
    %755 = arith.mulf %754, %716 : vector<8x16xf32>
    %cst_288 = arith.constant 0.151683062 : f32
    %756 = vector.broadcast %cst_288 : f32 to vector<8x16xf32>
    %757 = arith.mulf %756, %753 : vector<8x16xf32>
    %758 = arith.subf %755, %757 : vector<8x16xf32>
    %759 = vector.broadcast %5 : vector<1x16xf32> to vector<8x16xf32>
    %760 = arith.maximumf %758, %759 : vector<8x16xf32>
    %761 = vector.broadcast %8 : vector<1x16xf32> to vector<8x16xf32>
    %762 = arith.minimumf %760, %761 : vector<8x16xf32>
    %cst_289 = arith.constant 2.815550e-01 : f32
    %763 = vector.broadcast %cst_289 : f32 to vector<8x16xf32>
    %764 = arith.mulf %763, %762 : vector<8x16xf32>
    %cst_290 = arith.constant 0.71843189 : f32
    %765 = vector.broadcast %cst_290 : f32 to vector<8x16xf32>
    %766 = arith.mulf %765, %716 : vector<8x16xf32>
    %767 = arith.addf %764, %766 : vector<8x16xf32>
    %c6_291 = arith.constant 6 : index
    %c0_292 = arith.constant 0 : index
    %c0_293 = arith.constant 0 : index
    %768 = vector.load %arg1[%c6_291, %c0_292, %c0_293] : memref<20x8x16xf32, #tpu.memory_space<vmem>>, vector<1x8x16xf32>
    %769 = vector.shape_cast %768 : vector<1x8x16xf32> to vector<8x16xf32>
    %770 = arith.addf %767, %769 : vector<8x16xf32>
    %cst_294 = arith.constant dense<0.000000e+00> : vector<8x32xf32>
    %771 = tpu.matmul %770, %9, %cst_294 {dimension_numbers = #tpu.dot_dimension_numbers<[1], [0], [0], [1], [0, 0, 1, 1], [], []>} : vector<8x16xf32>, vector<16x32xf32>, vector<8x32xf32> -> vector<8x32xf32>
    %c5 = arith.constant 5 : index
    %c0_295 = arith.constant 0 : index
    %c0_296 = arith.constant 0 : index
    %772 = vector.load %arg2[%c5, %c0_295, %c0_296] : memref<20x1x32xf32, #tpu.memory_space<vmem>>, vector<1x1x32xf32>
    %773 = vector.shape_cast %772 : vector<1x1x32xf32> to vector<1x32xf32>
    %774 = vector.broadcast %773 : vector<1x32xf32> to vector<8x32xf32>
    %775 = arith.addf %771, %774 : vector<8x32xf32>
    %cst_297 = arith.constant 3.000000e+01 : f32
    %776 = vector.broadcast %cst_297 : f32 to vector<8x32xf32>
    %777 = arith.minimumf %775, %776 : vector<8x32xf32>
    %778 = math.exp %777 : vector<8x32xf32>
    %cst_298 = arith.constant 1.000000e+00 : f32
    %779 = vector.broadcast %cst_298 : f32 to vector<8x32xf32>
    %780 = arith.addf %779, %778 : vector<8x32xf32>
    %781 = arith.mulf %780, %780 : vector<8x32xf32>
    %cst_299 = arith.constant 1.000000e+00 : f32
    %782 = vector.broadcast %cst_299 : f32 to vector<8x32xf32>
    %783 = arith.subf %781, %782 : vector<8x32xf32>
    %784 = arith.mulf %775, %783 : vector<8x32xf32>
    %cst_300 = arith.constant 1.000000e+00 : f32
    %785 = vector.broadcast %cst_300 : f32 to vector<8x32xf32>
    %786 = arith.addf %781, %785 : vector<8x32xf32>
    %787 = tpu.reciprocal %786 {approx = true} : vector<8x32xf32> -> vector<8x32xf32>
    %788 = arith.mulf %784, %787 : vector<8x32xf32>
    %cst_301 = arith.constant dense<0.000000e+00> : vector<8x32xf32>
    %789 = tpu.matmul %788, %10, %cst_301 {dimension_numbers = #tpu.dot_dimension_numbers<[1], [0], [0], [1], [0, 0, 1, 1], [], []>} : vector<8x32xf32>, vector<32x32xf32>, vector<8x32xf32> -> vector<8x32xf32>
    %790 = vector.broadcast %12 : vector<1x32xf32> to vector<8x32xf32>
    %791 = arith.addf %789, %790 : vector<8x32xf32>
    %cst_302 = arith.constant 3.000000e+01 : f32
    %792 = vector.broadcast %cst_302 : f32 to vector<8x32xf32>
    %793 = arith.minimumf %791, %792 : vector<8x32xf32>
    %794 = math.exp %793 : vector<8x32xf32>
    %cst_303 = arith.constant 1.000000e+00 : f32
    %795 = vector.broadcast %cst_303 : f32 to vector<8x32xf32>
    %796 = arith.addf %795, %794 : vector<8x32xf32>
    %797 = arith.mulf %796, %796 : vector<8x32xf32>
    %cst_304 = arith.constant 1.000000e+00 : f32
    %798 = vector.broadcast %cst_304 : f32 to vector<8x32xf32>
    %799 = arith.subf %797, %798 : vector<8x32xf32>
    %800 = arith.mulf %791, %799 : vector<8x32xf32>
    %cst_305 = arith.constant 1.000000e+00 : f32
    %801 = vector.broadcast %cst_305 : f32 to vector<8x32xf32>
    %802 = arith.addf %797, %801 : vector<8x32xf32>
    %803 = tpu.reciprocal %802 {approx = true} : vector<8x32xf32> -> vector<8x32xf32>
    %804 = arith.mulf %800, %803 : vector<8x32xf32>
    %cst_306 = arith.constant dense<0.000000e+00> : vector<8x16xf32>
    %805 = tpu.matmul %804, %11, %cst_306 {dimension_numbers = #tpu.dot_dimension_numbers<[1], [0], [0], [1], [0, 0, 1, 1], [], []>} : vector<8x32xf32>, vector<32x16xf32>, vector<8x16xf32> -> vector<8x16xf32>
    %806 = vector.broadcast %13 : vector<1x16xf32> to vector<8x16xf32>
    %807 = arith.addf %805, %806 : vector<8x16xf32>
    %cst_307 = arith.constant 1.0082047 : f32
    %808 = vector.broadcast %cst_307 : f32 to vector<8x16xf32>
    %809 = arith.mulf %808, %770 : vector<8x16xf32>
    %cst_308 = arith.constant 0.128361419 : f32
    %810 = vector.broadcast %cst_308 : f32 to vector<8x16xf32>
    %811 = arith.mulf %810, %807 : vector<8x16xf32>
    %812 = arith.subf %809, %811 : vector<8x16xf32>
    %813 = vector.broadcast %5 : vector<1x16xf32> to vector<8x16xf32>
    %814 = arith.maximumf %812, %813 : vector<8x16xf32>
    %815 = vector.broadcast %8 : vector<1x16xf32> to vector<8x16xf32>
    %816 = arith.minimumf %814, %815 : vector<8x16xf32>
    %cst_309 = arith.constant 0.327435702 : f32
    %817 = vector.broadcast %cst_309 : f32 to vector<8x16xf32>
    %818 = arith.mulf %817, %816 : vector<8x16xf32>
    %cst_310 = arith.constant 0.672556936 : f32
    %819 = vector.broadcast %cst_310 : f32 to vector<8x16xf32>
    %820 = arith.mulf %819, %770 : vector<8x16xf32>
    %821 = arith.addf %818, %820 : vector<8x16xf32>
    %c5_311 = arith.constant 5 : index
    %c0_312 = arith.constant 0 : index
    %c0_313 = arith.constant 0 : index
    %822 = vector.load %arg1[%c5_311, %c0_312, %c0_313] : memref<20x8x16xf32, #tpu.memory_space<vmem>>, vector<1x8x16xf32>
    %823 = vector.shape_cast %822 : vector<1x8x16xf32> to vector<8x16xf32>
    %824 = arith.addf %821, %823 : vector<8x16xf32>
    %cst_314 = arith.constant dense<0.000000e+00> : vector<8x32xf32>
    %825 = tpu.matmul %824, %9, %cst_314 {dimension_numbers = #tpu.dot_dimension_numbers<[1], [0], [0], [1], [0, 0, 1, 1], [], []>} : vector<8x16xf32>, vector<16x32xf32>, vector<8x32xf32> -> vector<8x32xf32>
    %c4 = arith.constant 4 : index
    %c0_315 = arith.constant 0 : index
    %c0_316 = arith.constant 0 : index
    %826 = vector.load %arg2[%c4, %c0_315, %c0_316] : memref<20x1x32xf32, #tpu.memory_space<vmem>>, vector<1x1x32xf32>
    %827 = vector.shape_cast %826 : vector<1x1x32xf32> to vector<1x32xf32>
    %828 = vector.broadcast %827 : vector<1x32xf32> to vector<8x32xf32>
    %829 = arith.addf %825, %828 : vector<8x32xf32>
    %cst_317 = arith.constant 3.000000e+01 : f32
    %830 = vector.broadcast %cst_317 : f32 to vector<8x32xf32>
    %831 = arith.minimumf %829, %830 : vector<8x32xf32>
    %832 = math.exp %831 : vector<8x32xf32>
    %cst_318 = arith.constant 1.000000e+00 : f32
    %833 = vector.broadcast %cst_318 : f32 to vector<8x32xf32>
    %834 = arith.addf %833, %832 : vector<8x32xf32>
    %835 = arith.mulf %834, %834 : vector<8x32xf32>
    %cst_319 = arith.constant 1.000000e+00 : f32
    %836 = vector.broadcast %cst_319 : f32 to vector<8x32xf32>
    %837 = arith.subf %835, %836 : vector<8x32xf32>
    %838 = arith.mulf %829, %837 : vector<8x32xf32>
    %cst_320 = arith.constant 1.000000e+00 : f32
    %839 = vector.broadcast %cst_320 : f32 to vector<8x32xf32>
    %840 = arith.addf %835, %839 : vector<8x32xf32>
    %841 = tpu.reciprocal %840 {approx = true} : vector<8x32xf32> -> vector<8x32xf32>
    %842 = arith.mulf %838, %841 : vector<8x32xf32>
    %cst_321 = arith.constant dense<0.000000e+00> : vector<8x32xf32>
    %843 = tpu.matmul %842, %10, %cst_321 {dimension_numbers = #tpu.dot_dimension_numbers<[1], [0], [0], [1], [0, 0, 1, 1], [], []>} : vector<8x32xf32>, vector<32x32xf32>, vector<8x32xf32> -> vector<8x32xf32>
    %844 = vector.broadcast %12 : vector<1x32xf32> to vector<8x32xf32>
    %845 = arith.addf %843, %844 : vector<8x32xf32>
    %cst_322 = arith.constant 3.000000e+01 : f32
    %846 = vector.broadcast %cst_322 : f32 to vector<8x32xf32>
    %847 = arith.minimumf %845, %846 : vector<8x32xf32>
    %848 = math.exp %847 : vector<8x32xf32>
    %cst_323 = arith.constant 1.000000e+00 : f32
    %849 = vector.broadcast %cst_323 : f32 to vector<8x32xf32>
    %850 = arith.addf %849, %848 : vector<8x32xf32>
    %851 = arith.mulf %850, %850 : vector<8x32xf32>
    %cst_324 = arith.constant 1.000000e+00 : f32
    %852 = vector.broadcast %cst_324 : f32 to vector<8x32xf32>
    %853 = arith.subf %851, %852 : vector<8x32xf32>
    %854 = arith.mulf %845, %853 : vector<8x32xf32>
    %cst_325 = arith.constant 1.000000e+00 : f32
    %855 = vector.broadcast %cst_325 : f32 to vector<8x32xf32>
    %856 = arith.addf %851, %855 : vector<8x32xf32>
    %857 = tpu.reciprocal %856 {approx = true} : vector<8x32xf32> -> vector<8x32xf32>
    %858 = arith.mulf %854, %857 : vector<8x32xf32>
    %cst_326 = arith.constant dense<0.000000e+00> : vector<8x16xf32>
    %859 = tpu.matmul %858, %11, %cst_326 {dimension_numbers = #tpu.dot_dimension_numbers<[1], [0], [0], [1], [0, 0, 1, 1], [], []>} : vector<8x32xf32>, vector<32x16xf32>, vector<8x16xf32> -> vector<8x16xf32>
    %860 = vector.broadcast %13 : vector<1x16xf32> to vector<8x16xf32>
    %861 = arith.addf %859, %860 : vector<8x16xf32>
    %cst_327 = arith.constant 1.00551081 : f32
    %862 = vector.broadcast %cst_327 : f32 to vector<8x16xf32>
    %863 = arith.mulf %862, %824 : vector<8x16xf32>
    %cst_328 = arith.constant 0.105127916 : f32
    %864 = vector.broadcast %cst_328 : f32 to vector<8x16xf32>
    %865 = arith.mulf %864, %861 : vector<8x16xf32>
    %866 = arith.subf %863, %865 : vector<8x16xf32>
    %867 = vector.broadcast %5 : vector<1x16xf32> to vector<8x16xf32>
    %868 = arith.maximumf %866, %867 : vector<8x16xf32>
    %869 = vector.broadcast %8 : vector<1x16xf32> to vector<8x16xf32>
    %870 = arith.minimumf %868, %869 : vector<8x16xf32>
    %cst_329 = arith.constant 0.391100228 : f32
    %871 = vector.broadcast %cst_329 : f32 to vector<8x16xf32>
    %872 = arith.mulf %871, %870 : vector<8x16xf32>
    %cst_330 = arith.constant 0.608896195 : f32
    %873 = vector.broadcast %cst_330 : f32 to vector<8x16xf32>
    %874 = arith.mulf %873, %824 : vector<8x16xf32>
    %875 = arith.addf %872, %874 : vector<8x16xf32>
    %c4_331 = arith.constant 4 : index
    %c0_332 = arith.constant 0 : index
    %c0_333 = arith.constant 0 : index
    %876 = vector.load %arg1[%c4_331, %c0_332, %c0_333] : memref<20x8x16xf32, #tpu.memory_space<vmem>>, vector<1x8x16xf32>
    %877 = vector.shape_cast %876 : vector<1x8x16xf32> to vector<8x16xf32>
    %878 = arith.addf %875, %877 : vector<8x16xf32>
    %cst_334 = arith.constant dense<0.000000e+00> : vector<8x32xf32>
    %879 = tpu.matmul %878, %9, %cst_334 {dimension_numbers = #tpu.dot_dimension_numbers<[1], [0], [0], [1], [0, 0, 1, 1], [], []>} : vector<8x16xf32>, vector<16x32xf32>, vector<8x32xf32> -> vector<8x32xf32>
    %c3 = arith.constant 3 : index
    %c0_335 = arith.constant 0 : index
    %c0_336 = arith.constant 0 : index
    %880 = vector.load %arg2[%c3, %c0_335, %c0_336] : memref<20x1x32xf32, #tpu.memory_space<vmem>>, vector<1x1x32xf32>
    %881 = vector.shape_cast %880 : vector<1x1x32xf32> to vector<1x32xf32>
    %882 = vector.broadcast %881 : vector<1x32xf32> to vector<8x32xf32>
    %883 = arith.addf %879, %882 : vector<8x32xf32>
    %cst_337 = arith.constant 3.000000e+01 : f32
    %884 = vector.broadcast %cst_337 : f32 to vector<8x32xf32>
    %885 = arith.minimumf %883, %884 : vector<8x32xf32>
    %886 = math.exp %885 : vector<8x32xf32>
    %cst_338 = arith.constant 1.000000e+00 : f32
    %887 = vector.broadcast %cst_338 : f32 to vector<8x32xf32>
    %888 = arith.addf %887, %886 : vector<8x32xf32>
    %889 = arith.mulf %888, %888 : vector<8x32xf32>
    %cst_339 = arith.constant 1.000000e+00 : f32
    %890 = vector.broadcast %cst_339 : f32 to vector<8x32xf32>
    %891 = arith.subf %889, %890 : vector<8x32xf32>
    %892 = arith.mulf %883, %891 : vector<8x32xf32>
    %cst_340 = arith.constant 1.000000e+00 : f32
    %893 = vector.broadcast %cst_340 : f32 to vector<8x32xf32>
    %894 = arith.addf %889, %893 : vector<8x32xf32>
    %895 = tpu.reciprocal %894 {approx = true} : vector<8x32xf32> -> vector<8x32xf32>
    %896 = arith.mulf %892, %895 : vector<8x32xf32>
    %cst_341 = arith.constant dense<0.000000e+00> : vector<8x32xf32>
    %897 = tpu.matmul %896, %10, %cst_341 {dimension_numbers = #tpu.dot_dimension_numbers<[1], [0], [0], [1], [0, 0, 1, 1], [], []>} : vector<8x32xf32>, vector<32x32xf32>, vector<8x32xf32> -> vector<8x32xf32>
    %898 = vector.broadcast %12 : vector<1x32xf32> to vector<8x32xf32>
    %899 = arith.addf %897, %898 : vector<8x32xf32>
    %cst_342 = arith.constant 3.000000e+01 : f32
    %900 = vector.broadcast %cst_342 : f32 to vector<8x32xf32>
    %901 = arith.minimumf %899, %900 : vector<8x32xf32>
    %902 = math.exp %901 : vector<8x32xf32>
    %cst_343 = arith.constant 1.000000e+00 : f32
    %903 = vector.broadcast %cst_343 : f32 to vector<8x32xf32>
    %904 = arith.addf %903, %902 : vector<8x32xf32>
    %905 = arith.mulf %904, %904 : vector<8x32xf32>
    %cst_344 = arith.constant 1.000000e+00 : f32
    %906 = vector.broadcast %cst_344 : f32 to vector<8x32xf32>
    %907 = arith.subf %905, %906 : vector<8x32xf32>
    %908 = arith.mulf %899, %907 : vector<8x32xf32>
    %cst_345 = arith.constant 1.000000e+00 : f32
    %909 = vector.broadcast %cst_345 : f32 to vector<8x32xf32>
    %910 = arith.addf %905, %909 : vector<8x32xf32>
    %911 = tpu.reciprocal %910 {approx = true} : vector<8x32xf32> -> vector<8x32xf32>
    %912 = arith.mulf %908, %911 : vector<8x32xf32>
    %cst_346 = arith.constant dense<0.000000e+00> : vector<8x16xf32>
    %913 = tpu.matmul %912, %11, %cst_346 {dimension_numbers = #tpu.dot_dimension_numbers<[1], [0], [0], [1], [0, 0, 1, 1], [], []>} : vector<8x32xf32>, vector<32x16xf32>, vector<8x16xf32> -> vector<8x16xf32>
    %914 = vector.broadcast %13 : vector<1x16xf32> to vector<8x16xf32>
    %915 = arith.addf %913, %914 : vector<8x16xf32>
    %cst_347 = arith.constant 1.00335193 : f32
    %916 = vector.broadcast %cst_347 : f32 to vector<8x16xf32>
    %917 = arith.mulf %916, %878 : vector<8x16xf32>
    %cst_348 = arith.constant 0.0819450914 : f32
    %918 = vector.broadcast %cst_348 : f32 to vector<8x16xf32>
    %919 = arith.mulf %918, %915 : vector<8x16xf32>
    %920 = arith.subf %917, %919 : vector<8x16xf32>
    %921 = vector.broadcast %5 : vector<1x16xf32> to vector<8x16xf32>
    %922 = arith.maximumf %920, %921 : vector<8x16xf32>
    %923 = vector.broadcast %8 : vector<1x16xf32> to vector<8x16xf32>
    %924 = arith.minimumf %922, %923 : vector<8x16xf32>
    %cst_349 = arith.constant 0.485221028 : f32
    %925 = vector.broadcast %cst_349 : f32 to vector<8x16xf32>
    %926 = arith.mulf %925, %924 : vector<8x16xf32>
    %cst_350 = arith.constant 0.514777541 : f32
    %927 = vector.broadcast %cst_350 : f32 to vector<8x16xf32>
    %928 = arith.mulf %927, %878 : vector<8x16xf32>
    %929 = arith.addf %926, %928 : vector<8x16xf32>
    %c3_351 = arith.constant 3 : index
    %c0_352 = arith.constant 0 : index
    %c0_353 = arith.constant 0 : index
    %930 = vector.load %arg1[%c3_351, %c0_352, %c0_353] : memref<20x8x16xf32, #tpu.memory_space<vmem>>, vector<1x8x16xf32>
    %931 = vector.shape_cast %930 : vector<1x8x16xf32> to vector<8x16xf32>
    %932 = arith.addf %929, %931 : vector<8x16xf32>
    %cst_354 = arith.constant dense<0.000000e+00> : vector<8x32xf32>
    %933 = tpu.matmul %932, %9, %cst_354 {dimension_numbers = #tpu.dot_dimension_numbers<[1], [0], [0], [1], [0, 0, 1, 1], [], []>} : vector<8x16xf32>, vector<16x32xf32>, vector<8x32xf32> -> vector<8x32xf32>
    %c2 = arith.constant 2 : index
    %c0_355 = arith.constant 0 : index
    %c0_356 = arith.constant 0 : index
    %934 = vector.load %arg2[%c2, %c0_355, %c0_356] : memref<20x1x32xf32, #tpu.memory_space<vmem>>, vector<1x1x32xf32>
    %935 = vector.shape_cast %934 : vector<1x1x32xf32> to vector<1x32xf32>
    %936 = vector.broadcast %935 : vector<1x32xf32> to vector<8x32xf32>
    %937 = arith.addf %933, %936 : vector<8x32xf32>
    %cst_357 = arith.constant 3.000000e+01 : f32
    %938 = vector.broadcast %cst_357 : f32 to vector<8x32xf32>
    %939 = arith.minimumf %937, %938 : vector<8x32xf32>
    %940 = math.exp %939 : vector<8x32xf32>
    %cst_358 = arith.constant 1.000000e+00 : f32
    %941 = vector.broadcast %cst_358 : f32 to vector<8x32xf32>
    %942 = arith.addf %941, %940 : vector<8x32xf32>
    %943 = arith.mulf %942, %942 : vector<8x32xf32>
    %cst_359 = arith.constant 1.000000e+00 : f32
    %944 = vector.broadcast %cst_359 : f32 to vector<8x32xf32>
    %945 = arith.subf %943, %944 : vector<8x32xf32>
    %946 = arith.mulf %937, %945 : vector<8x32xf32>
    %cst_360 = arith.constant 1.000000e+00 : f32
    %947 = vector.broadcast %cst_360 : f32 to vector<8x32xf32>
    %948 = arith.addf %943, %947 : vector<8x32xf32>
    %949 = tpu.reciprocal %948 {approx = true} : vector<8x32xf32> -> vector<8x32xf32>
    %950 = arith.mulf %946, %949 : vector<8x32xf32>
    %cst_361 = arith.constant dense<0.000000e+00> : vector<8x32xf32>
    %951 = tpu.matmul %950, %10, %cst_361 {dimension_numbers = #tpu.dot_dimension_numbers<[1], [0], [0], [1], [0, 0, 1, 1], [], []>} : vector<8x32xf32>, vector<32x32xf32>, vector<8x32xf32> -> vector<8x32xf32>
    %952 = vector.broadcast %12 : vector<1x32xf32> to vector<8x32xf32>
    %953 = arith.addf %951, %952 : vector<8x32xf32>
    %cst_362 = arith.constant 3.000000e+01 : f32
    %954 = vector.broadcast %cst_362 : f32 to vector<8x32xf32>
    %955 = arith.minimumf %953, %954 : vector<8x32xf32>
    %956 = math.exp %955 : vector<8x32xf32>
    %cst_363 = arith.constant 1.000000e+00 : f32
    %957 = vector.broadcast %cst_363 : f32 to vector<8x32xf32>
    %958 = arith.addf %957, %956 : vector<8x32xf32>
    %959 = arith.mulf %958, %958 : vector<8x32xf32>
    %cst_364 = arith.constant 1.000000e+00 : f32
    %960 = vector.broadcast %cst_364 : f32 to vector<8x32xf32>
    %961 = arith.subf %959, %960 : vector<8x32xf32>
    %962 = arith.mulf %953, %961 : vector<8x32xf32>
    %cst_365 = arith.constant 1.000000e+00 : f32
    %963 = vector.broadcast %cst_365 : f32 to vector<8x32xf32>
    %964 = arith.addf %959, %963 : vector<8x32xf32>
    %965 = tpu.reciprocal %964 {approx = true} : vector<8x32xf32> -> vector<8x32xf32>
    %966 = arith.mulf %962, %965 : vector<8x32xf32>
    %cst_366 = arith.constant dense<0.000000e+00> : vector<8x16xf32>
    %967 = tpu.matmul %966, %11, %cst_366 {dimension_numbers = #tpu.dot_dimension_numbers<[1], [0], [0], [1], [0, 0, 1, 1], [], []>} : vector<8x32xf32>, vector<32x16xf32>, vector<8x16xf32> -> vector<8x16xf32>
    %968 = vector.broadcast %13 : vector<1x16xf32> to vector<8x16xf32>
    %969 = arith.addf %967, %968 : vector<8x16xf32>
    %cst_367 = arith.constant 1.00172412 : f32
    %970 = vector.broadcast %cst_367 : f32 to vector<8x16xf32>
    %971 = arith.mulf %970, %932 : vector<8x16xf32>
    %cst_368 = arith.constant 0.0587462559 : f32
    %972 = vector.broadcast %cst_368 : f32 to vector<8x16xf32>
    %973 = arith.mulf %972, %969 : vector<8x16xf32>
    %974 = arith.subf %971, %973 : vector<8x16xf32>
    %975 = vector.broadcast %5 : vector<1x16xf32> to vector<8x16xf32>
    %976 = arith.maximumf %974, %975 : vector<8x16xf32>
    %977 = vector.broadcast %8 : vector<1x16xf32> to vector<8x16xf32>
    %978 = arith.minimumf %976, %977 : vector<8x16xf32>
    %cst_369 = arith.constant 0.63774538 : f32
    %979 = vector.broadcast %cst_369 : f32 to vector<8x16xf32>
    %980 = arith.mulf %979, %978 : vector<8x16xf32>
    %cst_370 = arith.constant 0.362254292 : f32
    %981 = vector.broadcast %cst_370 : f32 to vector<8x16xf32>
    %982 = arith.mulf %981, %932 : vector<8x16xf32>
    %983 = arith.addf %980, %982 : vector<8x16xf32>
    %c2_371 = arith.constant 2 : index
    %c0_372 = arith.constant 0 : index
    %c0_373 = arith.constant 0 : index
    %984 = vector.load %arg1[%c2_371, %c0_372, %c0_373] : memref<20x8x16xf32, #tpu.memory_space<vmem>>, vector<1x8x16xf32>
    %985 = vector.shape_cast %984 : vector<1x8x16xf32> to vector<8x16xf32>
    %986 = arith.addf %983, %985 : vector<8x16xf32>
    %cst_374 = arith.constant dense<0.000000e+00> : vector<8x32xf32>
    %987 = tpu.matmul %986, %9, %cst_374 {dimension_numbers = #tpu.dot_dimension_numbers<[1], [0], [0], [1], [0, 0, 1, 1], [], []>} : vector<8x16xf32>, vector<16x32xf32>, vector<8x32xf32> -> vector<8x32xf32>
    %c1 = arith.constant 1 : index
    %c0_375 = arith.constant 0 : index
    %c0_376 = arith.constant 0 : index
    %988 = vector.load %arg2[%c1, %c0_375, %c0_376] : memref<20x1x32xf32, #tpu.memory_space<vmem>>, vector<1x1x32xf32>
    %989 = vector.shape_cast %988 : vector<1x1x32xf32> to vector<1x32xf32>
    %990 = vector.broadcast %989 : vector<1x32xf32> to vector<8x32xf32>
    %991 = arith.addf %987, %990 : vector<8x32xf32>
    %cst_377 = arith.constant 3.000000e+01 : f32
    %992 = vector.broadcast %cst_377 : f32 to vector<8x32xf32>
    %993 = arith.minimumf %991, %992 : vector<8x32xf32>
    %994 = math.exp %993 : vector<8x32xf32>
    %cst_378 = arith.constant 1.000000e+00 : f32
    %995 = vector.broadcast %cst_378 : f32 to vector<8x32xf32>
    %996 = arith.addf %995, %994 : vector<8x32xf32>
    %997 = arith.mulf %996, %996 : vector<8x32xf32>
    %cst_379 = arith.constant 1.000000e+00 : f32
    %998 = vector.broadcast %cst_379 : f32 to vector<8x32xf32>
    %999 = arith.subf %997, %998 : vector<8x32xf32>
    %1000 = arith.mulf %991, %999 : vector<8x32xf32>
    %cst_380 = arith.constant 1.000000e+00 : f32
    %1001 = vector.broadcast %cst_380 : f32 to vector<8x32xf32>
    %1002 = arith.addf %997, %1001 : vector<8x32xf32>
    %1003 = tpu.reciprocal %1002 {approx = true} : vector<8x32xf32> -> vector<8x32xf32>
    %1004 = arith.mulf %1000, %1003 : vector<8x32xf32>
    %cst_381 = arith.constant dense<0.000000e+00> : vector<8x32xf32>
    %1005 = tpu.matmul %1004, %10, %cst_381 {dimension_numbers = #tpu.dot_dimension_numbers<[1], [0], [0], [1], [0, 0, 1, 1], [], []>} : vector<8x32xf32>, vector<32x32xf32>, vector<8x32xf32> -> vector<8x32xf32>
    %1006 = vector.broadcast %12 : vector<1x32xf32> to vector<8x32xf32>
    %1007 = arith.addf %1005, %1006 : vector<8x32xf32>
    %cst_382 = arith.constant 3.000000e+01 : f32
    %1008 = vector.broadcast %cst_382 : f32 to vector<8x32xf32>
    %1009 = arith.minimumf %1007, %1008 : vector<8x32xf32>
    %1010 = math.exp %1009 : vector<8x32xf32>
    %cst_383 = arith.constant 1.000000e+00 : f32
    %1011 = vector.broadcast %cst_383 : f32 to vector<8x32xf32>
    %1012 = arith.addf %1011, %1010 : vector<8x32xf32>
    %1013 = arith.mulf %1012, %1012 : vector<8x32xf32>
    %cst_384 = arith.constant 1.000000e+00 : f32
    %1014 = vector.broadcast %cst_384 : f32 to vector<8x32xf32>
    %1015 = arith.subf %1013, %1014 : vector<8x32xf32>
    %1016 = arith.mulf %1007, %1015 : vector<8x32xf32>
    %cst_385 = arith.constant 1.000000e+00 : f32
    %1017 = vector.broadcast %cst_385 : f32 to vector<8x32xf32>
    %1018 = arith.addf %1013, %1017 : vector<8x32xf32>
    %1019 = tpu.reciprocal %1018 {approx = true} : vector<8x32xf32> -> vector<8x32xf32>
    %1020 = arith.mulf %1016, %1019 : vector<8x32xf32>
    %cst_386 = arith.constant dense<0.000000e+00> : vector<8x16xf32>
    %1021 = tpu.matmul %1020, %11, %cst_386 {dimension_numbers = #tpu.dot_dimension_numbers<[1], [0], [0], [1], [0, 0, 1, 1], [], []>} : vector<8x32xf32>, vector<32x16xf32>, vector<8x16xf32> -> vector<8x16xf32>
    %1022 = vector.broadcast %13 : vector<1x16xf32> to vector<8x16xf32>
    %1023 = arith.addf %1021, %1022 : vector<8x16xf32>
    %cst_387 = arith.constant 1.00062418 : f32
    %1024 = vector.broadcast %cst_387 : f32 to vector<8x16xf32>
    %1025 = arith.mulf %1024, %986 : vector<8x16xf32>
    %cst_388 = arith.constant 0.0353385247 : f32
    %1026 = vector.broadcast %cst_388 : f32 to vector<8x16xf32>
    %1027 = arith.mulf %1026, %1023 : vector<8x16xf32>
    %1028 = arith.subf %1025, %1027 : vector<8x16xf32>
    %1029 = vector.broadcast %5 : vector<1x16xf32> to vector<8x16xf32>
    %1030 = arith.maximumf %1028, %1029 : vector<8x16xf32>
    %1031 = vector.broadcast %8 : vector<1x16xf32> to vector<8x16xf32>
    %1032 = arith.minimumf %1030, %1031 : vector<8x16xf32>
    %cst_389 = arith.constant 0.91986984 : f32
    %1033 = vector.broadcast %cst_389 : f32 to vector<8x16xf32>
    %1034 = arith.mulf %1033, %1032 : vector<8x16xf32>
    %cst_390 = arith.constant 0.080130145 : f32
    %1035 = vector.broadcast %cst_390 : f32 to vector<8x16xf32>
    %1036 = arith.mulf %1035, %986 : vector<8x16xf32>
    %1037 = arith.addf %1034, %1036 : vector<8x16xf32>
    %c1_391 = arith.constant 1 : index
    %c0_392 = arith.constant 0 : index
    %c0_393 = arith.constant 0 : index
    %1038 = vector.load %arg1[%c1_391, %c0_392, %c0_393] : memref<20x8x16xf32, #tpu.memory_space<vmem>>, vector<1x8x16xf32>
    %1039 = vector.shape_cast %1038 : vector<1x8x16xf32> to vector<8x16xf32>
    %1040 = arith.addf %1037, %1039 : vector<8x16xf32>
    %cst_394 = arith.constant dense<0.000000e+00> : vector<8x32xf32>
    %1041 = tpu.matmul %1040, %9, %cst_394 {dimension_numbers = #tpu.dot_dimension_numbers<[1], [0], [0], [1], [0, 0, 1, 1], [], []>} : vector<8x16xf32>, vector<16x32xf32>, vector<8x32xf32> -> vector<8x32xf32>
    %c0_395 = arith.constant 0 : index
    %c0_396 = arith.constant 0 : index
    %c0_397 = arith.constant 0 : index
    %1042 = vector.load %arg2[%c0_395, %c0_396, %c0_397] : memref<20x1x32xf32, #tpu.memory_space<vmem>>, vector<1x1x32xf32>
    %1043 = vector.shape_cast %1042 : vector<1x1x32xf32> to vector<1x32xf32>
    %1044 = vector.broadcast %1043 : vector<1x32xf32> to vector<8x32xf32>
    %1045 = arith.addf %1041, %1044 : vector<8x32xf32>
    %cst_398 = arith.constant 3.000000e+01 : f32
    %1046 = vector.broadcast %cst_398 : f32 to vector<8x32xf32>
    %1047 = arith.minimumf %1045, %1046 : vector<8x32xf32>
    %1048 = math.exp %1047 : vector<8x32xf32>
    %cst_399 = arith.constant 1.000000e+00 : f32
    %1049 = vector.broadcast %cst_399 : f32 to vector<8x32xf32>
    %1050 = arith.addf %1049, %1048 : vector<8x32xf32>
    %1051 = arith.mulf %1050, %1050 : vector<8x32xf32>
    %cst_400 = arith.constant 1.000000e+00 : f32
    %1052 = vector.broadcast %cst_400 : f32 to vector<8x32xf32>
    %1053 = arith.subf %1051, %1052 : vector<8x32xf32>
    %1054 = arith.mulf %1045, %1053 : vector<8x32xf32>
    %cst_401 = arith.constant 1.000000e+00 : f32
    %1055 = vector.broadcast %cst_401 : f32 to vector<8x32xf32>
    %1056 = arith.addf %1051, %1055 : vector<8x32xf32>
    %1057 = tpu.reciprocal %1056 {approx = true} : vector<8x32xf32> -> vector<8x32xf32>
    %1058 = arith.mulf %1054, %1057 : vector<8x32xf32>
    %cst_402 = arith.constant dense<0.000000e+00> : vector<8x32xf32>
    %1059 = tpu.matmul %1058, %10, %cst_402 {dimension_numbers = #tpu.dot_dimension_numbers<[1], [0], [0], [1], [0, 0, 1, 1], [], []>} : vector<8x32xf32>, vector<32x32xf32>, vector<8x32xf32> -> vector<8x32xf32>
    %1060 = vector.broadcast %12 : vector<1x32xf32> to vector<8x32xf32>
    %1061 = arith.addf %1059, %1060 : vector<8x32xf32>
    %cst_403 = arith.constant 3.000000e+01 : f32
    %1062 = vector.broadcast %cst_403 : f32 to vector<8x32xf32>
    %1063 = arith.minimumf %1061, %1062 : vector<8x32xf32>
    %1064 = math.exp %1063 : vector<8x32xf32>
    %cst_404 = arith.constant 1.000000e+00 : f32
    %1065 = vector.broadcast %cst_404 : f32 to vector<8x32xf32>
    %1066 = arith.addf %1065, %1064 : vector<8x32xf32>
    %1067 = arith.mulf %1066, %1066 : vector<8x32xf32>
    %cst_405 = arith.constant 1.000000e+00 : f32
    %1068 = vector.broadcast %cst_405 : f32 to vector<8x32xf32>
    %1069 = arith.subf %1067, %1068 : vector<8x32xf32>
    %1070 = arith.mulf %1061, %1069 : vector<8x32xf32>
    %cst_406 = arith.constant 1.000000e+00 : f32
    %1071 = vector.broadcast %cst_406 : f32 to vector<8x32xf32>
    %1072 = arith.addf %1067, %1071 : vector<8x32xf32>
    %1073 = tpu.reciprocal %1072 {approx = true} : vector<8x32xf32> -> vector<8x32xf32>
    %1074 = arith.mulf %1070, %1073 : vector<8x32xf32>
    %cst_407 = arith.constant dense<0.000000e+00> : vector<8x16xf32>
    %1075 = tpu.matmul %1074, %11, %cst_407 {dimension_numbers = #tpu.dot_dimension_numbers<[1], [0], [0], [1], [0, 0, 1, 1], [], []>} : vector<8x32xf32>, vector<32x16xf32>, vector<8x16xf32> -> vector<8x16xf32>
    %1076 = vector.broadcast %13 : vector<1x16xf32> to vector<8x16xf32>
    %1077 = arith.addf %1075, %1076 : vector<8x16xf32>
    %cst_408 = arith.constant 1.000050e+00 : f32
    %1078 = vector.broadcast %cst_408 : f32 to vector<8x16xf32>
    %1079 = arith.mulf %1078, %1040 : vector<8x16xf32>
    %cst_409 = arith.constant 1.000050e-02 : f32
    %1080 = vector.broadcast %cst_409 : f32 to vector<8x16xf32>
    %1081 = arith.mulf %1080, %1077 : vector<8x16xf32>
    %1082 = arith.subf %1079, %1081 : vector<8x16xf32>
    %1083 = vector.broadcast %5 : vector<1x16xf32> to vector<8x16xf32>
    %1084 = arith.maximumf %1082, %1083 : vector<8x16xf32>
    %1085 = vector.broadcast %8 : vector<1x16xf32> to vector<8x16xf32>
    %1086 = arith.minimumf %1084, %1085 : vector<8x16xf32>
    %cst_410 = arith.constant 1.000000e+00 : f32
    %1087 = vector.broadcast %cst_410 : f32 to vector<8x16xf32>
    %1088 = arith.mulf %1087, %1086 : vector<8x16xf32>
    %cst_411 = arith.constant 0.000000e+00 : f32
    %1089 = vector.broadcast %cst_411 : f32 to vector<8x16xf32>
    %1090 = arith.mulf %1089, %1040 : vector<8x16xf32>
    %1091 = arith.addf %1088, %1090 : vector<8x16xf32>
    %c0_412 = arith.constant 0 : index
    %c0_413 = arith.constant 0 : index
    %c0_414 = arith.constant 0 : index
    %1092 = vector.load %arg1[%c0_412, %c0_413, %c0_414] : memref<20x8x16xf32, #tpu.memory_space<vmem>>, vector<1x8x16xf32>
    %1093 = vector.shape_cast %1092 : vector<1x8x16xf32> to vector<8x16xf32>
    %1094 = arith.addf %1091, %1093 : vector<8x16xf32>
    %1095 = vector.broadcast %5 : vector<1x16xf32> to vector<8x16xf32>
    %1096 = arith.maximumf %1094, %1095 : vector<8x16xf32>
    %1097 = vector.broadcast %8 : vector<1x16xf32> to vector<8x16xf32>
    %1098 = arith.minimumf %1096, %1097 : vector<8x16xf32>
    %c0_415 = arith.constant 0 : index
    %c0_416 = arith.constant 0 : index
    %1099 = vector.load %arg8[%c0_415, %c0_416] : memref<8x16xf32, #tpu.memory_space<vmem>>, vector<8x16xf32>
    tpu.vector_store %arg8[%c0_415, %c0_416], %1098 {strides = array<i32>} : memref<8x16xf32, #tpu.memory_space<vmem>>, vector<8x16xf32>,
    return
  }
}

</mosaic_0001>

<bundles_post_ra>
// kernel: tpu_custom_call.1
= control target key start
LH: loop header
LB: loop body
LE: loop exit
PB: predicated region body
PF: predicated region fallthrough
CT: control target
= control target key end

     0   :  { %v6730_v2 = vmov 0.0|0.0   ;;  %vm6731_vm0 = vmmov 0   ;;  %v6732_v4 = vmov 0.0   ;;  %s7450_s0 = inlined_call_operand.vmem [shape: f32[8,16], index: 0, kind: input, shape index: {}]   ;;  %s7451_s1 = inlined_call_operand.vmem [shape: f32[20,8,16], index: 1, kind: input, shape index: {}]   ;;  %s7452_s2 = inlined_call_operand.vmem [shape: f32[20,1,32], index: 2, kind: input, shape index: {}]   ;;  %s7453_s3 = inlined_call_operand.vmem [shape: f32[16,32], index: 3, kind: input, shape index: {}]   ;;  %s7454_s4 = inlined_call_operand.vmem [shape: f32[32,32], index: 4, kind: input, shape index: {}]   ;;  %s7455_s5 = inlined_call_operand.vmem [shape: f32[1,32], index: 5, kind: input, shape index: {}]   ;;  %s7456_s6 = inlined_call_operand.vmem [shape: f32[32,16], index: 6, kind: input, shape index: {}]   ;;  %s7457_s7 = inlined_call_operand.vmem [shape: f32[1,16], index: 7, kind: input, shape index: {}]   ;;  %s7458_s8 = inlined_call_operand.hbm [shape: f32[8,16], index: 8, kind: output, shape index: {}]  }
   0x1   :  { %v35_v0 = vld [vmem:[%s7453_s3] sm:$0xff]  ;;  %v36_v1 = vld [vmem:[%s7453_s3 + $0x8] sm:$0xff]  ;;  %6236 = vmatprep.subr.bf16.mxu0 %v6730_v2  ;;  %5660 = vmatprep.mubr.msk.f32.mxu0 %vm6731_vm0, %v6732_v4 }
   0x2   :  { %v6788_v3 = vpack.c.bf16 %v36_v1, %v35_v0  ;;  %6239 = vmatprep.subr.bf16.mxu1 %v6730_v2  ;;  %5671 = vmatprep.mubr.msk.f32.mxu1 %vm6731_vm0, %v6732_v4 }
   0x3   :  { %13 = vsyncpa [#allocation3], 0  ;;  %v6799_v5 = vld [vmem:[%s7450_s0] sm:$0xff]  ;;  %vm56_vm1 = vcmask 130048   ;;  %v38_v7 = vld [vmem:[%s7454_s4 + $0x8] sm:$0xff]  ;;  %vm146_vm2 = vcmask 261120   ;;  %v30_v46 = vlaneseq }
   0x4   :  { %6238 = vmatpush3.bf16.msra.mxu0 %v6788_v3  ;;  %v37_v6 = vld [vmem:[%s7454_s4] sm:$0xff]  ;;  %v39_v9 = vld [vmem:[%s7454_s4 + $0x10] sm:$0xff]  ;;  %v40_v10 = vld [vmem:[%s7454_s4 + $0x18] sm:$0xff]  ;;  %v309_v51 = vmul.f32 1.1064918, %v6799_v5  ;;  %s6735_s11 = smov [#allocation2]  }
   0x5   :  { %6245 = vmatprep.subr.bf16.mxu0 %v6730_v2  ;;  %v6812_v8 = vpack.c.bf16 %v38_v7, %v37_v6  ;;  %v6822_v11 = vpack.c.bf16 %v40_v10, %v39_v9  ;;  %v5237_v12 = vld [vmem:[%s7452_s2 + $0x13] ss:$0 sm:$0xff]  ;;  %v41_v26 = vld [vmem:[%s7456_s6] sm:$0xff]  ;;  %v42_v27 = vld [vmem:[%s7456_s6 + $0x8] sm:$0xff]  ;;  %v31_v47 = vand.u32 127, %v30_v46  ;;  %s5228_s12 = sshll.u32 %s6735_s11, 4  ;;  %s5229_s12 = int_to_ptr.vmem [resolvable:$true] %s5228_s12 }
   0x6   :  { %v6840_v28 = vpack.c.bf16 %v42_v27, %v41_v26  ;;  %v43_v29 = vld [vmem:[%s7456_s6 + $0x10] sm:$0xff]  ;;  %v44_v30 = vld [vmem:[%s7456_s6 + $0x18] sm:$0xff]  ;;  %v6857_v32 = vld [vmem:[%s7455_s5] ss:$0 sm:$0xff]  ;;  %v6733_v54 = vmov -1e+30   ;;  %p6711_p1 = scmp.lt.s32.totalorder %s5229_s12, %s5229_s12 }
   0x7   :  { %5661 = vmatmul.mubr.msk.f32.vlgmr.msra.gmra.mrb[0].mxu0 %vm56_vm1, %v6799_v5  ;;  %6241 = vmatpush3.bf16.msra.mxu1 %v6812_v8  ;;  %v6850_v31 = vpack.c.bf16 %v44_v30, %v43_v29  ;;  %v6870_v48 = vld [vmem:[%s7457_s7] ss:$0 sm:$0xff]  ;;  %vm32_vm3 = vcmp.lt.s32.totalorder %v31_v47, 4  ;;  %v6734_v57 = vmov 1e+30   ;;  %v5245_v63 = vld [vmem:[%s7451_s1 + $0x98] sm:$0xff] }
   0x8   :  { %5682 = vmatprep.mubr.msk.f32.mxu0 %vm6731_vm0, %v6732_v4  ;;  %6242 = vmatprep.subr.bf16.mxu1 %v6730_v2  ;;  %v6874_v55 = vsel %vm32_vm3, -1.0, %v6733_v54  ;;  %v6876_v58 = vsel %vm32_vm3, 1.0, %v6734_v57  ;;  %v315_v60 = vmul.f32 0.8998877, %v6799_v5  ;;  %v5247_v5 = vld [vmem:[%s7452_s2 + $0x12] ss:$0 sm:$0xff] }
   0x9   :  { %6247 = vmatpush3.bf16.msra.mxu0 %v6840_v28  ;;  %v5253_v47 = vld [vmem:[%s7451_s1 + $0x90] sm:$0xff]  ;;  %s6706_s13 = scalar_lea.vmem %s5229_s12, 128 }
   0xa   :  { %6248 = vmatprep.subr.bf16.mxu0 %v6730_v2  ;;  %p6707_p0 = scmp.ne.s32.totalorder %s5229_s12, %s6706_s13  ;;  %p6712_p2 = scmp.lt.s32.totalorder %s6706_s13, %s6706_s13 }
   0xb   :  { %6244 = vmatpush3.bf16.msra.mxu1 %v6822_v11 }
   0xc   :  { %6251 = vmatprep.subr.bf16.mxu1 %v6730_v2  ;;  %p6713_p3 = por %p6712_p2, %p6711_p1 }
   0xd   :  { %6250 = vmatpush3.bf16.msra.mxu0 %v6850_v31 }
   0xe   :  { %6254 = vmatprep.subr.bf16.mxu0 %v6730_v2  ;;  %p6714_p4 = pnand %p6713_p3, %p6707_p0 }
  0xda   :  { %v126_v13 = vpop.f32.mrb[0].mxu0 }
  0xdb   :  { %v127_v14 = vadd.f32 %v5237_v12, %v126_v13  ;;  %v5662_v15 = vpop.f32.mrb[1].mxu0 }
  0xdd   :  { %v130_v16 = vmin.f32 %v127_v14, 30.0 }
  0xdf   :  { %v131_v17 = vmul.f32 1.442695, %v130_v16 }
  0xe1   :  { %6542 = vpow2.f32 %v131_v17 }
  0xeb   :  { %v6543_v18 = vpop.eup %6542 }
  0xec   :  { %v133_v19 = vadd.f32 1.0, %v6543_v18 }
  0xee   :  { %v134_v20 = vmul.f32 %v133_v19, %v133_v19 }
  0xf0   :  { %v137_v21 = vadd.f32 1.0, %v134_v20  ;;  %v5239_v22 = vadd.f32 -1.0, %v134_v20 }
  0xf2   :  { %6544 = vrcp.f32 %v137_v21  ;;  %v136_v23 = vmul.f32 %v5239_v22, %v127_v14 }
  0xfc   :  { %v6545_v24 = vpop.eup %6544 }
  0xfd   :  { %v139_v25 = vmul.f32 %v6545_v24, %v136_v23 }
  0xff   :  { %5672 = vmatmul.mubr.msk.f32.vlgmr.msra.gmra.mrb[0].mxu1 %vm146_vm2, %v139_v25 }
 0x100   :  { %6253 = vmatpush3.bf16.msra.mxu1 %v6788_v3  ;;  %5689 = vmatprep.mubr.msk.f32.mxu1 %vm6731_vm0, %v6732_v4 }
 0x101   :  { %6260 = vmatprep.subr.bf16.mxu1 %v6730_v2 }
 0x1d2   :  { %v216_v33 = vpop.f32.mrb[0].mxu1 }
 0x1d3   :  { %v217_v34 = vadd.f32 %v6857_v32, %v216_v33  ;;  %v5673_v35 = vpop.f32.mrb[1].mxu1 }
 0x1d5   :  { %v220_v36 = vmin.f32 %v217_v34, 30.0 }
 0x1d7   :  { %v221_v37 = vmul.f32 1.442695, %v220_v36 }
 0x1d9   :  { %6546 = vpow2.f32 %v221_v37 }
 0x1e3   :  { %v6547_v38 = vpop.eup %6546 }
 0x1e4   :  { %v223_v39 = vadd.f32 1.0, %v6547_v38 }
 0x1e6   :  { %v224_v40 = vmul.f32 %v223_v39, %v223_v39 }
 0x1e8   :  { %v227_v41 = vadd.f32 1.0, %v224_v40  ;;  %v5242_v42 = vadd.f32 -1.0, %v224_v40 }
 0x1ea   :  { %6548 = vrcp.f32 %v227_v41  ;;  %v226_v43 = vmul.f32 %v5242_v42, %v217_v34 }
 0x1f4   :  { %v6549_v44 = vpop.eup %6548 }
 0x1f5   :  { %v229_v45 = vmul.f32 %v6549_v44, %v226_v43 }
 0x1f7   :  { %5683 = vmatmul.mubr.msk.f32.vlgmr.msra.gmra.mrb[2].mxu0 %vm146_vm2, %v229_v45 }
 0x1f8   :  { %6256 = vmatpush3.bf16.msra.mxu0 %v6812_v8  ;;  %5700 = vmatprep.mubr.msk.f32.mxu0 %vm6731_vm0, %v6732_v4 }
 0x1f9   :  { %6257 = vmatprep.subr.bf16.mxu0 %v6730_v2 }
 0x1fc   :  { %6259 = vmatpush3.bf16.msra.mxu0 %v6822_v11 }
 0x1fd   :  { %6266 = vmatprep.subr.bf16.mxu0 %v6730_v2 }
 0x2ca   :  { %v305_v49 = vpop.f32.mrb[2].mxu0 }
 0x2cb   :  { %v306_v50 = vadd.f32 %v6870_v48, %v305_v49  ;;  %v5684_v52 = vpop.f32.mrb[3].mxu0 }
 0x2cd   :  { %v310_v53 = vmul.f32 0.4736288, %v306_v50 }
 0x2cf   :  { %v311_v56 = vsub.f32 %v309_v51, %v310_v53  ;;  %v5255_v51 = vld [vmem:[%s7452_s2 + $0x11] ss:$0 sm:$0xff] }
 0x2d1   :  { %v312_v59 = vmax.f32 %v311_v56, %v6874_v55 }
 0x2d3   :  { %v313_v61 = vmin.f32 %v312_v59, %v6876_v58 }
 0x2d5   :  { %v314_v62 = vmul.f32 0.09965268, %v313_v61 }
 0x2d7   :  { %v316_v0 = vadd.f32 %v315_v60, %v314_v62 }
 0x2d9   :  { %v319_v1 = vadd.f32 %v5245_v63, %v316_v0 }
 0x2db   :  { %5690 = vmatmul.mubr.msk.f32.vlgmr.msra.gmra.mrb[2].mxu1 %vm56_vm1, %v319_v1  ;;  %v567_v40 = vmul.f32 1.095371, %v319_v1  ;;  %v573_v46 = vmul.f32 0.8947265, %v319_v1 }
 0x2dc   :  { %6262 = vmatpush3.bf16.msra.mxu1 %v6840_v28  ;;  %5711 = vmatprep.mubr.msk.f32.mxu1 %vm6731_vm0, %v6732_v4 }
 0x2dd   :  { %6263 = vmatprep.subr.bf16.mxu1 %v6730_v2 }
 0x2e0   :  { %6265 = vmatpush3.bf16.msra.mxu1 %v6850_v31 }
 0x2e1   :  { %6269 = vmatprep.subr.bf16.mxu1 %v6730_v2 }
 0x3ae   :  { %v397_v6 = vpop.f32.mrb[2].mxu1 }
 0x3af   :  { %v398_v7 = vadd.f32 %v5247_v5, %v397_v6  ;;  %v5691_v9 = vpop.f32.mrb[3].mxu1 }
 0x3b1   :  { %v401_v10 = vmin.f32 %v398_v7, 30.0 }
 0x3b3   :  { %v402_v12 = vmul.f32 1.442695, %v401_v10 }
 0x3b5   :  { %6550 = vpow2.f32 %v402_v12 }
 0x3bf   :  { %v6551_v13 = vpop.eup %6550 }
 0x3c0   :  { %v404_v14 = vadd.f32 1.0, %v6551_v13 }
 0x3c2   :  { %v405_v15 = vmul.f32 %v404_v14, %v404_v14 }
 0x3c4   :  { %v408_v16 = vadd.f32 1.0, %v405_v15  ;;  %v5249_v17 = vadd.f32 -1.0, %v405_v15 }
 0x3c6   :  { %6552 = vrcp.f32 %v408_v16  ;;  %v407_v18 = vmul.f32 %v5249_v17, %v398_v7 }
 0x3d0   :  { %v6553_v19 = vpop.eup %6552 }
 0x3d1   :  { %v410_v20 = vmul.f32 %v6553_v19, %v407_v18 }
 0x3d3   :  { %5701 = vmatmul.mubr.msk.f32.vlgmr.msra.gmra.mrb[4].mxu0 %vm146_vm2, %v410_v20 }
 0x3d4   :  { %6268 = vmatpush3.bf16.msra.mxu0 %v6788_v3  ;;  %5718 = vmatprep.mubr.msk.f32.mxu0 %vm6731_vm0, %v6732_v4 }
 0x3d5   :  { %6275 = vmatprep.subr.bf16.mxu0 %v6730_v2 }
 0x4a6   :  { %v480_v21 = vpop.f32.mrb[4].mxu0 }
 0x4a7   :  { %v481_v22 = vadd.f32 %v6857_v32, %v480_v21  ;;  %v5702_v23 = vpop.f32.mrb[5].mxu0 }
 0x4a9   :  { %v484_v24 = vmin.f32 %v481_v22, 30.0 }
 0x4ab   :  { %v485_v25 = vmul.f32 1.442695, %v484_v24 }
 0x4ad   :  { %6554 = vpow2.f32 %v485_v25 }
 0x4b7   :  { %v6555_v26 = vpop.eup %6554 }
 0x4b8   :  { %v487_v27 = vadd.f32 1.0, %v6555_v26 }
 0x4ba   :  { %v488_v29 = vmul.f32 %v487_v27, %v487_v27 }
 0x4bc   :  { %v491_v30 = vadd.f32 1.0, %v488_v29  ;;  %v5251_v33 = vadd.f32 -1.0, %v488_v29 }
 0x4be   :  { %6556 = vrcp.f32 %v491_v30  ;;  %v490_v34 = vmul.f32 %v5251_v33, %v481_v22 }
 0x4c8   :  { %v6557_v35 = vpop.eup %6556 }
 0x4c9   :  { %v493_v36 = vmul.f32 %v6557_v35, %v490_v34  ;;  %v5261_v34 = vld [vmem:[%s7451_s1 + $0x88] sm:$0xff] }
 0x4cb   :  { %5712 = vmatmul.mubr.msk.f32.vlgmr.msra.gmra.mrb[4].mxu1 %vm146_vm2, %v493_v36 }
 0x4cc   :  { %6271 = vmatpush3.bf16.msra.mxu1 %v6812_v8  ;;  %5729 = vmatprep.mubr.msk.f32.mxu1 %vm6731_vm0, %v6732_v4 }
 0x4cd   :  { %6272 = vmatprep.subr.bf16.mxu1 %v6730_v2 }
 0x4d0   :  { %6274 = vmatpush3.bf16.msra.mxu1 %v6822_v11 }
 0x4d1   :  { %6281 = vmatprep.subr.bf16.mxu1 %v6730_v2 }
 0x59e   :  { %v563_v37 = vpop.f32.mrb[4].mxu1 }
 0x59f   :  { %v564_v38 = vadd.f32 %v6870_v48, %v563_v37  ;;  %v5713_v39 = vpop.f32.mrb[5].mxu1  ;;  %v5263_v37 = vld [vmem:[%s7452_s2 + $0x10] ss:$0 sm:$0xff] }
 0x5a1   :  { %v568_v41 = vmul.f32 0.44703215, %v564_v38 }
 0x5a3   :  { %v569_v42 = vsub.f32 %v567_v40, %v568_v41 }
 0x5a5   :  { %v570_v43 = vmax.f32 %v569_v42, %v6874_v55 }
 0x5a7   :  { %v571_v44 = vmin.f32 %v570_v43, %v6876_v58 }
 0x5a9   :  { %v572_v45 = vmul.f32 0.10488376, %v571_v44 }
 0x5ab   :  { %v574_v49 = vadd.f32 %v573_v46, %v572_v45 }
 0x5ad   :  { %v577_v50 = vadd.f32 %v5253_v47, %v574_v49 }
 0x5af   :  { %5719 = vmatmul.mubr.msk.f32.vlgmr.msra.gmra.mrb[6].mxu0 %vm56_vm1, %v577_v50  ;;  %v825_v24 = vmul.f32 1.0849413, %v577_v50  ;;  %v831_v33 = vmul.f32 0.8889856, %v577_v50 }
 0x5b0   :  { %6277 = vmatpush3.bf16.msra.mxu0 %v6840_v28  ;;  %5740 = vmatprep.mubr.msk.f32.mxu0 %vm6731_vm0, %v6732_v4 }
 0x5b1   :  { %6278 = vmatprep.subr.bf16.mxu0 %v6730_v2 }
 0x5b4   :  { %6280 = vmatpush3.bf16.msra.mxu0 %v6850_v31 }
 0x5b5   :  { %6284 = vmatprep.subr.bf16.mxu0 %v6730_v2 }
 0x682   :  { %v655_v52 = vpop.f32.mrb[6].mxu0 }
 0x683   :  { %v656_v53 = vadd.f32 %v5255_v51, %v655_v52  ;;  %v5720_v54 = vpop.f32.mrb[7].mxu0 }
 0x685   :  { %v659_v56 = vmin.f32 %v656_v53, 30.0 }
 0x687   :  { %v660_v57 = vmul.f32 1.442695, %v659_v56 }
 0x689   :  { %6558 = vpow2.f32 %v660_v57 }
 0x693   :  { %v6559_v59 = vpop.eup %6558 }
 0x694   :  { %v662_v60 = vadd.f32 1.0, %v6559_v59 }
 0x696   :  { %v663_v61 = vmul.f32 %v662_v60, %v662_v60 }
 0x698   :  { %v666_v62 = vadd.f32 1.0, %v663_v61  ;;  %v5257_v63 = vadd.f32 -1.0, %v663_v61 }
 0x69a   :  { %6560 = vrcp.f32 %v666_v62  ;;  %v665_v0 = vmul.f32 %v5257_v63, %v656_v53 }
 0x6a4   :  { %v6561_v1 = vpop.eup %6560 }
 0x6a5   :  { %v668_v5 = vmul.f32 %v6561_v1, %v665_v0 }
 0x6a7   :  { %5730 = vmatmul.mubr.msk.f32.vlgmr.msra.gmra.mrb[6].mxu1 %vm146_vm2, %v668_v5 }
 0x6a8   :  { %6283 = vmatpush3.bf16.msra.mxu1 %v6788_v3  ;;  %5747 = vmatprep.mubr.msk.f32.mxu1 %vm6731_vm0, %v6732_v4 }
 0x6a9   :  { %6290 = vmatprep.subr.bf16.mxu1 %v6730_v2 }
 0x77a   :  { %v738_v6 = vpop.f32.mrb[6].mxu1 }
 0x77b   :  { %v739_v7 = vadd.f32 %v6857_v32, %v738_v6  ;;  %v5731_v9 = vpop.f32.mrb[7].mxu1 }
 0x77d   :  { %v742_v10 = vmin.f32 %v739_v7, 30.0 }
 0x77f   :  { %v743_v12 = vmul.f32 1.442695, %v742_v10 }
 0x781   :  { %6562 = vpow2.f32 %v743_v12 }
 0x78b   :  { %v6563_v13 = vpop.eup %6562 }
 0x78c   :  { %v745_v14 = vadd.f32 1.0, %v6563_v13 }
 0x78e   :  { %v746_v15 = vmul.f32 %v745_v14, %v745_v14 }
 0x790   :  { %v749_v16 = vadd.f32 1.0, %v746_v15  ;;  %v5259_v17 = vadd.f32 -1.0, %v746_v15 }
 0x792   :  { %6564 = vrcp.f32 %v749_v16  ;;  %v748_v18 = vmul.f32 %v5259_v17, %v739_v7 }
 0x79c   :  { %v6565_v19 = vpop.eup %6564 }
 0x79d   :  { %v751_v20 = vmul.f32 %v6565_v19, %v748_v18  ;;  %v5269_v18 = vld [vmem:[%s7451_s1 + $0x80] sm:$0xff] }
 0x79f   :  { %5741 = vmatmul.mubr.msk.f32.vlgmr.msra.gmra.mrb[8].mxu0 %vm146_vm2, %v751_v20 }
 0x7a0   :  { %6286 = vmatpush3.bf16.msra.mxu0 %v6812_v8  ;;  %5758 = vmatprep.mubr.msk.f32.mxu0 %vm6731_vm0, %v6732_v4 }
 0x7a1   :  { %6287 = vmatprep.subr.bf16.mxu0 %v6730_v2 }
 0x7a4   :  { %6289 = vmatpush3.bf16.msra.mxu0 %v6822_v11 }
 0x7a5   :  { %6296 = vmatprep.subr.bf16.mxu0 %v6730_v2 }
 0x872   :  { %v821_v21 = vpop.f32.mrb[8].mxu0 }
 0x873   :  { %v822_v22 = vadd.f32 %v6870_v48, %v821_v21  ;;  %v5742_v23 = vpop.f32.mrb[9].mxu0  ;;  %v5271_v21 = vld [vmem:[%s7452_s2 + $0xf] ss:$0 sm:$0xff] }
 0x875   :  { %v826_v25 = vmul.f32 0.42082974, %v822_v22 }
 0x877   :  { %v827_v26 = vsub.f32 %v825_v24, %v826_v25 }
 0x879   :  { %v828_v27 = vmax.f32 %v827_v26, %v6874_v55 }
 0x87b   :  { %v829_v29 = vmin.f32 %v828_v27, %v6876_v58 }
 0x87d   :  { %v830_v30 = vmul.f32 0.1106872, %v829_v29 }
 0x87f   :  { %v832_v35 = vadd.f32 %v831_v33, %v830_v30 }
 0x881   :  { %v835_v36 = vadd.f32 %v5261_v34, %v832_v35 }
 0x883   :  { %5748 = vmatmul.mubr.msk.f32.vlgmr.msra.gmra.mrb[8].mxu1 %vm56_vm1, %v835_v36  ;;  %v1083_v10 = vmul.f32 1.0751843, %v835_v36  ;;  %v1089_v17 = vmul.f32 0.88256425, %v835_v36 }
 0x884   :  { %6292 = vmatpush3.bf16.msra.mxu1 %v6840_v28  ;;  %5769 = vmatprep.mubr.msk.f32.mxu1 %vm6731_vm0, %v6732_v4 }
 0x885   :  { %6293 = vmatprep.subr.bf16.mxu1 %v6730_v2 }
 0x888   :  { %6295 = vmatpush3.bf16.msra.mxu1 %v6850_v31 }
 0x889   :  { %6299 = vmatprep.subr.bf16.mxu1 %v6730_v2 }
 0x956   :  { %v913_v38 = vpop.f32.mrb[8].mxu1 }
 0x957   :  { %v914_v39 = vadd.f32 %v5263_v37, %v913_v38  ;;  %v5749_v40 = vpop.f32.mrb[9].mxu1 }
 0x959   :  { %v917_v41 = vmin.f32 %v914_v39, 30.0 }
 0x95b   :  { %v918_v42 = vmul.f32 1.442695, %v917_v41 }
 0x95d   :  { %6566 = vpow2.f32 %v918_v42 }
 0x967   :  { %v6567_v43 = vpop.eup %6566 }
 0x968   :  { %v920_v44 = vadd.f32 1.0, %v6567_v43 }
 0x96a   :  { %v921_v45 = vmul.f32 %v920_v44, %v920_v44 }
 0x96c   :  { %v924_v46 = vadd.f32 1.0, %v921_v45  ;;  %v5265_v47 = vadd.f32 -1.0, %v921_v45 }
 0x96e   :  { %6568 = vrcp.f32 %v924_v46  ;;  %v923_v49 = vmul.f32 %v5265_v47, %v914_v39 }
 0x978   :  { %v6569_v50 = vpop.eup %6568 }
 0x979   :  { %v926_v51 = vmul.f32 %v6569_v50, %v923_v49 }
 0x97b   :  { %5759 = vmatmul.mubr.msk.f32.vlgmr.msra.gmra.mrb[10].mxu0 %vm146_vm2, %v926_v51 }
 0x97c   :  { %6298 = vmatpush3.bf16.msra.mxu0 %v6788_v3  ;;  %5776 = vmatprep.mubr.msk.f32.mxu0 %vm6731_vm0, %v6732_v4 }
 0x97d   :  { %6305 = vmatprep.subr.bf16.mxu0 %v6730_v2 }
 0xa4e   :  { %v996_v52 = vpop.f32.mrb[10].mxu0 }
 0xa4f   :  { %v997_v53 = vadd.f32 %v6857_v32, %v996_v52  ;;  %v5760_v54 = vpop.f32.mrb[11].mxu0 }
 0xa51   :  { %v1000_v56 = vmin.f32 %v997_v53, 30.0 }
 0xa53   :  { %v1001_v57 = vmul.f32 1.442695, %v1000_v56 }
 0xa55   :  { %6570 = vpow2.f32 %v1001_v57 }
 0xa5f   :  { %v6571_v59 = vpop.eup %6570 }
 0xa60   :  { %v1003_v60 = vadd.f32 1.0, %v6571_v59 }
 0xa62   :  { %v1004_v61 = vmul.f32 %v1003_v60, %v1003_v60 }
 0xa64   :  { %v1007_v62 = vadd.f32 1.0, %v1004_v61  ;;  %v5267_v63 = vadd.f32 -1.0, %v1004_v61 }
 0xa66   :  { %6572 = vrcp.f32 %v1007_v62  ;;  %v1006_v0 = vmul.f32 %v5267_v63, %v997_v53 }
 0xa70   :  { %v6573_v1 = vpop.eup %6572 }
 0xa71   :  { %v1009_v5 = vmul.f32 %v6573_v1, %v1006_v0  ;;  %v5277_v0 = vld [vmem:[%s7451_s1 + $0x78] sm:$0xff] }
 0xa73   :  { %5770 = vmatmul.mubr.msk.f32.vlgmr.msra.gmra.mrb[10].mxu1 %vm146_vm2, %v1009_v5 }
 0xa74   :  { %6301 = vmatpush3.bf16.msra.mxu1 %v6812_v8  ;;  %5787 = vmatprep.mubr.msk.f32.mxu1 %vm6731_vm0, %v6732_v4 }
 0xa75   :  { %6302 = vmatprep.subr.bf16.mxu1 %v6730_v2 }
 0xa78   :  { %6304 = vmatpush3.bf16.msra.mxu1 %v6822_v11 }
 0xa79   :  { %6311 = vmatprep.subr.bf16.mxu1 %v6730_v2 }
 0xb46   :  { %v1079_v6 = vpop.f32.mrb[10].mxu1 }
 0xb47   :  { %v1080_v7 = vadd.f32 %v6870_v48, %v1079_v6  ;;  %v5771_v9 = vpop.f32.mrb[11].mxu1  ;;  %v5279_v6 = vld [vmem:[%s7452_s2 + $0xe] ss:$0 sm:$0xff] }
 0xb49   :  { %v1084_v12 = vmul.f32 0.39499548, %v1080_v7 }
 0xb4b   :  { %v1085_v13 = vsub.f32 %v1083_v10, %v1084_v12 }
 0xb4d   :  { %v1086_v14 = vmax.f32 %v1085_v13, %v6874_v55 }
 0xb4f   :  { %v1087_v15 = vmin.f32 %v1086_v14, %v6876_v58 }
 0xb51   :  { %v1088_v16 = vmul.f32 0.11716392, %v1087_v15 }
 0xb53   :  { %v1090_v19 = vadd.f32 %v1089_v17, %v1088_v16 }
 0xb55   :  { %v1093_v20 = vadd.f32 %v5269_v18, %v1090_v19 }
 0xb57   :  { %5777 = vmatmul.mubr.msk.f32.vlgmr.msra.gmra.mrb[12].mxu0 %vm56_vm1, %v1093_v20  ;;  %v1341_v56 = vmul.f32 1.0660832, %v1093_v20  ;;  %v1347_v63 = vmul.f32 0.87533706, %v1093_v20 }
 0xb58   :  { %6307 = vmatpush3.bf16.msra.mxu0 %v6840_v28  ;;  %5798 = vmatprep.mubr.msk.f32.mxu0 %vm6731_vm0, %v6732_v4 }
 0xb59   :  { %6308 = vmatprep.subr.bf16.mxu0 %v6730_v2 }
 0xb5c   :  { %6310 = vmatpush3.bf16.msra.mxu0 %v6850_v31 }
 0xb5d   :  { %6314 = vmatprep.subr.bf16.mxu0 %v6730_v2 }
 0xc2a   :  { %v1171_v22 = vpop.f32.mrb[12].mxu0 }
 0xc2b   :  { %v1172_v23 = vadd.f32 %v5271_v21, %v1171_v22  ;;  %v5778_v24 = vpop.f32.mrb[13].mxu0 }
 0xc2d   :  { %v1175_v25 = vmin.f32 %v1172_v23, 30.0 }
 0xc2f   :  { %v1176_v26 = vmul.f32 1.442695, %v1175_v25 }
 0xc31   :  { %6574 = vpow2.f32 %v1176_v26 }
 0xc3b   :  { %v6575_v27 = vpop.eup %6574 }
 0xc3c   :  { %v1178_v29 = vadd.f32 1.0, %v6575_v27 }
 0xc3e   :  { %v1179_v30 = vmul.f32 %v1178_v29, %v1178_v29 }
 0xc40   :  { %v1182_v33 = vadd.f32 1.0, %v1179_v30  ;;  %v5273_v34 = vadd.f32 -1.0, %v1179_v30 }
 0xc42   :  { %6576 = vrcp.f32 %v1182_v33  ;;  %v1181_v35 = vmul.f32 %v5273_v34, %v1172_v23 }
 0xc4c   :  { %v6577_v36 = vpop.eup %6576 }
 0xc4d   :  { %v1184_v37 = vmul.f32 %v6577_v36, %v1181_v35 }
 0xc4f   :  { %5788 = vmatmul.mubr.msk.f32.vlgmr.msra.gmra.mrb[12].mxu1 %vm146_vm2, %v1184_v37 }
 0xc50   :  { %6313 = vmatpush3.bf16.msra.mxu1 %v6788_v3  ;;  %5805 = vmatprep.mubr.msk.f32.mxu1 %vm6731_vm0, %v6732_v4 }
 0xc51   :  { %6320 = vmatprep.subr.bf16.mxu1 %v6730_v2 }
 0xd22   :  { %v1254_v38 = vpop.f32.mrb[12].mxu1 }
 0xd23   :  { %v1255_v39 = vadd.f32 %v6857_v32, %v1254_v38  ;;  %v5789_v40 = vpop.f32.mrb[13].mxu1 }
 0xd25   :  { %v1258_v41 = vmin.f32 %v1255_v39, 30.0 }
 0xd27   :  { %v1259_v42 = vmul.f32 1.442695, %v1258_v41 }
 0xd29   :  { %6578 = vpow2.f32 %v1259_v42 }
 0xd33   :  { %v6579_v43 = vpop.eup %6578 }
 0xd34   :  { %v1261_v44 = vadd.f32 1.0, %v6579_v43 }
 0xd36   :  { %v1262_v45 = vmul.f32 %v1261_v44, %v1261_v44 }
 0xd38   :  { %v1265_v46 = vadd.f32 1.0, %v1262_v45  ;;  %v5275_v47 = vadd.f32 -1.0, %v1262_v45 }
 0xd3a   :  { %6580 = vrcp.f32 %v1265_v46  ;;  %v1264_v49 = vmul.f32 %v5275_v47, %v1255_v39 }
 0xd44   :  { %v6581_v50 = vpop.eup %6580 }
 0xd45   :  { %v1267_v51 = vmul.f32 %v6581_v50, %v1264_v49  ;;  %v5285_v49 = vld [vmem:[%s7451_s1 + $0x70] sm:$0xff] }
 0xd47   :  { %5799 = vmatmul.mubr.msk.f32.vlgmr.msra.gmra.mrb[14].mxu0 %vm146_vm2, %v1267_v51 }
 0xd48   :  { %6316 = vmatpush3.bf16.msra.mxu0 %v6812_v8  ;;  %5816 = vmatprep.mubr.msk.f32.mxu0 %vm6731_vm0, %v6732_v4 }
 0xd49   :  { %6317 = vmatprep.subr.bf16.mxu0 %v6730_v2 }
 0xd4c   :  { %6319 = vmatpush3.bf16.msra.mxu0 %v6822_v11 }
 0xd4d   :  { %6326 = vmatprep.subr.bf16.mxu0 %v6730_v2 }
 0xe1a   :  { %v1337_v52 = vpop.f32.mrb[14].mxu0 }
 0xe1b   :  { %v1338_v53 = vadd.f32 %v6870_v48, %v1337_v52  ;;  %v5800_v54 = vpop.f32.mrb[15].mxu0  ;;  %v5287_v52 = vld [vmem:[%s7452_s2 + $0xd] ss:$0 sm:$0xff] }
 0xe1d   :  { %v1342_v57 = vmul.f32 0.36950418, %v1338_v53 }
 0xe1f   :  { %v1343_v59 = vsub.f32 %v1341_v56, %v1342_v57 }
 0xe21   :  { %v1344_v60 = vmax.f32 %v1343_v59, %v6874_v55 }
 0xe23   :  { %v1345_v61 = vmin.f32 %v1344_v60, %v6876_v58 }
 0xe25   :  { %v1346_v62 = vmul.f32 0.12443981, %v1345_v61 }
 0xe27   :  { %v1348_v1 = vadd.f32 %v1347_v63, %v1346_v62 }
 0xe29   :  { %v1351_v5 = vadd.f32 %v5277_v0, %v1348_v1 }
 0xe2b   :  { %5806 = vmatmul.mubr.msk.f32.vlgmr.msra.gmra.mrb[14].mxu1 %vm56_vm1, %v1351_v5  ;;  %v1599_v41 = vmul.f32 1.057622, %v1351_v5  ;;  %v1605_v47 = vmul.f32 0.86714536, %v1351_v5 }
 0xe2c   :  { %6322 = vmatpush3.bf16.msra.mxu1 %v6840_v28  ;;  %5827 = vmatprep.mubr.msk.f32.mxu1 %vm6731_vm0, %v6732_v4 }
 0xe2d   :  { %6323 = vmatprep.subr.bf16.mxu1 %v6730_v2 }
 0xe30   :  { %6325 = vmatpush3.bf16.msra.mxu1 %v6850_v31 }
 0xe31   :  { %6329 = vmatprep.subr.bf16.mxu1 %v6730_v2 }
 0xefe   :  { %v1429_v7 = vpop.f32.mrb[14].mxu1 }
 0xeff   :  { %v1430_v9 = vadd.f32 %v5279_v6, %v1429_v7  ;;  %v5807_v10 = vpop.f32.mrb[15].mxu1 }
 0xf01   :  { %v1433_v12 = vmin.f32 %v1430_v9, 30.0 }
 0xf03   :  { %v1434_v13 = vmul.f32 1.442695, %v1433_v12 }
 0xf05   :  { %6582 = vpow2.f32 %v1434_v13 }
 0xf0f   :  { %v6583_v14 = vpop.eup %6582 }
 0xf10   :  { %v1436_v15 = vadd.f32 1.0, %v6583_v14 }
 0xf12   :  { %v1437_v16 = vmul.f32 %v1436_v15, %v1436_v15 }
 0xf14   :  { %v1440_v17 = vadd.f32 1.0, %v1437_v16  ;;  %v5281_v18 = vadd.f32 -1.0, %v1437_v16 }
 0xf16   :  { %6584 = vrcp.f32 %v1440_v17  ;;  %v1439_v19 = vmul.f32 %v5281_v18, %v1430_v9 }
 0xf20   :  { %v6585_v20 = vpop.eup %6584 }
 0xf21   :  { %v1442_v21 = vmul.f32 %v6585_v20, %v1439_v19 }
 0xf23   :  { %5817 = vmatmul.mubr.msk.f32.vlgmr.msra.gmra.mrb[16].mxu0 %vm146_vm2, %v1442_v21 }
 0xf24   :  { %6328 = vmatpush3.bf16.msra.mxu0 %v6788_v3  ;;  %5834 = vmatprep.mubr.msk.f32.mxu0 %vm6731_vm0, %v6732_v4 }
 0xf25   :  { %6335 = vmatprep.subr.bf16.mxu0 %v6730_v2 }
 0xff6   :  { %v1512_v22 = vpop.f32.mrb[16].mxu0 }
 0xff7   :  { %v1513_v23 = vadd.f32 %v6857_v32, %v1512_v22  ;;  %v5818_v24 = vpop.f32.mrb[17].mxu0 }
 0xff9   :  { %v1516_v25 = vmin.f32 %v1513_v23, 30.0 }
 0xffb   :  { %v1517_v26 = vmul.f32 1.442695, %v1516_v25 }
 0xffd   :  { %6586 = vpow2.f32 %v1517_v26 }
0x1007   :  { %v6587_v27 = vpop.eup %6586 }
0x1008   :  { %v1519_v29 = vadd.f32 1.0, %v6587_v27 }
0x100a   :  { %v1520_v30 = vmul.f32 %v1519_v29, %v1519_v29 }
0x100c   :  { %v1523_v33 = vadd.f32 1.0, %v1520_v30  ;;  %v5283_v34 = vadd.f32 -1.0, %v1520_v30 }
0x100e   :  { %6588 = vrcp.f32 %v1523_v33  ;;  %v1522_v35 = vmul.f32 %v5283_v34, %v1513_v23 }
0x1018   :  { %v6589_v36 = vpop.eup %6588 }
0x1019   :  { %v1525_v37 = vmul.f32 %v6589_v36, %v1522_v35  ;;  %v5293_v35 = vld [vmem:[%s7451_s1 + $0x68] sm:$0xff] }
0x101b   :  { %5828 = vmatmul.mubr.msk.f32.vlgmr.msra.gmra.mrb[16].mxu1 %vm146_vm2, %v1525_v37 }
0x101c   :  { %6331 = vmatpush3.bf16.msra.mxu1 %v6812_v8  ;;  %5845 = vmatprep.mubr.msk.f32.mxu1 %vm6731_vm0, %v6732_v4 }
0x101d   :  { %6332 = vmatprep.subr.bf16.mxu1 %v6730_v2 }
0x1020   :  { %6334 = vmatpush3.bf16.msra.mxu1 %v6822_v11 }
0x1021   :  { %6341 = vmatprep.subr.bf16.mxu1 %v6730_v2 }
0x10ee   :  { %v1595_v38 = vpop.f32.mrb[16].mxu1 }
0x10ef   :  { %v1596_v39 = vadd.f32 %v6870_v48, %v1595_v38  ;;  %v5829_v40 = vpop.f32.mrb[17].mxu1  ;;  %v5295_v38 = vld [vmem:[%s7452_s2 + $0xc] ss:$0 sm:$0xff] }
0x10f1   :  { %v1600_v42 = vmul.f32 0.34433144, %v1596_v39 }
0x10f3   :  { %v1601_v43 = vsub.f32 %v1599_v41, %v1600_v42 }
0x10f5   :  { %v1602_v44 = vmax.f32 %v1601_v43, %v6874_v55 }
0x10f7   :  { %v1603_v45 = vmin.f32 %v1602_v44, %v6876_v58 }
0x10f9   :  { %v1604_v46 = vmul.f32 0.13267405, %v1603_v45 }
0x10fb   :  { %v1606_v50 = vadd.f32 %v1605_v47, %v1604_v46 }
0x10fd   :  { %v1609_v51 = vadd.f32 %v5285_v49, %v1606_v50 }
0x10ff   :  { %5835 = vmatmul.mubr.msk.f32.vlgmr.msra.gmra.mrb[18].mxu0 %vm56_vm1, %v1609_v51  ;;  %v1857_v25 = vmul.f32 1.049786, %v1609_v51  ;;  %v1863_v34 = vmul.f32 0.8577853, %v1609_v51 }
0x1100   :  { %6337 = vmatpush3.bf16.msra.mxu0 %v6840_v28  ;;  %5856 = vmatprep.mubr.msk.f32.mxu0 %vm6731_vm0, %v6732_v4 }
0x1101   :  { %6338 = vmatprep.subr.bf16.mxu0 %v6730_v2 }
0x1104   :  { %6340 = vmatpush3.bf16.msra.mxu0 %v6850_v31 }
0x1105   :  { %6344 = vmatprep.subr.bf16.mxu0 %v6730_v2 }
0x11d2   :  { %v1687_v53 = vpop.f32.mrb[18].mxu0 }
0x11d3   :  { %v1688_v54 = vadd.f32 %v5287_v52, %v1687_v53  ;;  %v5836_v56 = vpop.f32.mrb[19].mxu0 }
0x11d5   :  { %v1691_v57 = vmin.f32 %v1688_v54, 30.0 }
0x11d7   :  { %v1692_v59 = vmul.f32 1.442695, %v1691_v57 }
0x11d9   :  { %6590 = vpow2.f32 %v1692_v59 }
0x11e3   :  { %v6591_v60 = vpop.eup %6590 }
0x11e4   :  { %v1694_v61 = vadd.f32 1.0, %v6591_v60 }
0x11e6   :  { %v1695_v62 = vmul.f32 %v1694_v61, %v1694_v61 }
0x11e8   :  { %v1698_v63 = vadd.f32 1.0, %v1695_v62  ;;  %v5289_v0 = vadd.f32 -1.0, %v1695_v62 }
0x11ea   :  { %6592 = vrcp.f32 %v1698_v63  ;;  %v1697_v1 = vmul.f32 %v5289_v0, %v1688_v54 }
0x11f4   :  { %v6593_v5 = vpop.eup %6592 }
0x11f5   :  { %v1700_v6 = vmul.f32 %v6593_v5, %v1697_v1 }
0x11f7   :  { %5846 = vmatmul.mubr.msk.f32.vlgmr.msra.gmra.mrb[18].mxu1 %vm146_vm2, %v1700_v6 }
0x11f8   :  { %6343 = vmatpush3.bf16.msra.mxu1 %v6788_v3  ;;  %5863 = vmatprep.mubr.msk.f32.mxu1 %vm6731_vm0, %v6732_v4 }
0x11f9   :  { %6350 = vmatprep.subr.bf16.mxu1 %v6730_v2 }
0x12ca   :  { %v1770_v7 = vpop.f32.mrb[18].mxu1 }
0x12cb   :  { %v1771_v9 = vadd.f32 %v6857_v32, %v1770_v7  ;;  %v5847_v10 = vpop.f32.mrb[19].mxu1 }
0x12cd   :  { %v1774_v12 = vmin.f32 %v1771_v9, 30.0 }
0x12cf   :  { %v1775_v13 = vmul.f32 1.442695, %v1774_v12 }
0x12d1   :  { %6594 = vpow2.f32 %v1775_v13 }
0x12db   :  { %v6595_v14 = vpop.eup %6594 }
0x12dc   :  { %v1777_v15 = vadd.f32 1.0, %v6595_v14 }
0x12de   :  { %v1778_v16 = vmul.f32 %v1777_v15, %v1777_v15 }
0x12e0   :  { %v1781_v17 = vadd.f32 1.0, %v1778_v16  ;;  %v5291_v18 = vadd.f32 -1.0, %v1778_v16 }
0x12e2   :  { %6596 = vrcp.f32 %v1781_v17  ;;  %v1780_v19 = vmul.f32 %v5291_v18, %v1771_v9 }
0x12ec   :  { %v6597_v20 = vpop.eup %6596 }
0x12ed   :  { %v1783_v21 = vmul.f32 %v6597_v20, %v1780_v19  ;;  %v5301_v19 = vld [vmem:[%s7451_s1 + $0x60] sm:$0xff] }
0x12ef   :  { %5857 = vmatmul.mubr.msk.f32.vlgmr.msra.gmra.mrb[20].mxu0 %vm146_vm2, %v1783_v21 }
0x12f0   :  { %6346 = vmatpush3.bf16.msra.mxu0 %v6812_v8  ;;  %5874 = vmatprep.mubr.msk.f32.mxu0 %vm6731_vm0, %v6732_v4 }
0x12f1   :  { %6347 = vmatprep.subr.bf16.mxu0 %v6730_v2 }
0x12f4   :  { %6349 = vmatpush3.bf16.msra.mxu0 %v6822_v11 }
0x12f5   :  { %6356 = vmatprep.subr.bf16.mxu0 %v6730_v2 }
0x13c2   :  { %v1853_v22 = vpop.f32.mrb[20].mxu0 }
0x13c3   :  { %v1854_v23 = vadd.f32 %v6870_v48, %v1853_v22  ;;  %v5858_v24 = vpop.f32.mrb[21].mxu0  ;;  %v5303_v22 = vld [vmem:[%s7452_s2 + $0xb] ss:$0 sm:$0xff] }
0x13c5   :  { %v1858_v26 = vmul.f32 0.3194536, %v1854_v23 }
0x13c7   :  { %v1859_v27 = vsub.f32 %v1857_v25, %v1858_v26 }
0x13c9   :  { %v1860_v29 = vmax.f32 %v1859_v27, %v6874_v55 }
0x13cb   :  { %v1861_v30 = vmin.f32 %v1860_v29, %v6876_v58 }
0x13cd   :  { %v1862_v33 = vmul.f32 0.14207084, %v1861_v30 }
0x13cf   :  { %v1864_v36 = vadd.f32 %v1863_v34, %v1862_v33 }
0x13d1   :  { %v1867_v37 = vadd.f32 %v5293_v35, %v1864_v36 }
0x13d3   :  { %5864 = vmatmul.mubr.msk.f32.vlgmr.msra.gmra.mrb[20].mxu1 %vm56_vm1, %v1867_v37  ;;  %v2115_v12 = vmul.f32 1.0425618, %v1867_v37  ;;  %v2121_v18 = vmul.f32 0.846991, %v1867_v37 }
0x13d4   :  { %6352 = vmatpush3.bf16.msra.mxu1 %v6840_v28  ;;  %5885 = vmatprep.mubr.msk.f32.mxu1 %vm6731_vm0, %v6732_v4 }
0x13d5   :  { %6353 = vmatprep.subr.bf16.mxu1 %v6730_v2 }
0x13d8   :  { %6355 = vmatpush3.bf16.msra.mxu1 %v6850_v31 }
0x13d9   :  { %6359 = vmatprep.subr.bf16.mxu1 %v6730_v2 }
0x14a6   :  { %v1945_v39 = vpop.f32.mrb[20].mxu1 }
0x14a7   :  { %v1946_v40 = vadd.f32 %v5295_v38, %v1945_v39  ;;  %v5865_v41 = vpop.f32.mrb[21].mxu1 }
0x14a9   :  { %v1949_v42 = vmin.f32 %v1946_v40, 30.0 }
0x14ab   :  { %v1950_v43 = vmul.f32 1.442695, %v1949_v42 }
0x14ad   :  { %6598 = vpow2.f32 %v1950_v43 }
0x14b7   :  { %v6599_v44 = vpop.eup %6598 }
0x14b8   :  { %v1952_v45 = vadd.f32 1.0, %v6599_v44 }
0x14ba   :  { %v1953_v46 = vmul.f32 %v1952_v45, %v1952_v45 }
0x14bc   :  { %v1956_v47 = vadd.f32 1.0, %v1953_v46  ;;  %v5297_v49 = vadd.f32 -1.0, %v1953_v46 }
0x14be   :  { %6600 = vrcp.f32 %v1956_v47  ;;  %v1955_v50 = vmul.f32 %v5297_v49, %v1946_v40 }
0x14c8   :  { %v6601_v51 = vpop.eup %6600 }
0x14c9   :  { %v1958_v52 = vmul.f32 %v6601_v51, %v1955_v50 }
0x14cb   :  { %5875 = vmatmul.mubr.msk.f32.vlgmr.msra.gmra.mrb[22].mxu0 %vm146_vm2, %v1958_v52 }
0x14cc   :  { %6358 = vmatpush3.bf16.msra.mxu0 %v6788_v3  ;;  %5892 = vmatprep.mubr.msk.f32.mxu0 %vm6731_vm0, %v6732_v4 }
0x14cd   :  { %6365 = vmatprep.subr.bf16.mxu0 %v6730_v2 }
0x159e   :  { %v2028_v53 = vpop.f32.mrb[22].mxu0 }
0x159f   :  { %v2029_v54 = vadd.f32 %v6857_v32, %v2028_v53  ;;  %v5876_v56 = vpop.f32.mrb[23].mxu0 }
0x15a1   :  { %v2032_v57 = vmin.f32 %v2029_v54, 30.0 }
0x15a3   :  { %v2033_v59 = vmul.f32 1.442695, %v2032_v57 }
0x15a5   :  { %6602 = vpow2.f32 %v2033_v59 }
0x15af   :  { %v6603_v60 = vpop.eup %6602 }
0x15b0   :  { %v2035_v61 = vadd.f32 1.0, %v6603_v60 }
0x15b2   :  { %v2036_v62 = vmul.f32 %v2035_v61, %v2035_v61 }
0x15b4   :  { %v2039_v63 = vadd.f32 1.0, %v2036_v62  ;;  %v5299_v0 = vadd.f32 -1.0, %v2036_v62 }
0x15b6   :  { %6604 = vrcp.f32 %v2039_v63  ;;  %v2038_v1 = vmul.f32 %v5299_v0, %v2029_v54  ;;  %v5309_v0 = vld [vmem:[%s7451_s1 + $0x58] sm:$0xff] }
0x15c0   :  { %v6605_v5 = vpop.eup %6604 }
0x15c1   :  { %v2041_v6 = vmul.f32 %v6605_v5, %v2038_v1 }
0x15c3   :  { %5886 = vmatmul.mubr.msk.f32.vlgmr.msra.gmra.mrb[22].mxu1 %vm146_vm2, %v2041_v6 }
0x15c4   :  { %6361 = vmatpush3.bf16.msra.mxu1 %v6812_v8  ;;  %5903 = vmatprep.mubr.msk.f32.mxu1 %vm6731_vm0, %v6732_v4 }
0x15c5   :  { %6362 = vmatprep.subr.bf16.mxu1 %v6730_v2 }
0x15c8   :  { %6364 = vmatpush3.bf16.msra.mxu1 %v6822_v11 }
0x15c9   :  { %6371 = vmatprep.subr.bf16.mxu1 %v6730_v2 }
0x1696   :  { %v2111_v7 = vpop.f32.mrb[22].mxu1 }
0x1697   :  { %v2112_v9 = vadd.f32 %v6870_v48, %v2111_v7  ;;  %v5887_v10 = vpop.f32.mrb[23].mxu1 }
0x1699   :  { %v2116_v13 = vmul.f32 0.2948476, %v2112_v9 }
0x169b   :  { %v2117_v14 = vsub.f32 %v2115_v12, %v2116_v13 }
0x169d   :  { %v2118_v15 = vmax.f32 %v2117_v14, %v6874_v55 }
0x169f   :  { %v2119_v16 = vmin.f32 %v2118_v15, %v6876_v58 }
0x16a1   :  { %v2120_v17 = vmul.f32 0.15289651, %v2119_v16 }
0x16a3   :  { %v2122_v20 = vadd.f32 %v2121_v18, %v2120_v17 }
0x16a5   :  { %v2125_v21 = vadd.f32 %v5301_v19, %v2122_v20 }
0x16a7   :  { %5893 = vmatmul.mubr.msk.f32.vlgmr.msra.gmra.mrb[24].mxu0 %vm56_vm1, %v2125_v21  ;;  %v2373_v56 = vmul.f32 1.035937, %v2125_v21  ;;  %v2379_v63 = vmul.f32 0.83440876, %v2125_v21 }
0x16a8   :  { %6367 = vmatpush3.bf16.msra.mxu0 %v6840_v28  ;;  %5914 = vmatprep.mubr.msk.f32.mxu0 %vm6731_vm0, %v6732_v4 }
0x16a9   :  { %6368 = vmatprep.subr.bf16.mxu0 %v6730_v2 }
0x16ac   :  { %6370 = vmatpush3.bf16.msra.mxu0 %v6850_v31 }
0x16ad   :  { %6374 = vmatprep.subr.bf16.mxu0 %v6730_v2 }
0x177a   :  { %v2203_v23 = vpop.f32.mrb[24].mxu0 }
0x177b   :  { %v2204_v24 = vadd.f32 %v5303_v22, %v2203_v23  ;;  %v5894_v25 = vpop.f32.mrb[25].mxu0  ;;  %v7134_v22 = vld [vmem:[%s7455_s5] ss:$0 sm:$0xff] }
0x177d   :  { %v2207_v26 = vmin.f32 %v2204_v24, 30.0 }
0x177f   :  { %v2208_v27 = vmul.f32 1.442695, %v2207_v26 }
0x1781   :  { %6606 = vpow2.f32 %v2208_v27 }
0x178b   :  { %v6607_v29 = vpop.eup %6606 }
0x178c   :  { %v2210_v30 = vadd.f32 1.0, %v6607_v29 }
0x178e   :  { %v2211_v33 = vmul.f32 %v2210_v30, %v2210_v30 }
0x1790   :  { %v2214_v34 = vadd.f32 1.0, %v2211_v33  ;;  %v5305_v35 = vadd.f32 -1.0, %v2211_v33 }
0x1792   :  { %6608 = vrcp.f32 %v2214_v34  ;;  %v2213_v36 = vmul.f32 %v5305_v35, %v2204_v24 }
0x179c   :  { %v6609_v37 = vpop.eup %6608 }
0x179d   :  { %v2216_v38 = vmul.f32 %v6609_v37, %v2213_v36 }
0x179f   :  { %5904 = vmatmul.mubr.msk.f32.vlgmr.msra.gmra.mrb[24].mxu1 %vm146_vm2, %v2216_v38 }
0x17a0   :  { %6373 = vmatpush3.bf16.msra.mxu1 %v6788_v3  ;;  %5921 = vmatprep.mubr.msk.f32.mxu1 %vm6731_vm0, %v6732_v4 }
0x17a1   :  { %6380 = vmatprep.subr.bf16.mxu1 %v6730_v2 }
0x1872   :  { %v2286_v39 = vpop.f32.mrb[24].mxu1 }
0x1873   :  { %v2287_v40 = vadd.f32 %v6857_v32, %v2286_v39  ;;  %v5905_v41 = vpop.f32.mrb[25].mxu1  ;;  %v7147_v39 = vld [vmem:[%s7457_s7] ss:$0 sm:$0xff] }
0x1875   :  { %v2290_v42 = vmin.f32 %v2287_v40, 30.0 }
0x1877   :  { %v2291_v43 = vmul.f32 1.442695, %v2290_v42 }
0x1879   :  { %6610 = vpow2.f32 %v2291_v43 }
0x1883   :  { %v6611_v44 = vpop.eup %6610 }
0x1884   :  { %v2293_v45 = vadd.f32 1.0, %v6611_v44 }
0x1886   :  { %v2294_v46 = vmul.f32 %v2293_v45, %v2293_v45 }
0x1888   :  { %v2297_v47 = vadd.f32 1.0, %v2294_v46  ;;  %v5307_v49 = vadd.f32 -1.0, %v2294_v46 }
0x188a   :  { %6612 = vrcp.f32 %v2297_v47  ;;  %v2296_v50 = vmul.f32 %v5307_v49, %v2287_v40 }
0x1894   :  { %v6613_v51 = vpop.eup %6612 }
0x1895   :  { %v2299_v52 = vmul.f32 %v6613_v51, %v2296_v50  ;;  %v5317_v50 = vld [vmem:[%s7451_s1 + $0x50] sm:$0xff] }
0x1897   :  { %5915 = vmatmul.mubr.msk.f32.vlgmr.msra.gmra.mrb[26].mxu0 %vm146_vm2, %v2299_v52 }
0x1898   :  { %6376 = vmatpush3.bf16.msra.mxu0 %v6812_v8  ;;  %5932 = vmatprep.mubr.msk.f32.mxu0 %vm6731_vm0, %v6732_v4 }
0x1899   :  { %6377 = vmatprep.subr.bf16.mxu0 %v6730_v2 }
0x189c   :  { %6379 = vmatpush3.bf16.msra.mxu0 %v6822_v11 }
0x189d   :  { %6386 = vmatprep.subr.bf16.mxu0 %v6730_v2 }
0x196a   :  { %v2369_v32 = vpop.f32.mrb[26].mxu0 }
0x196b   :  { %v2370_v53 = vadd.f32 %v6870_v48, %v2369_v32  ;;  %v5916_v54 = vpop.f32.mrb[27].mxu0  ;;  %v5311_v48 = vld [vmem:[%s7452_s2 + $0xa] ss:$0 sm:$0xff]  ;;  %v5319_v32 = vld [vmem:[%s7452_s2 + $0x9] ss:$0 sm:$0xff] }
0x196d   :  { %v2374_v57 = vmul.f32 0.27049097, %v2370_v53 }
0x196f   :  { %v2375_v59 = vsub.f32 %v2373_v56, %v2374_v57 }
0x1971   :  { %v2376_v60 = vmax.f32 %v2375_v59, %v6874_v55 }
0x1973   :  { %v2377_v61 = vmin.f32 %v2376_v60, %v6876_v58 }
0x1975   :  { %v2378_v62 = vmul.f32 0.16550516, %v2377_v61 }
0x1977   :  { %v2380_v1 = vadd.f32 %v2379_v63, %v2378_v62 }
0x1979   :  { %v2383_v5 = vadd.f32 %v5309_v0, %v2380_v1 }
0x197b   :  { %5922 = vmatmul.mubr.msk.f32.vlgmr.msra.gmra.mrb[26].mxu1 %vm56_vm1, %v2383_v5  ;;  %v2631_v42 = vmul.f32 1.0299001, %v2383_v5  ;;  %v2637_v49 = vmul.f32 0.81955785, %v2383_v5 }
0x197c   :  { %6382 = vmatpush3.bf16.msra.mxu1 %v6840_v28  ;;  %5943 = vmatprep.mubr.msk.f32.mxu1 %vm6731_vm0, %v6732_v4 }
0x197d   :  { %6383 = vmatprep.subr.bf16.mxu1 %v6730_v2 }
0x1980   :  { %6385 = vmatpush3.bf16.msra.mxu1 %v6850_v31 }
0x1981   :  { %6389 = vmatprep.subr.bf16.mxu1 %v6730_v2 }
0x1a4e   :  { %v2461_v6 = vpop.f32.mrb[26].mxu1 }
0x1a4f   :  { %v2462_v7 = vadd.f32 %v5311_v48, %v2461_v6  ;;  %v5923_v9 = vpop.f32.mrb[27].mxu1 }
0x1a51   :  { %v2465_v10 = vmin.f32 %v2462_v7, 30.0 }
0x1a53   :  { %v2466_v12 = vmul.f32 1.442695, %v2465_v10 }
0x1a55   :  { %6614 = vpow2.f32 %v2466_v12 }
0x1a5f   :  { %v6615_v13 = vpop.eup %6614 }
0x1a60   :  { %v2468_v14 = vadd.f32 1.0, %v6615_v13 }
0x1a62   :  { %v2469_v15 = vmul.f32 %v2468_v14, %v2468_v14 }
0x1a64   :  { %v2472_v16 = vadd.f32 1.0, %v2469_v15  ;;  %v5313_v17 = vadd.f32 -1.0, %v2469_v15 }
0x1a66   :  { %6616 = vrcp.f32 %v2472_v16  ;;  %v2471_v18 = vmul.f32 %v5313_v17, %v2462_v7 }
0x1a70   :  { %v6617_v19 = vpop.eup %6616 }
0x1a71   :  { %v2474_v20 = vmul.f32 %v6617_v19, %v2471_v18 }
0x1a73   :  { %5933 = vmatmul.mubr.msk.f32.vlgmr.msra.gmra.mrb[28].mxu0 %vm146_vm2, %v2474_v20 }
0x1a74   :  { %6388 = vmatpush3.bf16.msra.mxu0 %v6788_v3  ;;  %5950 = vmatprep.mubr.msk.f32.mxu0 %vm6731_vm0, %v6732_v4 }
0x1a75   :  { %6395 = vmatprep.subr.bf16.mxu0 %v6730_v2 }
0x1b46   :  { %v2544_v21 = vpop.f32.mrb[28].mxu0 }
0x1b47   :  { %v2545_v23 = vadd.f32 %v7134_v22, %v2544_v21  ;;  %v5934_v24 = vpop.f32.mrb[29].mxu0 }
0x1b49   :  { %v2548_v25 = vmin.f32 %v2545_v23, 30.0 }
0x1b4b   :  { %v2549_v26 = vmul.f32 1.442695, %v2548_v25 }
0x1b4d   :  { %6618 = vpow2.f32 %v2549_v26 }
0x1b57   :  { %v6619_v27 = vpop.eup %6618 }
0x1b58   :  { %v2551_v29 = vadd.f32 1.0, %v6619_v27 }
0x1b5a   :  { %v2552_v30 = vmul.f32 %v2551_v29, %v2551_v29 }
0x1b5c   :  { %v2555_v33 = vadd.f32 1.0, %v2552_v30  ;;  %v5315_v34 = vadd.f32 -1.0, %v2552_v30 }
0x1b5e   :  { %6620 = vrcp.f32 %v2555_v33  ;;  %v2554_v35 = vmul.f32 %v5315_v34, %v2545_v23 }
0x1b68   :  { %v6621_v36 = vpop.eup %6620 }
0x1b69   :  { %v2557_v37 = vmul.f32 %v6621_v36, %v2554_v35  ;;  %v5325_v35 = vld [vmem:[%s7451_s1 + $0x48] sm:$0xff] }
0x1b6b   :  { %5944 = vmatmul.mubr.msk.f32.vlgmr.msra.gmra.mrb[28].mxu1 %vm146_vm2, %v2557_v37 }
0x1b6c   :  { %6391 = vmatpush3.bf16.msra.mxu1 %v6812_v8  ;;  %5961 = vmatprep.mubr.msk.f32.mxu1 %vm6731_vm0, %v6732_v4 }
0x1b6d   :  { %6392 = vmatprep.subr.bf16.mxu1 %v6730_v2 }
0x1b70   :  { %6394 = vmatpush3.bf16.msra.mxu1 %v6822_v11 }
0x1b71   :  { %6401 = vmatprep.subr.bf16.mxu1 %v6730_v2 }
0x1c3e   :  { %v2627_v38 = vpop.f32.mrb[28].mxu1 }
0x1c3f   :  { %v2628_v40 = vadd.f32 %v7147_v39, %v2627_v38  ;;  %v5945_v41 = vpop.f32.mrb[29].mxu1  ;;  %v5327_v38 = vld [vmem:[%s7452_s2 + $0x8] ss:$0 sm:$0xff] }
0x1c41   :  { %v2632_v43 = vmul.f32 0.24636163, %v2628_v40 }
0x1c43   :  { %v2633_v44 = vsub.f32 %v2631_v42, %v2632_v43 }
0x1c45   :  { %v2634_v45 = vmax.f32 %v2633_v44, %v6874_v55 }
0x1c47   :  { %v2635_v46 = vmin.f32 %v2634_v45, %v6876_v58 }
0x1c49   :  { %v2636_v47 = vmul.f32 0.180378, %v2635_v46 }
0x1c4b   :  { %v2638_v51 = vadd.f32 %v2637_v49, %v2636_v47 }
0x1c4d   :  { %v2641_v52 = vadd.f32 %v5317_v50, %v2638_v51 }
0x1c4f   :  { %5951 = vmatmul.mubr.msk.f32.vlgmr.msra.gmra.mrb[30].mxu0 %vm56_vm1, %v2641_v52  ;;  %v2889_v25 = vmul.f32 1.0244406, %v2641_v52  ;;  %v2895_v34 = vmul.f32 0.8017677, %v2641_v52 }
0x1c50   :  { %6397 = vmatpush3.bf16.msra.mxu0 %v6840_v28  ;;  %5972 = vmatprep.mubr.msk.f32.mxu0 %vm6731_vm0, %v6732_v4 }
0x1c51   :  { %6398 = vmatprep.subr.bf16.mxu0 %v6730_v2 }
0x1c54   :  { %6400 = vmatpush3.bf16.msra.mxu0 %v6850_v31 }
0x1c55   :  { %6404 = vmatprep.subr.bf16.mxu0 %v6730_v2 }
0x1d22   :  { %v2719_v53 = vpop.f32.mrb[30].mxu0 }
0x1d23   :  { %v2720_v54 = vadd.f32 %v5319_v32, %v2719_v53  ;;  %v5952_v56 = vpop.f32.mrb[31].mxu0 }
0x1d25   :  { %v2723_v57 = vmin.f32 %v2720_v54, 30.0 }
0x1d27   :  { %v2724_v59 = vmul.f32 1.442695, %v2723_v57 }
0x1d29   :  { %6622 = vpow2.f32 %v2724_v59 }
0x1d33   :  { %v6623_v60 = vpop.eup %6622 }
0x1d34   :  { %v2726_v61 = vadd.f32 1.0, %v6623_v60 }
0x1d36   :  { %v2727_v62 = vmul.f32 %v2726_v61, %v2726_v61 }
0x1d38   :  { %v2730_v63 = vadd.f32 1.0, %v2727_v62  ;;  %v5321_v0 = vadd.f32 -1.0, %v2727_v62 }
0x1d3a   :  { %6624 = vrcp.f32 %v2730_v63  ;;  %v2729_v1 = vmul.f32 %v5321_v0, %v2720_v54 }
0x1d44   :  { %v6625_v5 = vpop.eup %6624 }
0x1d45   :  { %v2732_v48 = vmul.f32 %v6625_v5, %v2729_v1 }
0x1d47   :  { %5962 = vmatmul.mubr.msk.f32.vlgmr.msra.gmra.mrb[30].mxu1 %vm146_vm2, %v2732_v48 }
0x1d48   :  { %6403 = vmatpush3.bf16.msra.mxu1 %v6788_v3  ;;  %5979 = vmatprep.mubr.msk.f32.mxu1 %vm6731_vm0, %v6732_v4 }
0x1d49   :  { %6410 = vmatprep.subr.bf16.mxu1 %v6730_v2 }
0x1e1a   :  { %v2802_v6 = vpop.f32.mrb[30].mxu1 }
0x1e1b   :  { %v2803_v7 = vadd.f32 %v7134_v22, %v2802_v6  ;;  %v5963_v9 = vpop.f32.mrb[31].mxu1 }
0x1e1d   :  { %v2806_v10 = vmin.f32 %v2803_v7, 30.0 }
0x1e1f   :  { %v2807_v12 = vmul.f32 1.442695, %v2806_v10 }
0x1e21   :  { %6626 = vpow2.f32 %v2807_v12 }
0x1e2b   :  { %v6627_v13 = vpop.eup %6626 }
0x1e2c   :  { %v2809_v14 = vadd.f32 1.0, %v6627_v13 }
0x1e2e   :  { %v2810_v15 = vmul.f32 %v2809_v14, %v2809_v14 }
0x1e30   :  { %v2813_v16 = vadd.f32 1.0, %v2810_v15  ;;  %v5323_v17 = vadd.f32 -1.0, %v2810_v15 }
0x1e32   :  { %6628 = vrcp.f32 %v2813_v16  ;;  %v2812_v18 = vmul.f32 %v5323_v17, %v2803_v7 }
0x1e3c   :  { %v6629_v19 = vpop.eup %6628 }
0x1e3d   :  { %v2815_v20 = vmul.f32 %v6629_v19, %v2812_v18  ;;  %v5333_v18 = vld [vmem:[%s7451_s1 + $0x40] sm:$0xff] }
0x1e3f   :  { %5973 = vmatmul.mubr.msk.f32.vlgmr.msra.gmra.mrb[32].mxu0 %vm146_vm2, %v2815_v20 }
0x1e40   :  { %6406 = vmatpush3.bf16.msra.mxu0 %v6812_v8  ;;  %5990 = vmatprep.mubr.msk.f32.mxu0 %vm6731_vm0, %v6732_v4 }
0x1e41   :  { %6407 = vmatprep.subr.bf16.mxu0 %v6730_v2 }
0x1e44   :  { %6409 = vmatpush3.bf16.msra.mxu0 %v6822_v11 }
0x1e45   :  { %6416 = vmatprep.subr.bf16.mxu0 %v6730_v2 }
0x1f12   :  { %v2885_v21 = vpop.f32.mrb[32].mxu0 }
0x1f13   :  { %v2886_v23 = vadd.f32 %v7147_v39, %v2885_v21  ;;  %v5974_v24 = vpop.f32.mrb[33].mxu0  ;;  %v5335_v21 = vld [vmem:[%s7452_s2 + $0x7] ss:$0 sm:$0xff] }
0x1f15   :  { %v2890_v26 = vmul.f32 0.22243787, %v2886_v23 }
0x1f17   :  { %v2891_v27 = vsub.f32 %v2889_v25, %v2890_v26 }
0x1f19   :  { %v2892_v29 = vmax.f32 %v2891_v27, %v6874_v55 }
0x1f1b   :  { %v2893_v30 = vmin.f32 %v2892_v29, %v6876_v58 }
0x1f1d   :  { %v2894_v33 = vmul.f32 0.19818595, %v2893_v30 }
0x1f1f   :  { %v2896_v36 = vadd.f32 %v2895_v34, %v2894_v33 }
0x1f21   :  { %v2899_v37 = vadd.f32 %v5325_v35, %v2896_v36 }
0x1f23   :  { %5980 = vmatmul.mubr.msk.f32.vlgmr.msra.gmra.mrb[32].mxu1 %vm56_vm1, %v2899_v37  ;;  %v3147_v10 = vmul.f32 1.0195494, %v2899_v37  ;;  %v3153_v17 = vmul.f32 0.78007466, %v2899_v37 }
0x1f24   :  { %6412 = vmatpush3.bf16.msra.mxu1 %v6840_v28  ;;  %6001 = vmatprep.mubr.msk.f32.mxu1 %vm6731_vm0, %v6732_v4 }
0x1f25   :  { %6413 = vmatprep.subr.bf16.mxu1 %v6730_v2 }
0x1f28   :  { %6415 = vmatpush3.bf16.msra.mxu1 %v6850_v31 }
0x1f29   :  { %6419 = vmatprep.subr.bf16.mxu1 %v6730_v2 }
0x1ff6   :  { %v2977_v40 = vpop.f32.mrb[32].mxu1 }
0x1ff7   :  { %v2978_v41 = vadd.f32 %v5327_v38, %v2977_v40  ;;  %v5981_v42 = vpop.f32.mrb[33].mxu1 }
0x1ff9   :  { %v2981_v43 = vmin.f32 %v2978_v41, 30.0 }
0x1ffb   :  { %v2982_v44 = vmul.f32 1.442695, %v2981_v43 }
0x1ffd   :  { %6630 = vpow2.f32 %v2982_v44 }
0x2007   :  { %v6631_v45 = vpop.eup %6630 }
0x2008   :  { %v2984_v46 = vadd.f32 1.0, %v6631_v45 }
0x200a   :  { %v2985_v47 = vmul.f32 %v2984_v46, %v2984_v46 }
0x200c   :  { %v2988_v49 = vadd.f32 1.0, %v2985_v47  ;;  %v5329_v50 = vadd.f32 -1.0, %v2985_v47 }
0x200e   :  { %6632 = vrcp.f32 %v2988_v49  ;;  %v2987_v51 = vmul.f32 %v5329_v50, %v2978_v41 }
0x2018   :  { %v6633_v52 = vpop.eup %6632 }
0x2019   :  { %v2990_v32 = vmul.f32 %v6633_v52, %v2987_v51 }
0x201b   :  { %5991 = vmatmul.mubr.msk.f32.vlgmr.msra.gmra.mrb[34].mxu0 %vm146_vm2, %v2990_v32 }
0x201c   :  { %6418 = vmatpush3.bf16.msra.mxu0 %v6788_v3  ;;  %6008 = vmatprep.mubr.msk.f32.mxu0 %vm6731_vm0, %v6732_v4 }
0x201d   :  { %6425 = vmatprep.subr.bf16.mxu0 %v6730_v2 }
0x20ee   :  { %v3060_v53 = vpop.f32.mrb[34].mxu0 }
0x20ef   :  { %v3061_v54 = vadd.f32 %v7134_v22, %v3060_v53  ;;  %v5992_v56 = vpop.f32.mrb[35].mxu0 }
0x20f1   :  { %v3064_v57 = vmin.f32 %v3061_v54, 30.0 }
0x20f3   :  { %v3065_v59 = vmul.f32 1.442695, %v3064_v57 }
0x20f5   :  { %6634 = vpow2.f32 %v3065_v59 }
0x20ff   :  { %v6635_v60 = vpop.eup %6634 }
0x2100   :  { %v3067_v61 = vadd.f32 1.0, %v6635_v60 }
0x2102   :  { %v3068_v62 = vmul.f32 %v3067_v61, %v3067_v61 }
0x2104   :  { %v3071_v63 = vadd.f32 1.0, %v3068_v62  ;;  %v5331_v0 = vadd.f32 -1.0, %v3068_v62 }
0x2106   :  { %6636 = vrcp.f32 %v3071_v63  ;;  %v3070_v1 = vmul.f32 %v5331_v0, %v3061_v54 }
0x2110   :  { %v6637_v5 = vpop.eup %6636 }
0x2111   :  { %v3073_v48 = vmul.f32 %v6637_v5, %v3070_v1  ;;  %v5341_v1 = vld [vmem:[%s7451_s1 + $0x38] sm:$0xff] }
0x2113   :  { %6002 = vmatmul.mubr.msk.f32.vlgmr.msra.gmra.mrb[34].mxu1 %vm146_vm2, %v3073_v48 }
0x2114   :  { %6421 = vmatpush3.bf16.msra.mxu1 %v6812_v8  ;;  %6019 = vmatprep.mubr.msk.f32.mxu1 %vm6731_vm0, %v6732_v4 }
0x2115   :  { %6422 = vmatprep.subr.bf16.mxu1 %v6730_v2 }
0x2118   :  { %6424 = vmatpush3.bf16.msra.mxu1 %v6822_v11 }
0x2119   :  { %6431 = vmatprep.subr.bf16.mxu1 %v6730_v2 }
0x21e6   :  { %v3143_v6 = vpop.f32.mrb[34].mxu1 }
0x21e7   :  { %v3144_v7 = vadd.f32 %v7147_v39, %v3143_v6  ;;  %v6003_v9 = vpop.f32.mrb[35].mxu1  ;;  %v5343_v6 = vld [vmem:[%s7452_s2 + $0x6] ss:$0 sm:$0xff] }
0x21e9   :  { %v3148_v12 = vmul.f32 0.19869812, %v3144_v7 }
0x21eb   :  { %v3149_v13 = vsub.f32 %v3147_v10, %v3148_v12 }
0x21ed   :  { %v3150_v14 = vmax.f32 %v3149_v13, %v6874_v55 }
0x21ef   :  { %v3151_v15 = vmin.f32 %v3150_v14, %v6876_v58 }
0x21f1   :  { %v3152_v16 = vmul.f32 0.21989317, %v3151_v15 }
0x21f3   :  { %v3154_v19 = vadd.f32 %v3153_v17, %v3152_v16 }
0x21f5   :  { %v3157_v20 = vadd.f32 %v5333_v18, %v3154_v19 }
0x21f7   :  { %6009 = vmatmul.mubr.msk.f32.vlgmr.msra.gmra.mrb[36].mxu0 %vm56_vm1, %v3157_v20  ;;  %v3405_v57 = vmul.f32 1.0152178, %v3157_v20  ;;  %v3411_v0 = vmul.f32 0.75304216, %v3157_v20 }
0x21f8   :  { %6427 = vmatpush3.bf16.msra.mxu0 %v6840_v28  ;;  %6030 = vmatprep.mubr.msk.f32.mxu0 %vm6731_vm0, %v6732_v4 }
0x21f9   :  { %6428 = vmatprep.subr.bf16.mxu0 %v6730_v2 }
0x21fc   :  { %6430 = vmatpush3.bf16.msra.mxu0 %v6850_v31 }
0x21fd   :  { %6434 = vmatprep.subr.bf16.mxu0 %v6730_v2 }
0x22ca   :  { %v3235_v23 = vpop.f32.mrb[36].mxu0 }
0x22cb   :  { %v3236_v24 = vadd.f32 %v5335_v21, %v3235_v23  ;;  %v6010_v25 = vpop.f32.mrb[37].mxu0 }
0x22cd   :  { %v3239_v26 = vmin.f32 %v3236_v24, 30.0 }
0x22cf   :  { %v3240_v27 = vmul.f32 1.442695, %v3239_v26 }
0x22d1   :  { %6638 = vpow2.f32 %v3240_v27 }
0x22db   :  { %v6639_v29 = vpop.eup %6638 }
0x22dc   :  { %v3242_v30 = vadd.f32 1.0, %v6639_v29 }
0x22de   :  { %v3243_v33 = vmul.f32 %v3242_v30, %v3242_v30 }
0x22e0   :  { %v3246_v34 = vadd.f32 1.0, %v3243_v33  ;;  %v5337_v35 = vadd.f32 -1.0, %v3243_v33 }
0x22e2   :  { %6640 = vrcp.f32 %v3246_v34  ;;  %v3245_v36 = vmul.f32 %v5337_v35, %v3236_v24 }
0x22ec   :  { %v6641_v37 = vpop.eup %6640 }
0x22ed   :  { %v3248_v38 = vmul.f32 %v6641_v37, %v3245_v36 }
0x22ef   :  { %6020 = vmatmul.mubr.msk.f32.vlgmr.msra.gmra.mrb[36].mxu1 %vm146_vm2, %v3248_v38 }
0x22f0   :  { %6433 = vmatpush3.bf16.msra.mxu1 %v6788_v3  ;;  %6037 = vmatprep.mubr.msk.f32.mxu1 %vm6731_vm0, %v6732_v4 }
0x22f1   :  { %6440 = vmatprep.subr.bf16.mxu1 %v6730_v2 }
0x23c2   :  { %v3318_v40 = vpop.f32.mrb[36].mxu1 }
0x23c3   :  { %v3319_v41 = vadd.f32 %v7134_v22, %v3318_v40  ;;  %v6021_v42 = vpop.f32.mrb[37].mxu1 }
0x23c5   :  { %v3322_v43 = vmin.f32 %v3319_v41, 30.0 }
0x23c7   :  { %v3323_v44 = vmul.f32 1.442695, %v3322_v43 }
0x23c9   :  { %6642 = vpow2.f32 %v3323_v44 }
0x23d3   :  { %v6643_v45 = vpop.eup %6642 }
0x23d4   :  { %v3325_v46 = vadd.f32 1.0, %v6643_v45 }
0x23d6   :  { %v3326_v47 = vmul.f32 %v3325_v46, %v3325_v46 }
0x23d8   :  { %v3329_v49 = vadd.f32 1.0, %v3326_v47  ;;  %v5339_v50 = vadd.f32 -1.0, %v3326_v47 }
0x23da   :  { %6644 = vrcp.f32 %v3329_v49  ;;  %v3328_v51 = vmul.f32 %v5339_v50, %v3319_v41 }
0x23e4   :  { %v6645_v52 = vpop.eup %6644 }
0x23e5   :  { %v3331_v32 = vmul.f32 %v6645_v52, %v3328_v51  ;;  %v5349_v51 = vld [vmem:[%s7451_s1 + $0x30] sm:$0xff] }
0x23e7   :  { %6031 = vmatmul.mubr.msk.f32.vlgmr.msra.gmra.mrb[38].mxu0 %vm146_vm2, %v3331_v32 }
0x23e8   :  { %6436 = vmatpush3.bf16.msra.mxu0 %v6812_v8  ;;  %6048 = vmatprep.mubr.msk.f32.mxu0 %vm6731_vm0, %v6732_v4 }
0x23e9   :  { %6437 = vmatprep.subr.bf16.mxu0 %v6730_v2 }
0x23ec   :  { %6439 = vmatpush3.bf16.msra.mxu0 %v6822_v11 }
0x23ed   :  { %6446 = vmatprep.subr.bf16.mxu0 %v6730_v2 }
0x24ba   :  { %v3401_v53 = vpop.f32.mrb[38].mxu0 }
0x24bb   :  { %v3402_v54 = vadd.f32 %v7147_v39, %v3401_v53  ;;  %v6032_v56 = vpop.f32.mrb[39].mxu0  ;;  %v5351_v53 = vld [vmem:[%s7452_s2 + $0x5] ss:$0 sm:$0xff] }
0x24bd   :  { %v3406_v59 = vmul.f32 0.17512064, %v3402_v54 }
0x24bf   :  { %v3407_v60 = vsub.f32 %v3405_v57, %v3406_v59 }
0x24c1   :  { %v3408_v61 = vmax.f32 %v3407_v60, %v6874_v55 }
0x24c3   :  { %v3409_v62 = vmin.f32 %v3408_v61, %v6876_v58 }
0x24c5   :  { %v3410_v63 = vmul.f32 0.2469366, %v3409_v62 }
0x24c7   :  { %v3412_v5 = vadd.f32 %v3411_v0, %v3410_v63 }
0x24c9   :  { %v3415_v48 = vadd.f32 %v5341_v1, %v3412_v5 }
0x24cb   :  { %6038 = vmatmul.mubr.msk.f32.vlgmr.msra.gmra.mrb[38].mxu1 %vm56_vm1, %v3415_v48  ;;  %v3663_v43 = vmul.f32 1.0114385, %v3415_v48  ;;  %v3669_v50 = vmul.f32 0.7184319, %v3415_v48 }
0x24cc   :  { %6442 = vmatpush3.bf16.msra.mxu1 %v6840_v28  ;;  %6059 = vmatprep.mubr.msk.f32.mxu1 %vm6731_vm0, %v6732_v4 }
0x24cd   :  { %6443 = vmatprep.subr.bf16.mxu1 %v6730_v2 }
0x24d0   :  { %6445 = vmatpush3.bf16.msra.mxu1 %v6850_v31 }
0x24d1   :  { %6449 = vmatprep.subr.bf16.mxu1 %v6730_v2 }
0x259e   :  { %v3493_v7 = vpop.f32.mrb[38].mxu1 }
0x259f   :  { %v3494_v9 = vadd.f32 %v5343_v6, %v3493_v7  ;;  %v6039_v10 = vpop.f32.mrb[39].mxu1 }
0x25a1   :  { %v3497_v12 = vmin.f32 %v3494_v9, 30.0 }
0x25a3   :  { %v3498_v13 = vmul.f32 1.442695, %v3497_v12 }
0x25a5   :  { %6646 = vpow2.f32 %v3498_v13 }
0x25af   :  { %v6647_v14 = vpop.eup %6646 }
0x25b0   :  { %v3500_v15 = vadd.f32 1.0, %v6647_v14 }
0x25b2   :  { %v3501_v16 = vmul.f32 %v3500_v15, %v3500_v15 }
0x25b4   :  { %v3504_v17 = vadd.f32 1.0, %v3501_v16  ;;  %v5345_v18 = vadd.f32 -1.0, %v3501_v16 }
0x25b6   :  { %6648 = vrcp.f32 %v3504_v17  ;;  %v3503_v19 = vmul.f32 %v5345_v18, %v3494_v9 }
0x25c0   :  { %v6649_v20 = vpop.eup %6648 }
0x25c1   :  { %v3506_v21 = vmul.f32 %v6649_v20, %v3503_v19 }
0x25c3   :  { %6049 = vmatmul.mubr.msk.f32.vlgmr.msra.gmra.mrb[40].mxu0 %vm146_vm2, %v3506_v21 }
0x25c4   :  { %6448 = vmatpush3.bf16.msra.mxu0 %v6788_v3  ;;  %6066 = vmatprep.mubr.msk.f32.mxu0 %vm6731_vm0, %v6732_v4 }
0x25c5   :  { %6455 = vmatprep.subr.bf16.mxu0 %v6730_v2 }
0x2696   :  { %v3576_v23 = vpop.f32.mrb[40].mxu0 }
0x2697   :  { %v3577_v24 = vadd.f32 %v7134_v22, %v3576_v23  ;;  %v6050_v25 = vpop.f32.mrb[41].mxu0 }
0x2699   :  { %v3580_v26 = vmin.f32 %v3577_v24, 30.0 }
0x269b   :  { %v3581_v27 = vmul.f32 1.442695, %v3580_v26 }
0x269d   :  { %6650 = vpow2.f32 %v3581_v27 }
0x26a7   :  { %v6651_v29 = vpop.eup %6650 }
0x26a8   :  { %v3583_v30 = vadd.f32 1.0, %v6651_v29 }
0x26aa   :  { %v3584_v33 = vmul.f32 %v3583_v30, %v3583_v30 }
0x26ac   :  { %v3587_v34 = vadd.f32 1.0, %v3584_v33  ;;  %v5347_v35 = vadd.f32 -1.0, %v3584_v33 }
0x26ae   :  { %6652 = vrcp.f32 %v3587_v34  ;;  %v3586_v36 = vmul.f32 %v5347_v35, %v3577_v24 }
0x26b8   :  { %v6653_v37 = vpop.eup %6652 }
0x26b9   :  { %v3589_v38 = vmul.f32 %v6653_v37, %v3586_v36  ;;  %v5357_v36 = vld [vmem:[%s7451_s1 + $0x28] sm:$0xff] }
0x26bb   :  { %6060 = vmatmul.mubr.msk.f32.vlgmr.msra.gmra.mrb[40].mxu1 %vm146_vm2, %v3589_v38 }
0x26bc   :  { %6451 = vmatpush3.bf16.msra.mxu1 %v6812_v8  ;;  %6077 = vmatprep.mubr.msk.f32.mxu1 %vm6731_vm0, %v6732_v4 }
0x26bd   :  { %6452 = vmatprep.subr.bf16.mxu1 %v6730_v2 }
0x26c0   :  { %6454 = vmatpush3.bf16.msra.mxu1 %v6822_v11 }
0x26c1   :  { %6461 = vmatprep.subr.bf16.mxu1 %v6730_v2 }
0x278e   :  { %v3659_v40 = vpop.f32.mrb[40].mxu1 }
0x278f   :  { %v3660_v41 = vadd.f32 %v7147_v39, %v3659_v40  ;;  %v6061_v42 = vpop.f32.mrb[41].mxu1  ;;  %v5359_v40 = vld [vmem:[%s7452_s2 + $0x4] ss:$0 sm:$0xff] }
0x2791   :  { %v3664_v44 = vmul.f32 0.15168306, %v3660_v41 }
0x2793   :  { %v3665_v45 = vsub.f32 %v3663_v43, %v3664_v44 }
0x2795   :  { %v3666_v46 = vmax.f32 %v3665_v45, %v6874_v55 }
0x2797   :  { %v3667_v47 = vmin.f32 %v3666_v46, %v6876_v58 }
0x2799   :  { %v3668_v49 = vmul.f32 0.281555, %v3667_v47 }
0x279b   :  { %v3670_v52 = vadd.f32 %v3669_v50, %v3668_v49 }
0x279d   :  { %v3673_v32 = vadd.f32 %v5349_v51, %v3670_v52 }
0x279f   :  { %6067 = vmatmul.mubr.msk.f32.vlgmr.msra.gmra.mrb[42].mxu0 %vm56_vm1, %v3673_v32  ;;  %v3921_v26 = vmul.f32 1.0082047, %v3673_v32  ;;  %v3927_v35 = vmul.f32 0.67255694, %v3673_v32 }
0x27a0   :  { %6457 = vmatpush3.bf16.msra.mxu0 %v6840_v28  ;;  %6088 = vmatprep.mubr.msk.f32.mxu0 %vm6731_vm0, %v6732_v4 }
0x27a1   :  { %6458 = vmatprep.subr.bf16.mxu0 %v6730_v2 }
0x27a4   :  { %6460 = vmatpush3.bf16.msra.mxu0 %v6850_v31 }
0x27a5   :  { %6464 = vmatprep.subr.bf16.mxu0 %v6730_v2 }
0x2872   :  { %v3751_v54 = vpop.f32.mrb[42].mxu0 }
0x2873   :  { %v3752_v56 = vadd.f32 %v5351_v53, %v3751_v54  ;;  %v6068_v57 = vpop.f32.mrb[43].mxu0 }
0x2875   :  { %v3755_v59 = vmin.f32 %v3752_v56, 30.0 }
0x2877   :  { %v3756_v60 = vmul.f32 1.442695, %v3755_v59 }
0x2879   :  { %6654 = vpow2.f32 %v3756_v60 }
0x2883   :  { %v6655_v61 = vpop.eup %6654 }
0x2884   :  { %v3758_v62 = vadd.f32 1.0, %v6655_v61 }
0x2886   :  { %v3759_v63 = vmul.f32 %v3758_v62, %v3758_v62 }
0x2888   :  { %v3762_v0 = vadd.f32 1.0, %v3759_v63  ;;  %v5353_v1 = vadd.f32 -1.0, %v3759_v63 }
0x288a   :  { %6656 = vrcp.f32 %v3762_v0  ;;  %v3761_v5 = vmul.f32 %v5353_v1, %v3752_v56 }
0x2894   :  { %v6657_v48 = vpop.eup %6656 }
0x2895   :  { %v3764_v6 = vmul.f32 %v6657_v48, %v3761_v5 }
0x2897   :  { %6078 = vmatmul.mubr.msk.f32.vlgmr.msra.gmra.mrb[42].mxu1 %vm146_vm2, %v3764_v6 }
0x2898   :  { %6463 = vmatpush3.bf16.msra.mxu1 %v6788_v3  ;;  %6095 = vmatprep.mubr.msk.f32.mxu1 %vm6731_vm0, %v6732_v4 }
0x2899   :  { %6470 = vmatprep.subr.bf16.mxu1 %v6730_v2 }
0x296a   :  { %v3834_v7 = vpop.f32.mrb[42].mxu1 }
0x296b   :  { %v3835_v9 = vadd.f32 %v7134_v22, %v3834_v7  ;;  %v6079_v10 = vpop.f32.mrb[43].mxu1 }
0x296d   :  { %v3838_v12 = vmin.f32 %v3835_v9, 30.0 }
0x296f   :  { %v3839_v13 = vmul.f32 1.442695, %v3838_v12 }
0x2971   :  { %6658 = vpow2.f32 %v3839_v13 }
0x297b   :  { %v6659_v14 = vpop.eup %6658 }
0x297c   :  { %v3841_v15 = vadd.f32 1.0, %v6659_v14 }
0x297e   :  { %v3842_v16 = vmul.f32 %v3841_v15, %v3841_v15 }
0x2980   :  { %v3845_v17 = vadd.f32 1.0, %v3842_v16  ;;  %v5355_v18 = vadd.f32 -1.0, %v3842_v16 }
0x2982   :  { %6660 = vrcp.f32 %v3845_v17  ;;  %v3844_v19 = vmul.f32 %v5355_v18, %v3835_v9 }
0x298c   :  { %v6661_v20 = vpop.eup %6660 }
0x298d   :  { %v3847_v21 = vmul.f32 %v6661_v20, %v3844_v19  ;;  %v5365_v19 = vld [vmem:[%s7451_s1 + $0x20] sm:$0xff] }
0x298f   :  { %6089 = vmatmul.mubr.msk.f32.vlgmr.msra.gmra.mrb[44].mxu0 %vm146_vm2, %v3847_v21 }
0x2990   :  { %6466 = vmatpush3.bf16.msra.mxu0 %v6812_v8  ;;  %6106 = vmatprep.mubr.msk.f32.mxu0 %vm6731_vm0, %v6732_v4 }
0x2991   :  { %6467 = vmatprep.subr.bf16.mxu0 %v6730_v2 }
0x2994   :  { %6469 = vmatpush3.bf16.msra.mxu0 %v6822_v11 }
0x2995   :  { %6476 = vmatprep.subr.bf16.mxu0 %v6730_v2 }
0x2a62   :  { %v3917_v23 = vpop.f32.mrb[44].mxu0 }
0x2a63   :  { %v3918_v24 = vadd.f32 %v7147_v39, %v3917_v23  ;;  %v6090_v25 = vpop.f32.mrb[45].mxu0  ;;  %v5367_v23 = vld [vmem:[%s7452_s2 + $0x3] ss:$0 sm:$0xff] }
0x2a65   :  { %v3922_v27 = vmul.f32 0.12836142, %v3918_v24 }
0x2a67   :  { %v3923_v29 = vsub.f32 %v3921_v26, %v3922_v27 }
0x2a69   :  { %v3924_v30 = vmax.f32 %v3923_v29, %v6874_v55 }
0x2a6b   :  { %v3925_v33 = vmin.f32 %v3924_v30, %v6876_v58 }
0x2a6d   :  { %v3926_v34 = vmul.f32 0.3274357, %v3925_v33 }
0x2a6f   :  { %v3928_v37 = vadd.f32 %v3927_v35, %v3926_v34 }
0x2a71   :  { %v3931_v38 = vadd.f32 %v5357_v36, %v3928_v37 }
0x2a73   :  { %6096 = vmatmul.mubr.msk.f32.vlgmr.msra.gmra.mrb[44].mxu1 %vm56_vm1, %v3931_v38  ;;  %v4179_v12 = vmul.f32 1.0055108, %v3931_v38  ;;  %v4185_v18 = vmul.f32 0.6088962, %v3931_v38 }
0x2a74   :  { %6472 = vmatpush3.bf16.msra.mxu1 %v6840_v28  ;;  %6117 = vmatprep.mubr.msk.f32.mxu1 %vm6731_vm0, %v6732_v4 }
0x2a75   :  { %6473 = vmatprep.subr.bf16.mxu1 %v6730_v2 }
0x2a78   :  { %6475 = vmatpush3.bf16.msra.mxu1 %v6850_v31 }
0x2a79   :  { %6479 = vmatprep.subr.bf16.mxu1 %v6730_v2 }
0x2b46   :  { %v4009_v41 = vpop.f32.mrb[44].mxu1 }
0x2b47   :  { %v4010_v42 = vadd.f32 %v5359_v40, %v4009_v41  ;;  %v6097_v43 = vpop.f32.mrb[45].mxu1 }
0x2b49   :  { %v4013_v44 = vmin.f32 %v4010_v42, 30.0 }
0x2b4b   :  { %v4014_v45 = vmul.f32 1.442695, %v4013_v44 }
0x2b4d   :  { %6662 = vpow2.f32 %v4014_v45 }
0x2b57   :  { %v6663_v46 = vpop.eup %6662 }
0x2b58   :  { %v4016_v47 = vadd.f32 1.0, %v6663_v46 }
0x2b5a   :  { %v4017_v49 = vmul.f32 %v4016_v47, %v4016_v47 }
0x2b5c   :  { %v4020_v50 = vadd.f32 1.0, %v4017_v49  ;;  %v5361_v51 = vadd.f32 -1.0, %v4017_v49 }
0x2b5e   :  { %6664 = vrcp.f32 %v4020_v50  ;;  %v4019_v52 = vmul.f32 %v5361_v51, %v4010_v42 }
0x2b68   :  { %v6665_v32 = vpop.eup %6664 }
0x2b69   :  { %v4022_v53 = vmul.f32 %v6665_v32, %v4019_v52 }
0x2b6b   :  { %6107 = vmatmul.mubr.msk.f32.vlgmr.msra.gmra.mrb[46].mxu0 %vm146_vm2, %v4022_v53 }
0x2b6c   :  { %6478 = vmatpush3.bf16.msra.mxu0 %v6788_v3  ;;  %6124 = vmatprep.mubr.msk.f32.mxu0 %vm6731_vm0, %v6732_v4 }
0x2b6d   :  { %6485 = vmatprep.subr.bf16.mxu0 %v6730_v2 }
0x2c3e   :  { %v4092_v54 = vpop.f32.mrb[46].mxu0 }
0x2c3f   :  { %v4093_v56 = vadd.f32 %v7134_v22, %v4092_v54  ;;  %v6108_v57 = vpop.f32.mrb[47].mxu0 }
0x2c41   :  { %v4096_v59 = vmin.f32 %v4093_v56, 30.0 }
0x2c43   :  { %v4097_v60 = vmul.f32 1.442695, %v4096_v59 }
0x2c45   :  { %6666 = vpow2.f32 %v4097_v60 }
0x2c4f   :  { %v6667_v61 = vpop.eup %6666 }
0x2c50   :  { %v4099_v62 = vadd.f32 1.0, %v6667_v61 }
0x2c52   :  { %v4100_v63 = vmul.f32 %v4099_v62, %v4099_v62 }
0x2c54   :  { %v4103_v0 = vadd.f32 1.0, %v4100_v63  ;;  %v5363_v1 = vadd.f32 -1.0, %v4100_v63 }
0x2c56   :  { %6668 = vrcp.f32 %v4103_v0  ;;  %v4102_v5 = vmul.f32 %v5363_v1, %v4093_v56 }
0x2c60   :  { %v6669_v48 = vpop.eup %6668 }
0x2c61   :  { %v4105_v6 = vmul.f32 %v6669_v48, %v4102_v5  ;;  %v5373_v5 = vld [vmem:[%s7451_s1 + $0x18] sm:$0xff] }
0x2c63   :  { %6118 = vmatmul.mubr.msk.f32.vlgmr.msra.gmra.mrb[46].mxu1 %vm146_vm2, %v4105_v6 }
0x2c64   :  { %6481 = vmatpush3.bf16.msra.mxu1 %v6812_v8  ;;  %6135 = vmatprep.mubr.msk.f32.mxu1 %vm6731_vm0, %v6732_v4 }
0x2c65   :  { %6482 = vmatprep.subr.bf16.mxu1 %v6730_v2 }
0x2c68   :  { %6484 = vmatpush3.bf16.msra.mxu1 %v6822_v11 }
0x2c69   :  { %6491 = vmatprep.subr.bf16.mxu1 %v6730_v2 }
0x2d36   :  { %v4175_v7 = vpop.f32.mrb[46].mxu1 }
0x2d37   :  { %v4176_v9 = vadd.f32 %v7147_v39, %v4175_v7  ;;  %v6119_v10 = vpop.f32.mrb[47].mxu1  ;;  %v5375_v7 = vld [vmem:[%s7452_s2 + $0x2] ss:$0 sm:$0xff] }
0x2d39   :  { %v4180_v13 = vmul.f32 0.105127916, %v4176_v9 }
0x2d3b   :  { %v4181_v14 = vsub.f32 %v4179_v12, %v4180_v13 }
0x2d3d   :  { %v4182_v15 = vmax.f32 %v4181_v14, %v6874_v55 }
0x2d3f   :  { %v4183_v16 = vmin.f32 %v4182_v15, %v6876_v58 }
0x2d41   :  { %v4184_v17 = vmul.f32 0.39110023, %v4183_v16 }
0x2d43   :  { %v4186_v20 = vadd.f32 %v4185_v18, %v4184_v17 }
0x2d45   :  { %v4189_v21 = vadd.f32 %v5365_v19, %v4186_v20 }
0x2d47   :  { %6125 = vmatmul.mubr.msk.f32.vlgmr.msra.gmra.mrb[48].mxu0 %vm56_vm1, %v4189_v21  ;;  %v4437_v59 = vmul.f32 1.0033519, %v4189_v21  ;;  %v4443_v1 = vmul.f32 0.51477754, %v4189_v21 }
0x2d48   :  { %6487 = vmatpush3.bf16.msra.mxu0 %v6840_v28  ;;  %6146 = vmatprep.mubr.msk.f32.mxu0 %vm6731_vm0, %v6732_v4 }
0x2d49   :  { %6488 = vmatprep.subr.bf16.mxu0 %v6730_v2 }
0x2d4c   :  { %6490 = vmatpush3.bf16.msra.mxu0 %v6850_v31 }
0x2d4d   :  { %6494 = vmatprep.subr.bf16.mxu0 %v6730_v2 }
0x2e1a   :  { %v4267_v24 = vpop.f32.mrb[48].mxu0 }
0x2e1b   :  { %v4268_v25 = vadd.f32 %v5367_v23, %v4267_v24  ;;  %v6126_v26 = vpop.f32.mrb[49].mxu0 }
0x2e1d   :  { %v4271_v27 = vmin.f32 %v4268_v25, 30.0 }
0x2e1f   :  { %v4272_v29 = vmul.f32 1.442695, %v4271_v27 }
0x2e21   :  { %6670 = vpow2.f32 %v4272_v29 }
0x2e2b   :  { %v6671_v30 = vpop.eup %6670 }
0x2e2c   :  { %v4274_v33 = vadd.f32 1.0, %v6671_v30 }
0x2e2e   :  { %v4275_v34 = vmul.f32 %v4274_v33, %v4274_v33 }
0x2e30   :  { %v4278_v35 = vadd.f32 1.0, %v4275_v34  ;;  %v5369_v36 = vadd.f32 -1.0, %v4275_v34 }
0x2e32   :  { %6672 = vrcp.f32 %v4278_v35  ;;  %v4277_v37 = vmul.f32 %v5369_v36, %v4268_v25 }
0x2e3c   :  { %v6673_v38 = vpop.eup %6672 }
0x2e3d   :  { %v4280_v40 = vmul.f32 %v6673_v38, %v4277_v37 }
0x2e3f   :  { %6136 = vmatmul.mubr.msk.f32.vlgmr.msra.gmra.mrb[48].mxu1 %vm146_vm2, %v4280_v40 }
0x2e40   :  { %6493 = vmatpush3.bf16.msra.mxu1 %v6788_v3  ;;  %6153 = vmatprep.mubr.msk.f32.mxu1 %vm6731_vm0, %v6732_v4 }
0x2e41   :  { %6500 = vmatprep.subr.bf16.mxu1 %v6730_v2 }
0x2f12   :  { %v4350_v41 = vpop.f32.mrb[48].mxu1 }
0x2f13   :  { %v4351_v42 = vadd.f32 %v7134_v22, %v4350_v41  ;;  %v6137_v43 = vpop.f32.mrb[49].mxu1 }
0x2f15   :  { %v4354_v44 = vmin.f32 %v4351_v42, 30.0 }
0x2f17   :  { %v4355_v45 = vmul.f32 1.442695, %v4354_v44 }
0x2f19   :  { %6674 = vpow2.f32 %v4355_v45 }
0x2f23   :  { %v6675_v46 = vpop.eup %6674 }
0x2f24   :  { %v4357_v47 = vadd.f32 1.0, %v6675_v46 }
0x2f26   :  { %v4358_v49 = vmul.f32 %v4357_v47, %v4357_v47 }
0x2f28   :  { %v4361_v50 = vadd.f32 1.0, %v4358_v49  ;;  %v5371_v51 = vadd.f32 -1.0, %v4358_v49 }
0x2f2a   :  { %6676 = vrcp.f32 %v4361_v50  ;;  %v4360_v52 = vmul.f32 %v5371_v51, %v4351_v42  ;;  %v5381_v51 = vld [vmem:[%s7451_s1 + $0x10] sm:$0xff] }
0x2f34   :  { %v6677_v32 = vpop.eup %6676 }
0x2f35   :  { %v4363_v53 = vmul.f32 %v6677_v32, %v4360_v52 }
0x2f37   :  { %6147 = vmatmul.mubr.msk.f32.vlgmr.msra.gmra.mrb[50].mxu0 %vm146_vm2, %v4363_v53 }
0x2f38   :  { %6496 = vmatpush3.bf16.msra.mxu0 %v6812_v8  ;;  %6164 = vmatprep.mubr.msk.f32.mxu0 %vm6731_vm0, %v6732_v4 }
0x2f39   :  { %6497 = vmatprep.subr.bf16.mxu0 %v6730_v2 }
0x2f3c   :  { %6499 = vmatpush3.bf16.msra.mxu0 %v6822_v11 }
0x2f3d   :  { %6506 = vmatprep.subr.bf16.mxu0 %v6730_v2 }
0x300a   :  { %v4433_v54 = vpop.f32.mrb[50].mxu0 }
0x300b   :  { %v4434_v56 = vadd.f32 %v7147_v39, %v4433_v54  ;;  %v6148_v57 = vpop.f32.mrb[51].mxu0 }
0x300d   :  { %v4438_v60 = vmul.f32 0.08194509, %v4434_v56 }
0x300f   :  { %v4439_v61 = vsub.f32 %v4437_v59, %v4438_v60 }
0x3011   :  { %v4440_v62 = vmax.f32 %v4439_v61, %v6874_v55 }
0x3013   :  { %v4441_v63 = vmin.f32 %v4440_v62, %v6876_v58 }
0x3015   :  { %v4442_v0 = vmul.f32 0.48522103, %v4441_v63 }
0x3017   :  { %v4444_v48 = vadd.f32 %v4443_v1, %v4442_v0 }
0x3019   :  { %v4447_v6 = vadd.f32 %v5373_v5, %v4444_v48 }
0x301b   :  { %6154 = vmatmul.mubr.msk.f32.vlgmr.msra.gmra.mrb[50].mxu1 %vm56_vm1, %v4447_v6  ;;  %v4695_v43 = vmul.f32 1.0017241, %v4447_v6  ;;  %v4701_v50 = vmul.f32 0.3622543, %v4447_v6 }
0x301c   :  { %6502 = vmatpush3.bf16.msra.mxu1 %v6840_v28  ;;  %6175 = vmatprep.mubr.msk.f32.mxu1 %vm6731_vm0, %v6732_v4 }
0x301d   :  { %6503 = vmatprep.subr.bf16.mxu1 %v6730_v2 }
0x3020   :  { %6505 = vmatpush3.bf16.msra.mxu1 %v6850_v31 }
0x3021   :  { %6509 = vmatprep.subr.bf16.mxu1 %v6730_v2 }
0x30ee   :  { %v4525_v9 = vpop.f32.mrb[50].mxu1 }
0x30ef   :  { %v4526_v10 = vadd.f32 %v5375_v7, %v4525_v9  ;;  %v6155_v12 = vpop.f32.mrb[51].mxu1  ;;  %v6704_v7 = vld [vmem:[%s7455_s5] ss:$0 sm:$0xff] }
0x30f1   :  { %v4529_v13 = vmin.f32 %v4526_v10, 30.0 }
0x30f3   :  { %v4530_v14 = vmul.f32 1.442695, %v4529_v13 }
0x30f5   :  { %6678 = vpow2.f32 %v4530_v14 }
0x30ff   :  { %v6679_v15 = vpop.eup %6678 }
0x3100   :  { %v4532_v16 = vadd.f32 1.0, %v6679_v15 }
0x3102   :  { %v4533_v17 = vmul.f32 %v4532_v16, %v4532_v16 }
0x3104   :  { %v4536_v18 = vadd.f32 1.0, %v4533_v17  ;;  %v5377_v19 = vadd.f32 -1.0, %v4533_v17 }
0x3106   :  { %6680 = vrcp.f32 %v4536_v18  ;;  %v4535_v20 = vmul.f32 %v5377_v19, %v4526_v10 }
0x3110   :  { %v6681_v21 = vpop.eup %6680 }
0x3111   :  { %v4538_v23 = vmul.f32 %v6681_v21, %v4535_v20 }
0x3113   :  { %6165 = vmatmul.mubr.msk.f32.vlgmr.msra.gmra.mrb[52].mxu0 %vm146_vm2, %v4538_v23  ;;  %v6705_v23 = vld [vmem:[%s7457_s7] ss:$0 sm:$0xff] }
0x3114   :  { %6508 = vmatpush3.bf16.msra.mxu0 %v6788_v3  ;;  %6182 = vmatprep.mubr.msk.f32.mxu0 %vm6731_vm0, %v6732_v4 }
0x3115   :  { %6515 = vmatprep.subr.bf16.mxu0 %v6730_v2 }
0x31e6   :  { %v4608_v24 = vpop.f32.mrb[52].mxu0 }
0x31e7   :  { %v4609_v25 = vadd.f32 %v7134_v22, %v4608_v24  ;;  %v6166_v26 = vpop.f32.mrb[53].mxu0 }
0x31e9   :  { %v4612_v27 = vmin.f32 %v4609_v25, 30.0 }
0x31eb   :  { %v4613_v29 = vmul.f32 1.442695, %v4612_v27 }
0x31ed   :  { %6682 = vpow2.f32 %v4613_v29 }
0x31f7   :  { %v6683_v30 = vpop.eup %6682 }
0x31f8   :  { %v4615_v33 = vadd.f32 1.0, %v6683_v30 }
0x31fa   :  { %v4616_v34 = vmul.f32 %v4615_v33, %v4615_v33 }
0x31fc   :  { %v4619_v35 = vadd.f32 1.0, %v4616_v34  ;;  %v5379_v36 = vadd.f32 -1.0, %v4616_v34 }
0x31fe   :  { %6684 = vrcp.f32 %v4619_v35  ;;  %v4618_v37 = vmul.f32 %v5379_v36, %v4609_v25 }
0x3208   :  { %v6685_v38 = vpop.eup %6684 }
0x3209   :  { %v4621_v40 = vmul.f32 %v6685_v38, %v4618_v37  ;;  %v5390_v37 = vld [vmem:[%s7452_s2] ss:$0 sm:$0xff] }
0x320b   :  { %6176 = vmatmul.mubr.msk.f32.vlgmr.msra.gmra.mrb[52].mxu1 %vm146_vm2, %v4621_v40 }
0x320c   :  { %6511 = vmatpush3.bf16.msra.mxu1 %v6812_v8  ;;  %6193 = vmatprep.mubr.msk.f32.mxu1 %vm6731_vm0, %v6732_v4 }
0x320d   :  { %6512 = vmatprep.subr.bf16.mxu1 %v6730_v2 }
0x3210   :  { %6514 = vmatpush3.bf16.msra.mxu1 %v6822_v11 }
0x3211   :  { %6521 = vmatprep.subr.bf16.mxu1 %v6730_v2 }
0x32de   :  { %v4691_v22 = vpop.f32.mrb[52].mxu1 }
0x32df   :  { %v4692_v41 = vadd.f32 %v7147_v39, %v4691_v22  ;;  %v6177_v42 = vpop.f32.mrb[53].mxu1  ;;  %v5383_v39 = vld [vmem:[%s7452_s2 + $0x1] ss:$0 sm:$0xff] }
0x32e1   :  { %v4696_v44 = vmul.f32 0.058746256, %v4692_v41 }
0x32e3   :  { %v4697_v45 = vsub.f32 %v4695_v43, %v4696_v44 }
0x32e5   :  { %v4698_v46 = vmax.f32 %v4697_v45, %v6874_v55 }
0x32e7   :  { %v4699_v47 = vmin.f32 %v4698_v46, %v6876_v58 }
0x32e9   :  { %v4700_v49 = vmul.f32 0.6377454, %v4699_v47 }
0x32eb   :  { %v4702_v52 = vadd.f32 %v4701_v50, %v4700_v49 }
0x32ed   :  { %v4705_v32 = vadd.f32 %v5381_v51, %v4702_v52 }
0x32ef   :  { %6183 = vmatmul.mubr.msk.f32.vlgmr.msra.gmra.mrb[54].mxu0 %vm56_vm1, %v4705_v32  ;;  %v4953_v26 = vmul.f32 1.0006242, %v4705_v32  ;;  %v4959_v34 = vmul.f32 0.080130145, %v4705_v32 }
0x32f0   :  { %6517 = vmatpush3.bf16.msra.mxu0 %v6840_v28  ;;  %6204 = vmatprep.mubr.msk.f32.mxu0 %vm6731_vm0, %v6732_v4 }
0x32f1   :  { %6518 = vmatprep.subr.bf16.mxu0 %v6730_v2 }
0x32f4   :  { %6520 = vmatpush3.bf16.msra.mxu0 %v6850_v31 }
0x32f5   :  { %6524 = vmatprep.subr.bf16.mxu0 %v6730_v2 }
0x33c2   :  { %v4783_v53 = vpop.f32.mrb[54].mxu0 }
0x33c3   :  { %v4784_v54 = vadd.f32 %v5383_v39, %v4783_v53  ;;  %v6184_v56 = vpop.f32.mrb[55].mxu0 }
0x33c5   :  { %v4787_v57 = vmin.f32 %v4784_v54, 30.0 }
0x33c7   :  { %v4788_v59 = vmul.f32 1.442695, %v4787_v57 }
0x33c9   :  { %6686 = vpow2.f32 %v4788_v59 }
0x33d3   :  { %v6687_v60 = vpop.eup %6686 }
0x33d4   :  { %v4790_v61 = vadd.f32 1.0, %v6687_v60 }
0x33d6   :  { %v4791_v62 = vmul.f32 %v4790_v61, %v4790_v61 }
0x33d8   :  { %v4794_v63 = vadd.f32 1.0, %v4791_v62  ;;  %v5385_v0 = vadd.f32 -1.0, %v4791_v62 }
0x33da   :  { %6688 = vrcp.f32 %v4794_v63  ;;  %v4793_v1 = vmul.f32 %v5385_v0, %v4784_v54 }
0x33e4   :  { %v6689_v5 = vpop.eup %6688 }
0x33e5   :  { %v4796_v48 = vmul.f32 %v6689_v5, %v4793_v1 }
0x33e7   :  { %6194 = vmatmul.mubr.msk.f32.vlgmr.msra.gmra.mrb[54].mxu1 %vm146_vm2, %v4796_v48 }
0x33e8   :  { %6523 = vmatpush3.bf16.msra.mxu1 %v6788_v3  ;;  %6211 = vmatprep.mubr.msk.f32.mxu1 %vm6731_vm0, %v6732_v4 }
0x33e9   :  { %6530 = vmatprep.subr.bf16.mxu1 %v6730_v2 }
0x34ba   :  { %v4866_v6 = vpop.f32.mrb[54].mxu1 }
0x34bb   :  { %v4867_v9 = vadd.f32 %v6704_v7, %v4866_v6  ;;  %v6195_v10 = vpop.f32.mrb[55].mxu1 }
0x34bd   :  { %v4870_v12 = vmin.f32 %v4867_v9, 30.0 }
0x34bf   :  { %v4871_v13 = vmul.f32 1.442695, %v4870_v12 }
0x34c1   :  { %6690 = vpow2.f32 %v4871_v13 }
0x34cb   :  { %v6691_v14 = vpop.eup %6690 }
0x34cc   :  { %v4873_v15 = vadd.f32 1.0, %v6691_v14 }
0x34ce   :  { %v4874_v16 = vmul.f32 %v4873_v15, %v4873_v15 }
0x34d0   :  { %v4877_v17 = vadd.f32 1.0, %v4874_v16  ;;  %v5387_v3 = vadd.f32 -1.0, %v4874_v16 }
0x34d2   :  { %6692 = vrcp.f32 %v4877_v17  ;;  %v4876_v18 = vmul.f32 %v5387_v3, %v4867_v9  ;;  %v5217_v9 = vld [vmem:[%s7451_s1] sm:$0xff] }
0x34dc   :  { %v6693_v19 = vpop.eup %6692 }
0x34dd   :  { %v4879_v20 = vmul.f32 %v6693_v19, %v4876_v18 }
0x34df   :  { %6205 = vmatmul.mubr.msk.f32.vlgmr.msra.gmra.mrb[56].mxu0 %vm146_vm2, %v4879_v20 }
0x34e0   :  { %6526 = vmatpush3.bf16.msra.mxu0 %v6812_v8  ;;  %6222 = vmatprep.mubr.msk.f32.mxu0 %vm6731_vm0, %v6732_v4 }
0x34e1   :  { %6527 = vmatprep.subr.bf16.mxu0 %v6730_v2 }
0x34e4   :  { %6529 = vmatpush3.bf16.msra.mxu0 %v6822_v11  ;;  %v5389_v11 = vld [vmem:[%s7451_s1 + $0x8] sm:$0xff] }
0x35b2   :  { %v4949_v21 = vpop.f32.mrb[56].mxu0 }
0x35b3   :  { %v4950_v24 = vadd.f32 %v6705_v23, %v4949_v21  ;;  %v6206_v25 = vpop.f32.mrb[57].mxu0 }
0x35b5   :  { %v4954_v27 = vmul.f32 0.035338525, %v4950_v24 }
0x35b7   :  { %v4955_v29 = vsub.f32 %v4953_v26, %v4954_v27 }
0x35b9   :  { %v4956_v30 = vmax.f32 %v4955_v29, %v6874_v55 }
0x35bb   :  { %v4957_v8 = vmin.f32 %v4956_v30, %v6876_v58 }
0x35bd   :  { %v4958_v33 = vmul.f32 0.91986984, %v4957_v8 }
0x35bf   :  { %v4960_v35 = vadd.f32 %v4959_v34, %v4958_v33 }
0x35c1   :  { %v4963_v36 = vadd.f32 %v5389_v11, %v4960_v35 }
0x35c3   :  { %6212 = vmatmul.mubr.msk.f32.vlgmr.msra.gmra.mrb[56].mxu1 %vm56_vm1, %v4963_v36  ;;  %v5210_v0 = vmul.f32 1.00005, %v4963_v36 }
0x35c4   :  { %6532 = vmatpush3.bf16.msra.mxu1 %v6840_v28  ;;  %6233 = vmatprep.mubr.msk.f32.mxu1 %vm6731_vm0, %v6732_v4 }
0x35c5   :  { %6533 = vmatprep.subr.bf16.mxu1 %v6730_v2 }
0x35c8   :  { %6535 = vmatpush3.bf16.msra.mxu1 %v6850_v31 }
0x3696   :  { %v5040_v38 = vpop.f32.mrb[56].mxu1 }
0x3697   :  { %v5041_v40 = vadd.f32 %v5390_v37, %v5040_v38  ;;  %v6213_v22 = vpop.f32.mrb[57].mxu1 }
0x3699   :  { %v5044_v41 = vmin.f32 %v5041_v40, 30.0 }
0x369b   :  { %v5045_v42 = vmul.f32 1.442695, %v5044_v41 }
0x369d   :  { %6694 = vpow2.f32 %v5045_v42 }
0x36a7   :  { %v6695_v43 = vpop.eup %6694 }
0x36a8   :  { %v5047_v44 = vadd.f32 1.0, %v6695_v43 }
0x36aa   :  { %v5048_v28 = vmul.f32 %v5047_v44, %v5047_v44 }
0x36ac   :  { %v5051_v45 = vadd.f32 1.0, %v5048_v28  ;;  %v5392_v4 = vadd.f32 -1.0, %v5048_v28 }
0x36ae   :  { %6696 = vrcp.f32 %v5051_v45  ;;  %v5050_v46 = vmul.f32 %v5392_v4, %v5041_v40 }
0x36b8   :  { %v6697_v2 = vpop.eup %6696 }
0x36b9   :  { %v5053_v47 = vmul.f32 %v6697_v2, %v5050_v46 }
0x36bb   :  { %6223 = vmatmul.mubr.msk.f32.vlgmr.msra.gmra.mrb[58].mxu0 %vm146_vm2, %v5053_v47 }
0x378e   :  { %v5123_v31 = vpop.f32.mrb[58].mxu0 }
0x378f   :  { %v5124_v49 = vadd.f32 %v6704_v7, %v5123_v31  ;;  %v6224_v50 = vpop.f32.mrb[59].mxu0  ;;  %v5215_v7 = vmul.f32 0.0, %v4963_v36 }
0x3791   :  { %v5127_v51 = vmin.f32 %v5124_v49, 30.0 }
0x3793   :  { %v5128_v52 = vmul.f32 1.442695, %v5127_v51 }
0x3795   :  { %6698 = vpow2.f32 %v5128_v52 }
0x379f   :  { %v6699_v32 = vpop.eup %6698 }
0x37a0   :  { %v5130_v39 = vadd.f32 1.0, %v6699_v32 }
0x37a2   :  { %v5131_v53 = vmul.f32 %v5130_v39, %v5130_v39 }
0x37a4   :  { %v5134_v54 = vadd.f32 1.0, %v5131_v53  ;;  %v5394_v56 = vadd.f32 -1.0, %v5131_v53 }
0x37a6   :  { %6700 = vrcp.f32 %v5134_v54  ;;  %v5133_v57 = vmul.f32 %v5394_v56, %v5124_v49 }
0x37b0   :  { %v6701_v59 = vpop.eup %6700 }
0x37b1   :  { %v5136_v60 = vmul.f32 %v6701_v59, %v5133_v57 }
0x37b3   :  { %6234 = vmatmul.mubr.msk.f32.vlgmr.msra.gmra.mrb[58].mxu1 %vm146_vm2, %v5136_v60 }
0x3886   :  { %v5206_v61 = vpop.f32.mrb[58].mxu1 }
0x3887   :  { %v5207_v62 = vadd.f32 %v6705_v23, %v5206_v61  ;;  %v6235_v63 = vpop.f32.mrb[59].mxu1 }
0x3889   :  { %v5211_v1 = vmul.f32 0.0100005, %v5207_v62 }
0x388b   :  { %v5212_v5 = vsub.f32 %v5210_v0, %v5211_v1 }
0x388d   :  { %v5213_v48 = vmax.f32 %v5212_v5, %v6874_v55 }
0x388f   :  { %v5214_v6 = vmin.f32 %v5213_v48, %v6876_v58 }
0x3891   :  { %v5216_v10 = vadd.f32 %v5215_v7, %v5214_v6 }
0x3893   :  { %v5218_v12 = vadd.f32 %v5217_v9, %v5216_v10 }
0x3895   :  { %v5219_v13 = vmax.f32 %v5218_v12, %v6874_v55 }
0x3897   :  { %v5220_v14 = vmin.f32 %v5219_v13, %v6876_v58 }
0x3899   :  { %5221 = vst.msk [vmem:[#allocation2] sm:$0xff] %vm56_vm1, %v5220_v14 }
0x389a   :  { %6717 = shalt.err (!%p6714_p4)
}
0x389b   :  { %s6718_s14 = scalar_lea.hbm %s7458_s8, 128 }
0x389c   :  { %p6719_p5 = scmp.ne.s32.totalorder %s7458_s8, %s6718_s14  ;;  %p6722_p6 = scmp.lt.u32.totalorder %s6718_s14, %s7458_s8 }
0x389e   :  { %p6724_p7 = pnand %p6722_p6, %p6719_p5 }
0x38a0   :  { %6727 = shalt.err (!%p6724_p7)
}
0x38a1   :  { %5231 = dma.vmem_to_hbm [thread:$0]  %s5229_s12, 128, %s7458_s8, [#allocation3]  }
0x38a2   :  { %6728 = dma.done.wait [#allocation3], 128  }
0x38a3   :  { %6729 = vsyncadd [#allocation3], 4294967168 }
0x38a4   :  { %5235 = vsyncpa [#allocation3], 1 }

</bundles_post_ra>
